<compile_context>
chip_gen: v7x
topology: tpu7x:2x2x1
jax: 0.10.0
libtpu: 0.0.40
codegen_flags: <defaults>
</compile_context>

<pallas_src>
import functools
import math

import jax
import jax.numpy as jnp
from jax import lax
from jax.experimental import pallas as pl
from jax.experimental.pallas import tpu as pltpu

_GN_EPS = 1e-6   # nn.GroupNorm(32, C, eps=1e-06)
_LN_EPS = 1e-5   # nn.LayerNorm default eps


def _erf(x):
    # Abramowitz & Stegun 7.1.26 rational approximation, |err| <= 1.5e-7.
    a1, a2, a3, a4, a5 = (0.254829592, -0.284496736, 1.421413741,
                          -1.453152027, 1.061405429)
    p = 0.3275911
    s = jnp.where(x >= 0.0, 1.0, -1.0)
    ax = jnp.abs(x)
    t = 1.0 / (1.0 + p * ax)
    poly = ((((a5 * t + a4) * t + a3) * t + a2) * t + a1) * t
    return s * (1.0 - poly * jnp.exp(-ax * ax))


def _gelu_exact(x):
    return 0.5 * x * (1.0 + _erf(x * 0.7071067811865476))


def _layernorm(x, gamma, beta):
    mu = jnp.mean(x, axis=-1, keepdims=True)
    d = x - mu
    var = jnp.mean(d * d, axis=-1, keepdims=True)
    return d * lax.rsqrt(var + _LN_EPS) * gamma + beta


def _attention_block_kernel(
    x_ref,                          # (C, S)  original input, channels-first
    ohcg_ref, ohgc_ref,             # (C, G) * 1/(S*cg), (G, C)  GroupNorm one-hots
    gn_g_ref, gn_b_ref,             # (1, C)   GroupNorm affine
    wci_ref, bci_ref,               # (C, C), (1, C)   conv_input (1x1) as GEMM
    ln1_g_ref, ln1_b_ref,           # (1, C)
    wqkv_ref,                       # (C, 3C)  fused in_proj, Q cols pre-scaled
    wo_ref, bo_ref,                 # (C, C), (1, C)   out_proj
    ln2_g_ref, ln2_b_ref,           # (1, C)
    wg1_ref, bg1_ref,               # (C, 8C), (1, 8C) fused GEGLU linear
    wg2_ref, bg2_ref,               # (4C, C), (1, C)  linear_geglu_2
    wco_ref, bco_ref,               # (C, C), (1, C)   conv_output (1x1) as GEMM
    o_ref,                          # (C, S)
    *, n_head, d_head,
):
    f32 = jnp.float32
    x_cs = x_ref[...].astype(f32)                 # (C, S)  residue_long (chan-first)
    x = x_cs.T                                    # (S, C)  single in-VMEM relayout
    S, C = x.shape

    # ---------------- GroupNorm(32, C, eps=1e-6) ----------------
    sum_c = jnp.sum(x, axis=0, keepdims=True)                                # (1,C)
    mean_g = jnp.dot(sum_c, ohcg_ref[...], preferred_element_type=f32)       # (1,G)
    mean_c = jnp.dot(mean_g, ohgc_ref[...], preferred_element_type=f32)      # (1,C)
    d = x - mean_c
    ssq_c = jnp.sum(d * d, axis=0, keepdims=True)                            # (1,C)
    var_g = jnp.dot(ssq_c, ohcg_ref[...], preferred_element_type=f32)        # (1,G)
    var_c = jnp.dot(var_g, ohgc_ref[...], preferred_element_type=f32)        # (1,C)
    h = d * lax.rsqrt(var_c + _GN_EPS) * gn_g_ref[...] + gn_b_ref[...]

    # ---------------- conv_input: 1x1 conv == per-pixel GEMM ----------------
    h = jnp.dot(h, wci_ref[...], preferred_element_type=f32) + bci_ref[...]
    residue_short = h

    # ---------------- LayerNorm 1 + multi-head self-attention ----------------
    hn = _layernorm(h, ln1_g_ref[...], ln1_b_ref[...])
    qkv = jnp.dot(hn, wqkv_ref[...], preferred_element_type=f32)             # (S,3C)

    # Accumulate the output projection per head (no concatenate). The 1/sqrt(dh)
    # scale is already folded into the Q columns of wqkv.
    # TODO(synk): convert to lax.fori_loop + flash-style KV tiling for large S.
    attn = residue_short + bo_ref[...]
    for head in range(n_head):
        lo = head * d_head
        qh = qkv[:, lo:lo + d_head]
        kh = qkv[:, C + lo:C + lo + d_head]
        vh = qkv[:, 2 * C + lo:2 * C + lo + d_head]
        sc = lax.dot_general(qh, kh, (((1,), (1,)), ((), ())),
                             preferred_element_type=f32)                     # (S,S)
        m = jnp.max(sc, axis=-1, keepdims=True)
        e = jnp.exp(sc - m)
        p = e * pl.reciprocal(jnp.sum(e, axis=-1, keepdims=True), approx=True)
        oh = jnp.dot(p, vh, preferred_element_type=f32)                      # (S,dh)
        attn = attn + jnp.dot(oh, wo_ref[lo:lo + d_head, :],
                              preferred_element_type=f32)                    # (S,C)
    h = attn
    residue_short = h

    # ---------------- LayerNorm 2 + GEGLU (single fused GEMM) ----------------
    hn = _layernorm(h, ln2_g_ref[...], ln2_b_ref[...])
    z = jnp.dot(hn, wg1_ref[...], preferred_element_type=f32) + bg1_ref[...]  # (S,8C)
    four_c = 4 * C
    a = z[:, :four_c]
    g = z[:, four_c:]
    h = jnp.dot(a * _gelu_exact(g), wg2_ref[...],
                preferred_element_type=f32) + bg2_ref[...]
    h = h + residue_short

    # ---------------- conv_output (1x1) + long residual ----------------
    out = jnp.dot(h, wco_ref[...], preferred_element_type=f32) + bco_ref[...]
    o_ref[...] = (out.T + x_cs).astype(o_ref.dtype)       # back to channels-first


@functools.partial(jax.jit, static_argnames=("n_head", "num_groups"))
def attention_block_pallas(x_nchw, params, *, n_head, num_groups=32):
    B, C, H, W = x_nchw.shape
    S = H * W
    d_head = C // n_head
    cg = C // num_groups
    f32 = jnp.float32

    # NCHW -> (B, C, S) is a free reshape (no data movement); the transpose to
    # channels-last happens on the VMEM tile inside the kernel, so activations
    # make exactly one HBM round trip.
    x_bcs = x_nchw.reshape(B, C, S)

    row = lambda a: a.reshape(1, -1).astype(f32)

    # GroupNorm one-hot channel<->group matrices, hoisted out of the kernel.
    ch = jnp.arange(C) // cg
    grp = jnp.arange(num_groups)
    oh_cg = (ch[:, None] == grp[None, :]).astype(f32) / float(S * cg)   # (C, G)
    oh_gc = (grp[:, None] == ch[None, :]).astype(f32)                   # (G, C)

    # Fused QKV weight with the attention scale folded into the Q columns.
    w_in = params["in_proj_w"].astype(f32)                              # (3C, C)
    scale = 1.0 / math.sqrt(d_head)
    qkv_scale = jnp.concatenate(
        [jnp.full((C,), scale, f32), jnp.ones((2 * C,), f32)])
    w_qkv = w_in.T * qkv_scale[None, :]                                 # (C, 3C)

    inputs = (
        x_bcs,
        oh_cg, oh_gc,
        row(params["gn_w"]), row(params["gn_b"]),
        params["ci_w"].reshape(C, C).T.astype(f32), row(params["ci_b"]),
        row(params["ln1_w"]), row(params["ln1_b"]),
        w_qkv,
        params["out_proj_w"].T.astype(f32), row(params["out_proj_b"]),
        row(params["ln2_w"]), row(params["ln2_b"]),
        params["g1_w"].T.astype(f32), row(params["g1_b"]),              # (C,8C),(1,8C)
        params["g2_w"].T.astype(f32), row(params["g2_b"]),              # (4C,C),(1,C)
        params["co_w"].reshape(C, C).T.astype(f32), row(params["co_b"]),
    )

    def resident(shape):
        # Whole array, constant index map -> fetched once and kept in VMEM for
        # every grid step; single-buffered so no VMEM is wasted double-buffering.
        return pl.BlockSpec(shape, lambda b: (0,) * len(shape),
                            pipeline_mode=pl.Buffered(1))

    in_specs = [pl.BlockSpec((None, C, S), lambda b: (b, 0, 0))]
    in_specs += [resident(t.shape) for t in inputs[1:]]

    kernel = functools.partial(_attention_block_kernel,
                               n_head=n_head, d_head=d_head)

    out_bcs = pl.pallas_call(
        kernel,
        out_shape=jax.ShapeDtypeStruct((B, C, S), x_nchw.dtype),
        grid_spec=pltpu.PrefetchScalarGridSpec(
            num_scalar_prefetch=0,
            grid=(B,),
            in_specs=in_specs,
            out_specs=pl.BlockSpec((None, C, S), lambda b: (b, 0, 0)),
        ),
        compiler_params=pltpu.CompilerParams(
            dimension_semantics=("parallel",),
            # 32 MiB is load-bearing on v5e (16 MiB default); raise toward
            # 64-100 MiB on v6e when scaling C/S instead of shrinking tiles.
            vmem_limit_bytes=32 * 1024 * 1024,
        ),
    )(*inputs)

    return out_bcs.reshape(B, C, H, W)


# ---------------------------- pure-JAX reference ----------------------------
def _reference_attention_block(x, params, *, n_head, num_groups=32):
    HI = lax.Precision.HIGHEST
    B, C, H, W = x.shape
    S = H * W
    d_head = C // n_head

    xg = x.reshape(B, num_groups, C // num_groups, H, W)
    mu = xg.mean(axis=(2, 3, 4), keepdims=True)
    var = xg.var(axis=(2, 3, 4), keepdims=True)
    h = ((xg - mu) / jnp.sqrt(var + _GN_EPS)).reshape(B, C, H, W)
    h = h * params["gn_w"].reshape(1, C, 1, 1) + params["gn_b"].reshape(1, C, 1, 1)

    h = (jnp.einsum("bchw,oc->bohw", h, params["ci_w"].reshape(C, C), precision=HI)
         + params["ci_b"].reshape(1, C, 1, 1))

    t = h.reshape(B, C, S).transpose(0, 2, 1)
    residue_short = t

    def layernorm(z, g, b):
        mu = z.mean(-1, keepdims=True)
        var = z.var(-1, keepdims=True)
        return (z - mu) / jnp.sqrt(var + _LN_EPS) * g + b

    t = layernorm(t, params["ln1_w"], params["ln1_b"])
    qkv = jnp.einsum("bsc,dc->bsd", t, params["in_proj_w"], precision=HI)
    q, k, v = jnp.split(qkv, 3, axis=-1)
    heads = lambda z: z.reshape(B, S, n_head, d_head).transpose(0, 2, 1, 3)
    q, k, v = heads(q), heads(k), heads(v)
    w = jnp.einsum("bhqd,bhkd->bhqk", q, k, precision=HI) / math.sqrt(d_head)
    w = jax.nn.softmax(w, axis=-1)
    o = jnp.einsum("bhqk,bhkd->bhqd", w, v, precision=HI)
    o = o.transpose(0, 2, 1, 3).reshape(B, S, C)
    o = (jnp.einsum("bsc,dc->bsd", o, params["out_proj_w"], precision=HI)
         + params["out_proj_b"])
    t = o + residue_short
    residue_short = t

    t = layernorm(t, params["ln2_w"], params["ln2_b"])
    z = jnp.einsum("bsc,dc->bsd", t, params["g1_w"], precision=HI) + params["g1_b"]
    a, gate = jnp.split(z, 2, axis=-1)
    gelu = 0.5 * gate * (1.0 + lax.erf(gate / math.sqrt(2.0)))
    t = (jnp.einsum("bsc,dc->bsd", a * gelu, params["g2_w"], precision=HI)
         + params["g2_b"])
    t = t + residue_short

    h = t.transpose(0, 2, 1).reshape(B, C, H, W)
    out = (jnp.einsum("bchw,oc->bohw", h, params["co_w"].reshape(C, C), precision=HI)
           + params["co_b"].reshape(1, C, 1, 1))
    return out + x


if __name__ == "__main__":
    n_head, n_embd = 4, 16
    C = n_head * n_embd        # 64 — divisible by 32 as GroupNorm(32, C) requires
    B, H, W = 2, 8, 8

    key = jax.random.PRNGKey(0)
    ks = jax.random.split(key, 18)

    def uni(k, shape, fan_in):
        bound = 1.0 / math.sqrt(fan_in)
        return jax.random.uniform(k, shape, jnp.float32, -bound, bound)

    x = jax.random.normal(ks[0], (B, C, H, W), dtype=jnp.float32)
    params = {
        "gn_w": 1.0 + 0.1 * jax.random.normal(ks[1], (C,), jnp.float32),
        "gn_b": 0.1 * jax.random.normal(ks[2], (C,), jnp.float32),
        "ci_w": uni(ks[3], (C, C, 1, 1), C),
        "ci_b": uni(ks[4], (C,), C),
        "ln1_w": 1.0 + 0.1 * jax.random.normal(ks[5], (C,), jnp.float32),
        "ln1_b": 0.1 * jax.random.normal(ks[6], (C,), jnp.float32),
        "in_proj_w": uni(ks[7], (3 * C, C), C),          # no in_proj bias
        "out_proj_w": uni(ks[8], (C, C), C),
        "out_proj_b": uni(ks[9], (C,), C),
        "ln2_w": 1.0 + 0.1 * jax.random.normal(ks[10], (C,), jnp.float32),
        "ln2_b": 0.1 * jax.random.normal(ks[11], (C,), jnp.float32),
        "g1_w": uni(ks[12], (8 * C, C), C),              # nn.Linear(C, 8C)
        "g1_b": uni(ks[13], (8 * C,), C),
        "g2_w": uni(ks[14], (C, 4 * C), 4 * C),          # nn.Linear(4C, C): (out, in)
        "g2_b": uni(ks[15], (C,), 4 * C),
        "co_w": uni(ks[16], (C, C, 1, 1), C),
        "co_b": uni(ks[17], (C,), C),
    }

    out = attention_block_pallas(x, params, n_head=n_head)
    out = jax.block_until_ready(out)

    ref = _reference_attention_block(x, params, n_head=n_head)
    assert out.shape == (B, C, H, W), out.shape
    max_err = float(jnp.max(jnp.abs(out - ref)))
    assert jnp.allclose(out, ref, rtol=2e-3, atol=2e-3), max_err

    print("KERNEL_OK")
</pallas_src>

<mosaic_0001>
module attributes {stable_mosaic.version = 11 : i64} {
  func.func @_attention_block_kernel(%arg0: i32, %arg1: memref<1x64x64xf32, #tpu.memory_space<vmem>>, %arg2: memref<64x32xf32, #tpu.memory_space<vmem>>, %arg3: memref<32x64xf32, #tpu.memory_space<vmem>>, %arg4: memref<1x64xf32, #tpu.memory_space<vmem>>, %arg5: memref<1x64xf32, #tpu.memory_space<vmem>>, %arg6: memref<64x64xf32, #tpu.memory_space<vmem>>, %arg7: memref<1x64xf32, #tpu.memory_space<vmem>>, %arg8: memref<1x64xf32, #tpu.memory_space<vmem>>, %arg9: memref<1x64xf32, #tpu.memory_space<vmem>>, %arg10: memref<64x192xf32, #tpu.memory_space<vmem>>, %arg11: memref<64x64xf32, #tpu.memory_space<vmem>>, %arg12: memref<1x64xf32, #tpu.memory_space<vmem>>, %arg13: memref<1x64xf32, #tpu.memory_space<vmem>>, %arg14: memref<1x64xf32, #tpu.memory_space<vmem>>, %arg15: memref<64x512xf32, #tpu.memory_space<vmem>>, %arg16: memref<1x512xf32, #tpu.memory_space<vmem>>, %arg17: memref<256x64xf32, #tpu.memory_space<vmem>>, %arg18: memref<1x64xf32, #tpu.memory_space<vmem>>, %arg19: memref<64x64xf32, #tpu.memory_space<vmem>>, %arg20: memref<1x64xf32, #tpu.memory_space<vmem>>, %arg21: memref<1x64x64xf32, #tpu.memory_space<vmem>>) attributes {dimension_semantics = [#tpu.dimension_semantics<parallel>], iteration_bounds = array<i64: 2>, scalar_prefetch = 0 : i64, scratch_operands = 0 : i64, tpu.core_type = #tpu.core_type<tc>, window_params = [{transform_indices = @transform_0, window_bounds = array<i64: 1, 64, 64>}, {pipeline_mode = #tpu.pipeline_mode<synchronous>, transform_indices = @transform_1, window_bounds = array<i64: 64, 32>}, {pipeline_mode = #tpu.pipeline_mode<synchronous>, transform_indices = @transform_2, window_bounds = array<i64: 32, 64>}, {pipeline_mode = #tpu.pipeline_mode<synchronous>, transform_indices = @transform_3, window_bounds = array<i64: 1, 64>}, {pipeline_mode = #tpu.pipeline_mode<synchronous>, transform_indices = @transform_4, window_bounds = array<i64: 1, 64>}, {pipeline_mode = #tpu.pipeline_mode<synchronous>, transform_indices = @transform_5, window_bounds = array<i64: 64, 64>}, {pipeline_mode = #tpu.pipeline_mode<synchronous>, transform_indices = @transform_6, window_bounds = array<i64: 1, 64>}, {pipeline_mode = #tpu.pipeline_mode<synchronous>, transform_indices = @transform_7, window_bounds = array<i64: 1, 64>}, {pipeline_mode = #tpu.pipeline_mode<synchronous>, transform_indices = @transform_8, window_bounds = array<i64: 1, 64>}, {pipeline_mode = #tpu.pipeline_mode<synchronous>, transform_indices = @transform_9, window_bounds = array<i64: 64, 192>}, {pipeline_mode = #tpu.pipeline_mode<synchronous>, transform_indices = @transform_10, window_bounds = array<i64: 64, 64>}, {pipeline_mode = #tpu.pipeline_mode<synchronous>, transform_indices = @transform_11, window_bounds = array<i64: 1, 64>}, {pipeline_mode = #tpu.pipeline_mode<synchronous>, transform_indices = @transform_12, window_bounds = array<i64: 1, 64>}, {pipeline_mode = #tpu.pipeline_mode<synchronous>, transform_indices = @transform_13, window_bounds = array<i64: 1, 64>}, {pipeline_mode = #tpu.pipeline_mode<synchronous>, transform_indices = @transform_14, window_bounds = array<i64: 64, 512>}, {pipeline_mode = #tpu.pipeline_mode<synchronous>, transform_indices = @transform_15, window_bounds = array<i64: 1, 512>}, {pipeline_mode = #tpu.pipeline_mode<synchronous>, transform_indices = @transform_16, window_bounds = array<i64: 256, 64>}, {pipeline_mode = #tpu.pipeline_mode<synchronous>, transform_indices = @transform_17, window_bounds = array<i64: 1, 64>}, {pipeline_mode = #tpu.pipeline_mode<synchronous>, transform_indices = @transform_18, window_bounds = array<i64: 64, 64>}, {pipeline_mode = #tpu.pipeline_mode<synchronous>, transform_indices = @transform_19, window_bounds = array<i64: 1, 64>}, {transform_indices = @transform_20, window_bounds = array<i64: 1, 64, 64>}]} {
    %c0 = arith.constant 0 : index
    %c0_0 = arith.constant 0 : index
    %c0_1 = arith.constant 0 : index
    %0 = vector.load %arg1[%c0, %c0_0, %c0_1] : memref<1x64x64xf32, #tpu.memory_space<vmem>>, vector<1x64x64xf32>
    %1 = vector.shape_cast %0 : vector<1x64x64xf32> to vector<64x64xf32>
    %2 = tpu.transpose %1, [1, 0] : vector<64x64xf32> -> vector<64x64xf32>
    %cst = arith.constant dense<0.000000e+00> : vector<64xf32>
    %3 = vector.multi_reduction <add>, %2, %cst [0] : vector<64x64xf32> to vector<64xf32>
    %4 = vector.shape_cast %3 : vector<64xf32> to vector<1x64xf32>
    %c0_2 = arith.constant 0 : index
    %c0_3 = arith.constant 0 : index
    %5 = vector.load %arg2[%c0_2, %c0_3] : memref<64x32xf32, #tpu.memory_space<vmem>>, vector<64x32xf32>
    %cst_4 = arith.constant dense<0.000000e+00> : vector<1x32xf32>
    %6 = tpu.matmul %4, %5, %cst_4 {dimension_numbers = #tpu.dot_dimension_numbers<[1], [0], [0], [1], [0, 0, 1, 1], [], []>} : vector<1x64xf32>, vector<64x32xf32>, vector<1x32xf32> -> vector<1x32xf32>
    %c0_5 = arith.constant 0 : index
    %c0_6 = arith.constant 0 : index
    %7 = vector.load %arg3[%c0_5, %c0_6] : memref<32x64xf32, #tpu.memory_space<vmem>>, vector<32x64xf32>
    %cst_7 = arith.constant dense<0.000000e+00> : vector<1x64xf32>
    %8 = tpu.matmul %6, %7, %cst_7 {dimension_numbers = #tpu.dot_dimension_numbers<[1], [0], [0], [1], [0, 0, 1, 1], [], []>} : vector<1x32xf32>, vector<32x64xf32>, vector<1x64xf32> -> vector<1x64xf32>
    %9 = vector.broadcast %8 : vector<1x64xf32> to vector<64x64xf32>
    %10 = arith.subf %2, %9 : vector<64x64xf32>
    %11 = arith.mulf %10, %10 : vector<64x64xf32>
    %cst_8 = arith.constant dense<0.000000e+00> : vector<64xf32>
    %12 = vector.multi_reduction <add>, %11, %cst_8 [0] : vector<64x64xf32> to vector<64xf32>
    %13 = vector.shape_cast %12 : vector<64xf32> to vector<1x64xf32>
    %c0_9 = arith.constant 0 : index
    %c0_10 = arith.constant 0 : index
    %14 = vector.load %arg2[%c0_9, %c0_10] : memref<64x32xf32, #tpu.memory_space<vmem>>, vector<64x32xf32>
    %cst_11 = arith.constant dense<0.000000e+00> : vector<1x32xf32>
    %15 = tpu.matmul %13, %14, %cst_11 {dimension_numbers = #tpu.dot_dimension_numbers<[1], [0], [0], [1], [0, 0, 1, 1], [], []>} : vector<1x64xf32>, vector<64x32xf32>, vector<1x32xf32> -> vector<1x32xf32>
    %c0_12 = arith.constant 0 : index
    %c0_13 = arith.constant 0 : index
    %16 = vector.load %arg3[%c0_12, %c0_13] : memref<32x64xf32, #tpu.memory_space<vmem>>, vector<32x64xf32>
    %cst_14 = arith.constant dense<0.000000e+00> : vector<1x64xf32>
    %17 = tpu.matmul %15, %16, %cst_14 {dimension_numbers = #tpu.dot_dimension_numbers<[1], [0], [0], [1], [0, 0, 1, 1], [], []>} : vector<1x32xf32>, vector<32x64xf32>, vector<1x64xf32> -> vector<1x64xf32>
    %cst_15 = arith.constant 9.99999997E-7 : f32
    %18 = vector.broadcast %cst_15 : f32 to vector<1x64xf32>
    %19 = arith.addf %17, %18 : vector<1x64xf32>
    %20 = math.rsqrt %19 : vector<1x64xf32>
    %21 = vector.broadcast %20 : vector<1x64xf32> to vector<64x64xf32>
    %22 = arith.mulf %10, %21 : vector<64x64xf32>
    %c0_16 = arith.constant 0 : index
    %c0_17 = arith.constant 0 : index
    %23 = vector.load %arg4[%c0_16, %c0_17] : memref<1x64xf32, #tpu.memory_space<vmem>>, vector<1x64xf32>
    %24 = vector.broadcast %23 : vector<1x64xf32> to vector<64x64xf32>
    %25 = arith.mulf %22, %24 : vector<64x64xf32>
    %c0_18 = arith.constant 0 : index
    %c0_19 = arith.constant 0 : index
    %26 = vector.load %arg5[%c0_18, %c0_19] : memref<1x64xf32, #tpu.memory_space<vmem>>, vector<1x64xf32>
    %27 = vector.broadcast %26 : vector<1x64xf32> to vector<64x64xf32>
    %28 = arith.addf %25, %27 : vector<64x64xf32>
    %c0_20 = arith.constant 0 : index
    %c0_21 = arith.constant 0 : index
    %29 = vector.load %arg6[%c0_20, %c0_21] : memref<64x64xf32, #tpu.memory_space<vmem>>, vector<64x64xf32>
    %cst_22 = arith.constant dense<0.000000e+00> : vector<64x64xf32>
    %30 = tpu.matmul %28, %29, %cst_22 {dimension_numbers = #tpu.dot_dimension_numbers<[1], [0], [0], [1], [0, 0, 1, 1], [], []>} : vector<64x64xf32>, vector<64x64xf32>, vector<64x64xf32> -> vector<64x64xf32>
    %c0_23 = arith.constant 0 : index
    %c0_24 = arith.constant 0 : index
    %31 = vector.load %arg7[%c0_23, %c0_24] : memref<1x64xf32, #tpu.memory_space<vmem>>, vector<1x64xf32>
    %32 = vector.broadcast %31 : vector<1x64xf32> to vector<64x64xf32>
    %33 = arith.addf %30, %32 : vector<64x64xf32>
    %c0_25 = arith.constant 0 : index
    %c0_26 = arith.constant 0 : index
    %34 = vector.load %arg8[%c0_25, %c0_26] : memref<1x64xf32, #tpu.memory_space<vmem>>, vector<1x64xf32>
    %c0_27 = arith.constant 0 : index
    %c0_28 = arith.constant 0 : index
    %35 = vector.load %arg9[%c0_27, %c0_28] : memref<1x64xf32, #tpu.memory_space<vmem>>, vector<1x64xf32>
    %cst_29 = arith.constant dense<0.000000e+00> : vector<64xf32>
    %36 = vector.multi_reduction <add>, %33, %cst_29 [1] : vector<64x64xf32> to vector<64xf32>
    %37 = vector.shape_cast %36 : vector<64xf32> to vector<64x1xf32>
    %cst_30 = arith.constant 6.400000e+01 : f32
    %38 = vector.broadcast %cst_30 : f32 to vector<64x1xf32>
    %39 = arith.divf %37, %38 : vector<64x1xf32>
    %40 = vector.broadcast %39 : vector<64x1xf32> to vector<64x64xf32>
    %41 = arith.subf %33, %40 : vector<64x64xf32>
    %42 = arith.mulf %41, %41 : vector<64x64xf32>
    %cst_31 = arith.constant dense<0.000000e+00> : vector<64xf32>
    %43 = vector.multi_reduction <add>, %42, %cst_31 [1] : vector<64x64xf32> to vector<64xf32>
    %44 = vector.shape_cast %43 : vector<64xf32> to vector<64x1xf32>
    %cst_32 = arith.constant 6.400000e+01 : f32
    %45 = vector.broadcast %cst_32 : f32 to vector<64x1xf32>
    %46 = arith.divf %44, %45 : vector<64x1xf32>
    %cst_33 = arith.constant 9.99999974E-6 : f32
    %47 = vector.broadcast %cst_33 : f32 to vector<64x1xf32>
    %48 = arith.addf %46, %47 : vector<64x1xf32>
    %49 = math.rsqrt %48 : vector<64x1xf32>
    %50 = vector.broadcast %49 : vector<64x1xf32> to vector<64x64xf32>
    %51 = arith.mulf %41, %50 : vector<64x64xf32>
    %52 = vector.broadcast %34 : vector<1x64xf32> to vector<64x64xf32>
    %53 = arith.mulf %51, %52 : vector<64x64xf32>
    %54 = vector.broadcast %35 : vector<1x64xf32> to vector<64x64xf32>
    %55 = arith.addf %53, %54 : vector<64x64xf32>
    %c0_34 = arith.constant 0 : index
    %c0_35 = arith.constant 0 : index
    %56 = vector.load %arg10[%c0_34, %c0_35] : memref<64x192xf32, #tpu.memory_space<vmem>>, vector<64x192xf32>
    %cst_36 = arith.constant dense<0.000000e+00> : vector<64x192xf32>
    %57 = tpu.matmul %55, %56, %cst_36 {dimension_numbers = #tpu.dot_dimension_numbers<[1], [0], [0], [1], [0, 0, 1, 1], [], []>} : vector<64x64xf32>, vector<64x192xf32>, vector<64x192xf32> -> vector<64x192xf32>
    %c0_37 = arith.constant 0 : index
    %c0_38 = arith.constant 0 : index
    %58 = vector.load %arg12[%c0_37, %c0_38] : memref<1x64xf32, #tpu.memory_space<vmem>>, vector<1x64xf32>
    %59 = vector.broadcast %58 : vector<1x64xf32> to vector<64x64xf32>
    %60 = arith.addf %33, %59 : vector<64x64xf32>
    %61 = vector.extract_strided_slice %57 {offsets = [0, 0], sizes = [64, 16], strides = [1, 1]} : vector<64x192xf32> to vector<64x16xf32>
    %62 = vector.extract_strided_slice %57 {offsets = [0, 64], sizes = [64, 16], strides = [1, 1]} : vector<64x192xf32> to vector<64x16xf32>
    %63 = vector.extract_strided_slice %57 {offsets = [0, 128], sizes = [64, 16], strides = [1, 1]} : vector<64x192xf32> to vector<64x16xf32>
    %cst_39 = arith.constant dense<0.000000e+00> : vector<64x64xf32>
    %64 = tpu.matmul %61, %62, %cst_39 {dimension_numbers = #tpu.dot_dimension_numbers<[1], [1], [0], [0], [0, 0, 1, 0], [], []>} : vector<64x16xf32>, vector<64x16xf32>, vector<64x64xf32> -> vector<64x64xf32>
    %cst_40 = arith.constant dense<0xFF800000> : vector<64xf32>
    %65 = vector.multi_reduction <maximumf>, %64, %cst_40 [1] : vector<64x64xf32> to vector<64xf32>
    %66 = vector.shape_cast %65 : vector<64xf32> to vector<64x1xf32>
    %67 = vector.broadcast %66 : vector<64x1xf32> to vector<64x64xf32>
    %68 = arith.subf %64, %67 : vector<64x64xf32>
    %69 = math.exp %68 : vector<64x64xf32>
    %cst_41 = arith.constant dense<0.000000e+00> : vector<64xf32>
    %70 = vector.multi_reduction <add>, %69, %cst_41 [1] : vector<64x64xf32> to vector<64xf32>
    %71 = vector.shape_cast %70 : vector<64xf32> to vector<64x1xf32>
    %72 = tpu.reciprocal %71 {approx = true} : vector<64x1xf32> -> vector<64x1xf32>
    %73 = vector.broadcast %72 : vector<64x1xf32> to vector<64x64xf32>
    %74 = arith.mulf %69, %73 : vector<64x64xf32>
    %cst_42 = arith.constant dense<0.000000e+00> : vector<64x16xf32>
    %75 = tpu.matmul %74, %63, %cst_42 {dimension_numbers = #tpu.dot_dimension_numbers<[1], [0], [0], [1], [0, 0, 1, 1], [], []>} : vector<64x64xf32>, vector<64x16xf32>, vector<64x16xf32> -> vector<64x16xf32>
    %c0_43 = arith.constant 0 : index
    %c0_44 = arith.constant 0 : index
    %76 = vector.load %arg11[%c0_43, %c0_44] : memref<64x64xf32, #tpu.memory_space<vmem>>, vector<16x64xf32>
    %cst_45 = arith.constant dense<0.000000e+00> : vector<64x64xf32>
    %77 = tpu.matmul %75, %76, %cst_45 {dimension_numbers = #tpu.dot_dimension_numbers<[1], [0], [0], [1], [0, 0, 1, 1], [], []>} : vector<64x16xf32>, vector<16x64xf32>, vector<64x64xf32> -> vector<64x64xf32>
    %78 = arith.addf %60, %77 : vector<64x64xf32>
    %79 = vector.extract_strided_slice %57 {offsets = [0, 16], sizes = [64, 16], strides = [1, 1]} : vector<64x192xf32> to vector<64x16xf32>
    %80 = vector.extract_strided_slice %57 {offsets = [0, 80], sizes = [64, 16], strides = [1, 1]} : vector<64x192xf32> to vector<64x16xf32>
    %81 = vector.extract_strided_slice %57 {offsets = [0, 144], sizes = [64, 16], strides = [1, 1]} : vector<64x192xf32> to vector<64x16xf32>
    %cst_46 = arith.constant dense<0.000000e+00> : vector<64x64xf32>
    %82 = tpu.matmul %79, %80, %cst_46 {dimension_numbers = #tpu.dot_dimension_numbers<[1], [1], [0], [0], [0, 0, 1, 0], [], []>} : vector<64x16xf32>, vector<64x16xf32>, vector<64x64xf32> -> vector<64x64xf32>
    %cst_47 = arith.constant dense<0xFF800000> : vector<64xf32>
    %83 = vector.multi_reduction <maximumf>, %82, %cst_47 [1] : vector<64x64xf32> to vector<64xf32>
    %84 = vector.shape_cast %83 : vector<64xf32> to vector<64x1xf32>
    %85 = vector.broadcast %84 : vector<64x1xf32> to vector<64x64xf32>
    %86 = arith.subf %82, %85 : vector<64x64xf32>
    %87 = math.exp %86 : vector<64x64xf32>
    %cst_48 = arith.constant dense<0.000000e+00> : vector<64xf32>
    %88 = vector.multi_reduction <add>, %87, %cst_48 [1] : vector<64x64xf32> to vector<64xf32>
    %89 = vector.shape_cast %88 : vector<64xf32> to vector<64x1xf32>
    %90 = tpu.reciprocal %89 {approx = true} : vector<64x1xf32> -> vector<64x1xf32>
    %91 = vector.broadcast %90 : vector<64x1xf32> to vector<64x64xf32>
    %92 = arith.mulf %87, %91 : vector<64x64xf32>
    %cst_49 = arith.constant dense<0.000000e+00> : vector<64x16xf32>
    %93 = tpu.matmul %92, %81, %cst_49 {dimension_numbers = #tpu.dot_dimension_numbers<[1], [0], [0], [1], [0, 0, 1, 1], [], []>} : vector<64x64xf32>, vector<64x16xf32>, vector<64x16xf32> -> vector<64x16xf32>
    %c16 = arith.constant 16 : index
    %c0_50 = arith.constant 0 : index
    %94 = vector.load %arg11[%c16, %c0_50] : memref<64x64xf32, #tpu.memory_space<vmem>>, vector<16x64xf32>
    %cst_51 = arith.constant dense<0.000000e+00> : vector<64x64xf32>
    %95 = tpu.matmul %93, %94, %cst_51 {dimension_numbers = #tpu.dot_dimension_numbers<[1], [0], [0], [1], [0, 0, 1, 1], [], []>} : vector<64x16xf32>, vector<16x64xf32>, vector<64x64xf32> -> vector<64x64xf32>
    %96 = arith.addf %78, %95 : vector<64x64xf32>
    %97 = vector.extract_strided_slice %57 {offsets = [0, 32], sizes = [64, 16], strides = [1, 1]} : vector<64x192xf32> to vector<64x16xf32>
    %98 = vector.extract_strided_slice %57 {offsets = [0, 96], sizes = [64, 16], strides = [1, 1]} : vector<64x192xf32> to vector<64x16xf32>
    %99 = vector.extract_strided_slice %57 {offsets = [0, 160], sizes = [64, 16], strides = [1, 1]} : vector<64x192xf32> to vector<64x16xf32>
    %cst_52 = arith.constant dense<0.000000e+00> : vector<64x64xf32>
    %100 = tpu.matmul %97, %98, %cst_52 {dimension_numbers = #tpu.dot_dimension_numbers<[1], [1], [0], [0], [0, 0, 1, 0], [], []>} : vector<64x16xf32>, vector<64x16xf32>, vector<64x64xf32> -> vector<64x64xf32>
    %cst_53 = arith.constant dense<0xFF800000> : vector<64xf32>
    %101 = vector.multi_reduction <maximumf>, %100, %cst_53 [1] : vector<64x64xf32> to vector<64xf32>
    %102 = vector.shape_cast %101 : vector<64xf32> to vector<64x1xf32>
    %103 = vector.broadcast %102 : vector<64x1xf32> to vector<64x64xf32>
    %104 = arith.subf %100, %103 : vector<64x64xf32>
    %105 = math.exp %104 : vector<64x64xf32>
    %cst_54 = arith.constant dense<0.000000e+00> : vector<64xf32>
    %106 = vector.multi_reduction <add>, %105, %cst_54 [1] : vector<64x64xf32> to vector<64xf32>
    %107 = vector.shape_cast %106 : vector<64xf32> to vector<64x1xf32>
    %108 = tpu.reciprocal %107 {approx = true} : vector<64x1xf32> -> vector<64x1xf32>
    %109 = vector.broadcast %108 : vector<64x1xf32> to vector<64x64xf32>
    %110 = arith.mulf %105, %109 : vector<64x64xf32>
    %cst_55 = arith.constant dense<0.000000e+00> : vector<64x16xf32>
    %111 = tpu.matmul %110, %99, %cst_55 {dimension_numbers = #tpu.dot_dimension_numbers<[1], [0], [0], [1], [0, 0, 1, 1], [], []>} : vector<64x64xf32>, vector<64x16xf32>, vector<64x16xf32> -> vector<64x16xf32>
    %c32 = arith.constant 32 : index
    %c0_56 = arith.constant 0 : index
    %112 = vector.load %arg11[%c32, %c0_56] : memref<64x64xf32, #tpu.memory_space<vmem>>, vector<16x64xf32>
    %cst_57 = arith.constant dense<0.000000e+00> : vector<64x64xf32>
    %113 = tpu.matmul %111, %112, %cst_57 {dimension_numbers = #tpu.dot_dimension_numbers<[1], [0], [0], [1], [0, 0, 1, 1], [], []>} : vector<64x16xf32>, vector<16x64xf32>, vector<64x64xf32> -> vector<64x64xf32>
    %114 = arith.addf %96, %113 : vector<64x64xf32>
    %115 = vector.extract_strided_slice %57 {offsets = [0, 48], sizes = [64, 16], strides = [1, 1]} : vector<64x192xf32> to vector<64x16xf32>
    %116 = vector.extract_strided_slice %57 {offsets = [0, 112], sizes = [64, 16], strides = [1, 1]} : vector<64x192xf32> to vector<64x16xf32>
    %117 = vector.extract_strided_slice %57 {offsets = [0, 176], sizes = [64, 16], strides = [1, 1]} : vector<64x192xf32> to vector<64x16xf32>
    %cst_58 = arith.constant dense<0.000000e+00> : vector<64x64xf32>
    %118 = tpu.matmul %115, %116, %cst_58 {dimension_numbers = #tpu.dot_dimension_numbers<[1], [1], [0], [0], [0, 0, 1, 0], [], []>} : vector<64x16xf32>, vector<64x16xf32>, vector<64x64xf32> -> vector<64x64xf32>
    %cst_59 = arith.constant dense<0xFF800000> : vector<64xf32>
    %119 = vector.multi_reduction <maximumf>, %118, %cst_59 [1] : vector<64x64xf32> to vector<64xf32>
    %120 = vector.shape_cast %119 : vector<64xf32> to vector<64x1xf32>
    %121 = vector.broadcast %120 : vector<64x1xf32> to vector<64x64xf32>
    %122 = arith.subf %118, %121 : vector<64x64xf32>
    %123 = math.exp %122 : vector<64x64xf32>
    %cst_60 = arith.constant dense<0.000000e+00> : vector<64xf32>
    %124 = vector.multi_reduction <add>, %123, %cst_60 [1] : vector<64x64xf32> to vector<64xf32>
    %125 = vector.shape_cast %124 : vector<64xf32> to vector<64x1xf32>
    %126 = tpu.reciprocal %125 {approx = true} : vector<64x1xf32> -> vector<64x1xf32>
    %127 = vector.broadcast %126 : vector<64x1xf32> to vector<64x64xf32>
    %128 = arith.mulf %123, %127 : vector<64x64xf32>
    %cst_61 = arith.constant dense<0.000000e+00> : vector<64x16xf32>
    %129 = tpu.matmul %128, %117, %cst_61 {dimension_numbers = #tpu.dot_dimension_numbers<[1], [0], [0], [1], [0, 0, 1, 1], [], []>} : vector<64x64xf32>, vector<64x16xf32>, vector<64x16xf32> -> vector<64x16xf32>
    %c48 = arith.constant 48 : index
    %c0_62 = arith.constant 0 : index
    %130 = vector.load %arg11[%c48, %c0_62] : memref<64x64xf32, #tpu.memory_space<vmem>>, vector<16x64xf32>
    %cst_63 = arith.constant dense<0.000000e+00> : vector<64x64xf32>
    %131 = tpu.matmul %129, %130, %cst_63 {dimension_numbers = #tpu.dot_dimension_numbers<[1], [0], [0], [1], [0, 0, 1, 1], [], []>} : vector<64x16xf32>, vector<16x64xf32>, vector<64x64xf32> -> vector<64x64xf32>
    %132 = arith.addf %114, %131 : vector<64x64xf32>
    %c0_64 = arith.constant 0 : index
    %c0_65 = arith.constant 0 : index
    %133 = vector.load %arg13[%c0_64, %c0_65] : memref<1x64xf32, #tpu.memory_space<vmem>>, vector<1x64xf32>
    %c0_66 = arith.constant 0 : index
    %c0_67 = arith.constant 0 : index
    %134 = vector.load %arg14[%c0_66, %c0_67] : memref<1x64xf32, #tpu.memory_space<vmem>>, vector<1x64xf32>
    %cst_68 = arith.constant dense<0.000000e+00> : vector<64xf32>
    %135 = vector.multi_reduction <add>, %132, %cst_68 [1] : vector<64x64xf32> to vector<64xf32>
    %136 = vector.shape_cast %135 : vector<64xf32> to vector<64x1xf32>
    %cst_69 = arith.constant 6.400000e+01 : f32
    %137 = vector.broadcast %cst_69 : f32 to vector<64x1xf32>
    %138 = arith.divf %136, %137 : vector<64x1xf32>
    %139 = vector.broadcast %138 : vector<64x1xf32> to vector<64x64xf32>
    %140 = arith.subf %132, %139 : vector<64x64xf32>
    %141 = arith.mulf %140, %140 : vector<64x64xf32>
    %cst_70 = arith.constant dense<0.000000e+00> : vector<64xf32>
    %142 = vector.multi_reduction <add>, %141, %cst_70 [1] : vector<64x64xf32> to vector<64xf32>
    %143 = vector.shape_cast %142 : vector<64xf32> to vector<64x1xf32>
    %cst_71 = arith.constant 6.400000e+01 : f32
    %144 = vector.broadcast %cst_71 : f32 to vector<64x1xf32>
    %145 = arith.divf %143, %144 : vector<64x1xf32>
    %cst_72 = arith.constant 9.99999974E-6 : f32
    %146 = vector.broadcast %cst_72 : f32 to vector<64x1xf32>
    %147 = arith.addf %145, %146 : vector<64x1xf32>
    %148 = math.rsqrt %147 : vector<64x1xf32>
    %149 = vector.broadcast %148 : vector<64x1xf32> to vector<64x64xf32>
    %150 = arith.mulf %140, %149 : vector<64x64xf32>
    %151 = vector.broadcast %133 : vector<1x64xf32> to vector<64x64xf32>
    %152 = arith.mulf %150, %151 : vector<64x64xf32>
    %153 = vector.broadcast %134 : vector<1x64xf32> to vector<64x64xf32>
    %154 = arith.addf %152, %153 : vector<64x64xf32>
    %c0_73 = arith.constant 0 : index
    %c0_74 = arith.constant 0 : index
    %155 = vector.load %arg15[%c0_73, %c0_74] : memref<64x512xf32, #tpu.memory_space<vmem>>, vector<64x512xf32>
    %cst_75 = arith.constant dense<0.000000e+00> : vector<64x512xf32>
    %156 = tpu.matmul %154, %155, %cst_75 {dimension_numbers = #tpu.dot_dimension_numbers<[1], [0], [0], [1], [0, 0, 1, 1], [], []>} : vector<64x64xf32>, vector<64x512xf32>, vector<64x512xf32> -> vector<64x512xf32>
    %c0_76 = arith.constant 0 : index
    %c0_77 = arith.constant 0 : index
    %157 = vector.load %arg16[%c0_76, %c0_77] : memref<1x512xf32, #tpu.memory_space<vmem>>, vector<1x512xf32>
    %158 = vector.broadcast %157 : vector<1x512xf32> to vector<64x512xf32>
    %159 = arith.addf %156, %158 : vector<64x512xf32>
    %160 = vector.extract_strided_slice %159 {offsets = [0, 0], sizes = [64, 256], strides = [1, 1]} : vector<64x512xf32> to vector<64x256xf32>
    %161 = vector.extract_strided_slice %159 {offsets = [0, 256], sizes = [64, 256], strides = [1, 1]} : vector<64x512xf32> to vector<64x256xf32>
    %cst_78 = arith.constant 5.000000e-01 : f32
    %162 = vector.broadcast %cst_78 : f32 to vector<64x256xf32>
    %163 = arith.mulf %162, %161 : vector<64x256xf32>
    %cst_79 = arith.constant 0.707106769 : f32
    %164 = vector.broadcast %cst_79 : f32 to vector<64x256xf32>
    %165 = arith.mulf %161, %164 : vector<64x256xf32>
    %cst_80 = arith.constant 0.000000e+00 : f32
    %166 = vector.broadcast %cst_80 : f32 to vector<64x256xf32>
    %167 = arith.cmpf oge, %165, %166 : vector<64x256xf32>
    %cst_81 = arith.constant 1.000000e+00 : f32
    %cst_82 = arith.constant -1.000000e+00 : f32
    %168 = vector.broadcast %cst_81 : f32 to vector<64x256xf32>
    %169 = vector.broadcast %cst_82 : f32 to vector<64x256xf32>
    %170 = arith.select %167, %168, %169 : vector<64x256xi1>, vector<64x256xf32>
    %171 = math.absf %165 : vector<64x256xf32>
    %cst_83 = arith.constant 0.327591091 : f32
    %172 = vector.broadcast %cst_83 : f32 to vector<64x256xf32>
    %173 = arith.mulf %172, %171 : vector<64x256xf32>
    %cst_84 = arith.constant 1.000000e+00 : f32
    %174 = vector.broadcast %cst_84 : f32 to vector<64x256xf32>
    %175 = arith.addf %174, %173 : vector<64x256xf32>
    %cst_85 = arith.constant 1.000000e+00 : f32
    %176 = vector.broadcast %cst_85 : f32 to vector<64x256xf32>
    %177 = arith.divf %176, %175 : vector<64x256xf32>
    %cst_86 = arith.constant 1.06140542 : f32
    %178 = vector.broadcast %cst_86 : f32 to vector<64x256xf32>
    %179 = arith.mulf %178, %177 : vector<64x256xf32>
    %cst_87 = arith.constant -1.45315206 : f32
    %180 = vector.broadcast %cst_87 : f32 to vector<64x256xf32>
    %181 = arith.addf %179, %180 : vector<64x256xf32>
    %182 = arith.mulf %181, %177 : vector<64x256xf32>
    %cst_88 = arith.constant 1.42141378 : f32
    %183 = vector.broadcast %cst_88 : f32 to vector<64x256xf32>
    %184 = arith.addf %182, %183 : vector<64x256xf32>
    %185 = arith.mulf %184, %177 : vector<64x256xf32>
    %cst_89 = arith.constant -0.284496725 : f32
    %186 = vector.broadcast %cst_89 : f32 to vector<64x256xf32>
    %187 = arith.addf %185, %186 : vector<64x256xf32>
    %188 = arith.mulf %187, %177 : vector<64x256xf32>
    %cst_90 = arith.constant 0.254829586 : f32
    %189 = vector.broadcast %cst_90 : f32 to vector<64x256xf32>
    %190 = arith.addf %188, %189 : vector<64x256xf32>
    %191 = arith.mulf %190, %177 : vector<64x256xf32>
    %cst_91 = arith.constant 0.000000e+00 : f32
    %192 = vector.broadcast %cst_91 : f32 to vector<64x256xf32>
    %193 = arith.subf %192, %171 : vector<64x256xf32>
    %194 = arith.mulf %193, %171 : vector<64x256xf32>
    %195 = math.exp %194 : vector<64x256xf32>
    %196 = arith.mulf %191, %195 : vector<64x256xf32>
    %cst_92 = arith.constant 1.000000e+00 : f32
    %197 = vector.broadcast %cst_92 : f32 to vector<64x256xf32>
    %198 = arith.subf %197, %196 : vector<64x256xf32>
    %199 = arith.mulf %170, %198 : vector<64x256xf32>
    %cst_93 = arith.constant 1.000000e+00 : f32
    %200 = vector.broadcast %cst_93 : f32 to vector<64x256xf32>
    %201 = arith.addf %200, %199 : vector<64x256xf32>
    %202 = arith.mulf %163, %201 : vector<64x256xf32>
    %203 = arith.mulf %160, %202 : vector<64x256xf32>
    %c0_94 = arith.constant 0 : index
    %c0_95 = arith.constant 0 : index
    %204 = vector.load %arg17[%c0_94, %c0_95] : memref<256x64xf32, #tpu.memory_space<vmem>>, vector<256x64xf32>
    %cst_96 = arith.constant dense<0.000000e+00> : vector<64x64xf32>
    %205 = tpu.matmul %203, %204, %cst_96 {dimension_numbers = #tpu.dot_dimension_numbers<[1], [0], [0], [1], [0, 0, 1, 1], [], []>} : vector<64x256xf32>, vector<256x64xf32>, vector<64x64xf32> -> vector<64x64xf32>
    %c0_97 = arith.constant 0 : index
    %c0_98 = arith.constant 0 : index
    %206 = vector.load %arg18[%c0_97, %c0_98] : memref<1x64xf32, #tpu.memory_space<vmem>>, vector<1x64xf32>
    %207 = vector.broadcast %206 : vector<1x64xf32> to vector<64x64xf32>
    %208 = arith.addf %205, %207 : vector<64x64xf32>
    %209 = arith.addf %208, %132 : vector<64x64xf32>
    %c0_99 = arith.constant 0 : index
    %c0_100 = arith.constant 0 : index
    %210 = vector.load %arg19[%c0_99, %c0_100] : memref<64x64xf32, #tpu.memory_space<vmem>>, vector<64x64xf32>
    %cst_101 = arith.constant dense<0.000000e+00> : vector<64x64xf32>
    %211 = tpu.matmul %209, %210, %cst_101 {dimension_numbers = #tpu.dot_dimension_numbers<[1], [0], [0], [1], [0, 0, 1, 1], [], []>} : vector<64x64xf32>, vector<64x64xf32>, vector<64x64xf32> -> vector<64x64xf32>
    %c0_102 = arith.constant 0 : index
    %c0_103 = arith.constant 0 : index
    %212 = vector.load %arg20[%c0_102, %c0_103] : memref<1x64xf32, #tpu.memory_space<vmem>>, vector<1x64xf32>
    %213 = vector.broadcast %212 : vector<1x64xf32> to vector<64x64xf32>
    %214 = arith.addf %211, %213 : vector<64x64xf32>
    %215 = tpu.transpose %214, [1, 0] : vector<64x64xf32> -> vector<64x64xf32>
    %216 = arith.addf %215, %1 : vector<64x64xf32>
    %c0_104 = arith.constant 0 : index
    %c0_105 = arith.constant 0 : index
    %c0_106 = arith.constant 0 : index
    %217 = vector.load %arg21[%c0_104, %c0_105, %c0_106] : memref<1x64x64xf32, #tpu.memory_space<vmem>>, vector<1x64x64xf32>
    %218 = vector.shape_cast %217 : vector<1x64x64xf32> to vector<64x64xf32>
    %219 = vector.shape_cast %216 : vector<64x64xf32> to vector<1x64x64xf32>
    tpu.vector_store %arg21[%c0_104, %c0_105, %c0_106], %219 {strides = array<i32>} : memref<1x64x64xf32, #tpu.memory_space<vmem>>, vector<1x64x64xf32>,
    return
  }
  func.func @transform_0(%arg0: i32) -> (i32, i32, i32) {
    %c0_i32 = arith.constant 0 : i32
    %c0_i32_0 = arith.constant 0 : i32
    %c0_i32_1 = arith.constant 0 : i32
    return %arg0, %c0_i32, %c0_i32_0 : i32, i32, i32
  }
  func.func @transform_1(%arg0: i32) -> (i32, i32) {
    %c0_i32 = arith.constant 0 : i32
    %c0_i32_0 = arith.constant 0 : i32
    %c0_i32_1 = arith.constant 0 : i32
    return %c0_i32, %c0_i32_0 : i32, i32
  }
  func.func @transform_2(%arg0: i32) -> (i32, i32) {
    %c0_i32 = arith.constant 0 : i32
    %c0_i32_0 = arith.constant 0 : i32
    %c0_i32_1 = arith.constant 0 : i32
    return %c0_i32, %c0_i32_0 : i32, i32
  }
  func.func @transform_3(%arg0: i32) -> (i32, i32) {
    %c0_i32 = arith.constant 0 : i32
    %c0_i32_0 = arith.constant 0 : i32
    %c0_i32_1 = arith.constant 0 : i32
    return %c0_i32, %c0_i32_0 : i32, i32
  }
  func.func @transform_4(%arg0: i32) -> (i32, i32) {
    %c0_i32 = arith.constant 0 : i32
    %c0_i32_0 = arith.constant 0 : i32
    %c0_i32_1 = arith.constant 0 : i32
    return %c0_i32, %c0_i32_0 : i32, i32
  }
  func.func @transform_5(%arg0: i32) -> (i32, i32) {
    %c0_i32 = arith.constant 0 : i32
    %c0_i32_0 = arith.constant 0 : i32
    %c0_i32_1 = arith.constant 0 : i32
    return %c0_i32, %c0_i32_0 : i32, i32
  }
  func.func @transform_6(%arg0: i32) -> (i32, i32) {
    %c0_i32 = arith.constant 0 : i32
    %c0_i32_0 = arith.constant 0 : i32
    %c0_i32_1 = arith.constant 0 : i32
    return %c0_i32, %c0_i32_0 : i32, i32
  }
  func.func @transform_7(%arg0: i32) -> (i32, i32) {
    %c0_i32 = arith.constant 0 : i32
    %c0_i32_0 = arith.constant 0 : i32
    %c0_i32_1 = arith.constant 0 : i32
    return %c0_i32, %c0_i32_0 : i32, i32
  }
  func.func @transform_8(%arg0: i32) -> (i32, i32) {
    %c0_i32 = arith.constant 0 : i32
    %c0_i32_0 = arith.constant 0 : i32
    %c0_i32_1 = arith.constant 0 : i32
    return %c0_i32, %c0_i32_0 : i32, i32
  }
  func.func @transform_9(%arg0: i32) -> (i32, i32) {
    %c0_i32 = arith.constant 0 : i32
    %c0_i32_0 = arith.constant 0 : i32
    %c0_i32_1 = arith.constant 0 : i32
    return %c0_i32, %c0_i32_0 : i32, i32
  }
  func.func @transform_10(%arg0: i32) -> (i32, i32) {
    %c0_i32 = arith.constant 0 : i32
    %c0_i32_0 = arith.constant 0 : i32
    %c0_i32_1 = arith.constant 0 : i32
    return %c0_i32, %c0_i32_0 : i32, i32
  }
  func.func @transform_11(%arg0: i32) -> (i32, i32) {
    %c0_i32 = arith.constant 0 : i32
    %c0_i32_0 = arith.constant 0 : i32
    %c0_i32_1 = arith.constant 0 : i32
    return %c0_i32, %c0_i32_0 : i32, i32
  }
  func.func @transform_12(%arg0: i32) -> (i32, i32) {
    %c0_i32 = arith.constant 0 : i32
    %c0_i32_0 = arith.constant 0 : i32
    %c0_i32_1 = arith.constant 0 : i32
    return %c0_i32, %c0_i32_0 : i32, i32
  }
  func.func @transform_13(%arg0: i32) -> (i32, i32) {
    %c0_i32 = arith.constant 0 : i32
    %c0_i32_0 = arith.constant 0 : i32
    %c0_i32_1 = arith.constant 0 : i32
    return %c0_i32, %c0_i32_0 : i32, i32
  }
  func.func @transform_14(%arg0: i32) -> (i32, i32) {
    %c0_i32 = arith.constant 0 : i32
    %c0_i32_0 = arith.constant 0 : i32
    %c0_i32_1 = arith.constant 0 : i32
    return %c0_i32, %c0_i32_0 : i32, i32
  }
  func.func @transform_15(%arg0: i32) -> (i32, i32) {
    %c0_i32 = arith.constant 0 : i32
    %c0_i32_0 = arith.constant 0 : i32
    %c0_i32_1 = arith.constant 0 : i32
    return %c0_i32, %c0_i32_0 : i32, i32
  }
  func.func @transform_16(%arg0: i32) -> (i32, i32) {
    %c0_i32 = arith.constant 0 : i32
    %c0_i32_0 = arith.constant 0 : i32
    %c0_i32_1 = arith.constant 0 : i32
    return %c0_i32, %c0_i32_0 : i32, i32
  }
  func.func @transform_17(%arg0: i32) -> (i32, i32) {
    %c0_i32 = arith.constant 0 : i32
    %c0_i32_0 = arith.constant 0 : i32
    %c0_i32_1 = arith.constant 0 : i32
    return %c0_i32, %c0_i32_0 : i32, i32
  }
  func.func @transform_18(%arg0: i32) -> (i32, i32) {
    %c0_i32 = arith.constant 0 : i32
    %c0_i32_0 = arith.constant 0 : i32
    %c0_i32_1 = arith.constant 0 : i32
    return %c0_i32, %c0_i32_0 : i32, i32
  }
  func.func @transform_19(%arg0: i32) -> (i32, i32) {
    %c0_i32 = arith.constant 0 : i32
    %c0_i32_0 = arith.constant 0 : i32
    %c0_i32_1 = arith.constant 0 : i32
    return %c0_i32, %c0_i32_0 : i32, i32
  }
  func.func @transform_20(%arg0: i32) -> (i32, i32, i32) {
    %c0_i32 = arith.constant 0 : i32
    %c0_i32_0 = arith.constant 0 : i32
    %c0_i32_1 = arith.constant 0 : i32
    return %arg0, %c0_i32, %c0_i32_0 : i32, i32, i32
  }
}

</mosaic_0001>

<bundles_post_ra>
// kernel: attention_block_pallas.1
= control target key start
LH: loop header
LB: loop body
LE: loop exit
PB: predicated region body
PF: predicated region fallthrough
CT: control target
= control target key end

     0   :  { %s8632_s0 = inlined_call_operand.vmem [shape: f32[2,64,64], index: 0, kind: input, shape index: {}]   ;;  %s8633_s1 = inlined_call_operand.vmem [shape: f32[64,32], index: 1, kind: input, shape index: {}]   ;;  %s8634_s2 = inlined_call_operand.vmem [shape: f32[32,64], index: 2, kind: input, shape index: {}]   ;;  %s8635_s3 = inlined_call_operand.vmem [shape: f32[1,64], index: 3, kind: input, shape index: {}]   ;;  %s8636_s4 = inlined_call_operand.vmem [shape: f32[1,64], index: 4, kind: input, shape index: {}]   ;;  %s8637_s5 = inlined_call_operand.vmem [shape: f32[64,64], index: 5, kind: input, shape index: {}]   ;;  %s8638_s6 = inlined_call_operand.vmem [shape: f32[1,64], index: 6, kind: input, shape index: {}]   ;;  %s8639_s7 = inlined_call_operand.vmem [shape: f32[1,64], index: 7, kind: input, shape index: {}]   ;;  %s8640_s8 = inlined_call_operand.vmem [shape: f32[1,64], index: 8, kind: input, shape index: {}]   ;;  %s8641_s9 = inlined_call_operand.vmem [shape: f32[64,192], index: 9, kind: input, shape index: {}]   ;;  %s8642_s10 = inlined_call_operand.vmem [shape: f32[64,64], index: 10, kind: input, shape index: {}]   ;;  %s8643_s11 = inlined_call_operand.vmem [shape: f32[1,64], index: 11, kind: input, shape index: {}]   ;;  %s8644_s12 = inlined_call_operand.vmem [shape: f32[1,64], index: 12, kind: input, shape index: {}]   ;;  %s8645_s13 = inlined_call_operand.vmem [shape: f32[1,64], index: 13, kind: input, shape index: {}]   ;;  %s8646_s14 = inlined_call_operand.vmem [shape: f32[64,512], index: 14, kind: input, shape index: {}]   ;;  %s8647_s15 = inlined_call_operand.vmem [shape: f32[1,512], index: 15, kind: input, shape index: {}]   ;;  %s8648_s16 = inlined_call_operand.vmem [shape: f32[256,64], index: 16, kind: input, shape index: {}]   ;;  %s8649_s17 = inlined_call_operand.vmem [shape: f32[1,64], index: 17, kind: input, shape index: {}]   ;;  %s8650_s18 = inlined_call_operand.vmem [shape: f32[64,64], index: 18, kind: input, shape index: {}]   ;;  %s8651_s19 = inlined_call_operand.vmem [shape: f32[1,64], index: 19, kind: input, shape index: {}]   ;;  %s8652_s20 = inlined_call_operand.vmem [shape: f32[2,64,64], index: 20, kind: output, shape index: {}]  }
   0x1   :  { %8666 = sst [smem:[#allocation17_spill]] %s8632_s0 }
   0x2   :  { %8667 = sst [smem:[#allocation18_spill]] %s8633_s1  ;;  %s6742_s1 = smov 0  }
   0x3   :  { %8668 = sst [smem:[#allocation19_spill]] %s8634_s2 }
   0x4   :  { %8669 = sst [smem:[#allocation20_spill]] %s8635_s3 }
   0x5   :  { %8670 = sst [smem:[#allocation21_spill]] %s8636_s4 }
   0x6 LB: > { %s4986_s22 = sadd.s32 4294967295, %s6624_s1   ;;  %p4990_p0 = scmp.ge.s32.totalorder %s6624_s1, 1  ;;  %s6624_s1 = sphi %s6742_s1, %s30_s1  }
   0x7   : > { %p562_p1 = scmp.lt.s32.totalorder %s6624_s1, 3 }
   0x9   : > { %p563_p2 = pnand %p4990_p0, %p562_p1 }
   0xb   : > { %566 = sbr.rel (%p563_p2) target bundleno = 5333 (0x14d5), region = 100 }
  0x12   : > { %p620_p3 = scmp.lt.s32.totalorder %s4986_s22, 1  ;;  %s8671_s25 = sld [smem:[#allocation17_spill]]  ;;  %v6626_v10 = vmov 0.0|0.0   ;;  %vm6627_vm0 = vmmov 0   ;;  %v6628_v21 = vmov 0.0   ;;  %vm670_vm1 = vcmask 523264  }
  0x13   : > { %s8672_s28 = sld [smem:[#allocation18_spill]]  ;;  %5869 = vmatprep.subr.bf16.mxu0 %v6626_v10  ;;  %5881 = vmatprep.subr.bf16.mxu1 %v6626_v10  ;;  %s8673_s2 = sld [smem:[#allocation19_spill]]  ;;  %vm777_vm2 = vcmask 261120   ;;  %v851_v59 = vlaneseq  ;;  %vm1552_vm3 = vcmask 130048  }
  0x14   : > { %s8711_s22 = smov (!%p620_p3, %s4986_s22), 1  ;;  %5481 = vmatprep.mubr.msk.f32.mxu0 %vm6627_vm0, %v6628_v21  ;;  %5492 = vmatprep.mubr.msk.f32.mxu1 %vm6627_vm0, %v6628_v21  ;;  %s8674_s29 = sld [smem:[#allocation20_spill]]  ;;  %vm7154_vm4 = vmpackc.low %vm1552_vm3, %vm1552_vm3 }
  0x15   : > { %s8655_s23 = sshll.u32 %s8711_s22, 6  ;;  %v6846_v60 = vshrl.u32 %v851_v59, 7  ;;  %s8675_s21 = sld [smem:[#allocation21_spill]] }
  0x16   : > { %s6629_s0 = smov 64   ;;  %s6631_s24 = smov 112  }
  0x17   : > { %v6849_v61 = vsub.s32 0, %v6846_v60  ;;  %s6633_s26 = smov 96   ;;  %s6634_s30 = smov 16  }
  0x18   : > { %s6758_s3 = scalar_lea.vmem %s8671_s25, %s8655_s23  ;;  %s6632_s25 = smov 32  }
  0x19   : > { %v630_v0 = vld [vmem:[%s6758_s3] sm:$0xff]  ;;  %v631_v1 = vld [vmem:[%s6758_s3 + $0x8] sm:$0xff]  ;;  %v632_v2 = vld [vmem:[%s6758_s3 + $0x10] sm:$0xff] }
  0x1a   : > { %638 = vxpose.xlu0.b32.start [1/8] (short) (narrow) %v630_v0, 64  ;;  %v633_v3 = vld [vmem:[%s6758_s3 + $0x18] sm:$0xff]  ;;  %v634_v4 = vld [vmem:[%s6758_s3 + $0x20] sm:$0xff]  ;;  %v635_v5 = vld [vmem:[%s6758_s3 + $0x28] sm:$0xff] }
  0x1b   : > { %v636_v6 = vld [vmem:[%s6758_s3 + $0x30] sm:$0xff]  ;;  %v637_v7 = vld [vmem:[%s6758_s3 + $0x38] sm:$0xff]  ;;  %v692_v8 = vld [vmem:[%s8672_s28] sm:$0xff] }
  0x1c   : > { %v693_v9 = vld [vmem:[%s8672_s28 + $0x8] sm:$0xff]  ;;  %v694_v12 = vld [vmem:[%s8672_s28 + $0x10] sm:$0xff]  ;;  %v695_v13 = vld [vmem:[%s8672_s28 + $0x18] sm:$0xff] }
  0x1d   : > { %v6775_v11 = vpack.c.bf16 %v693_v9, %v692_v8  ;;  %v6786_v14 = vpack.c.bf16 %v695_v13, %v694_v12  ;;  %v696_v15 = vld [vmem:[%s8672_s28 + $0x20] sm:$0xff]  ;;  %v697_v16 = vld [vmem:[%s8672_s28 + $0x28] sm:$0xff]  ;;  %v698_v18 = vld [vmem:[%s8672_s28 + $0x30] sm:$0xff] }
  0x1e   : > { %639 = vxpose.xlu0.b32.cont [2/8] (short) (narrow) %v631_v1, 64  ;;  %v6796_v17 = vpack.c.bf16 %v697_v16, %v696_v15  ;;  %v699_v19 = vld [vmem:[%s8672_s28 + $0x38] sm:$0xff]  ;;  %v773_v22 = vld [vmem:[%s8673_s2] sm:$0xff]  ;;  %v774_v23 = vld [vmem:[%s8673_s2 + $0x8] sm:$0xff] }
  0x1f   : > { %5871 = vmatpush3.bf16.msra.mxu0 %v6775_v11  ;;  %v5879_v20 = vpack.c.bf16 %v699_v19, %v698_v18  ;;  %v775_v24 = vld [vmem:[%s8673_s2 + $0x10] sm:$0xff]  ;;  %v5882_v25 = vpack.c.bf16 %v774_v23, %v773_v22  ;;  %v776_v26 = vld [vmem:[%s8673_s2 + $0x18] sm:$0xff] }
  0x20   : > { %5872 = vmatprep.subr.bf16.mxu0 %v6626_v10  ;;  %v5885_v27 = vpack.c.bf16 %v776_v26, %v775_v24 }
  0x21   : > { %5883 = vmatpush3.bf16.msra.mxu1 %v5882_v25 }
  0x22   : > { %640 = vxpose.xlu0.b32.cont [3/8] (short) (narrow) %v632_v2, 64  ;;  %5884 = vmatprep.subr.bf16.mxu1 %v6626_v10 }
  0x23   : > { %5874 = vmatpush3.bf16.msra.mxu0 %v6786_v14 }
  0x24   : > { %5875 = vmatprep.subr.bf16.mxu0 %v6626_v10 }
  0x25   : > { %5886 = vmatpush3.bf16.msra.mxu1 %v5885_v27 }
  0x26   : > { %641 = vxpose.xlu0.b32.cont [4/8] (short) (narrow) %v633_v3, 64  ;;  %5887 = vmatprep.subr.bf16.mxu1 %v6626_v10 }
  0x27   : > { %5877 = vmatpush3.bf16.msra.mxu0 %v6796_v17 }
  0x28   : > { %5878 = vmatprep.subr.bf16.mxu0 %v6626_v10 }
  0x2a   : > { %642 = vxpose.xlu0.b32.cont [5/8] (short) (narrow) %v634_v4, 64 }
  0x2b   : > { %5880 = vmatpush3.bf16.msra.mxu0 %v5879_v20 }
  0x2c   : > { %5899 = vmatprep.subr.bf16.mxu0 %v6626_v10 }
  0x2e   : > { %643 = vxpose.xlu0.b32.cont [6/8] (short) (narrow) %v635_v5, 64 }
  0x32   : > { %644 = vxpose.xlu0.b32.cont [7/8] (short) (narrow) %v636_v6, 64 }
  0x36   : > { %645 = vxpose.xlu0.b32.end [8/8] (short) (narrow) %v637_v7, 64 }
  0x9a   : > { %v654_v28 = vpop.trf.xlu0 }
  0x9b   : > { %v671_v34 = vsel %vm670_vm1, %v654_v28, 0.0 }
  0x9e   : > { %v655_v29 = vpop.trf.xlu0 }
  0x9f   : > { %v672_v32 = vsel %vm670_vm1, %v655_v29, 0.0 }
  0xa0   : > { %v673_v36 = vadd.f32 %v672_v32, %v671_v34 }
  0xa2   : > { %v656_v30 = vpop.trf.xlu0 }
  0xa3   : > { %v674_v35 = vsel %vm670_vm1, %v656_v30, 0.0 }
  0xa4   : > { %v675_v38 = vadd.f32 %v674_v35, %v673_v36 }
  0xa6   : > { %v657_v31 = vpop.trf.xlu0 }
  0xa7   : > { %v676_v37 = vsel %vm670_vm1, %v657_v31, 0.0 }
  0xa8   : > { %v677_v41 = vadd.f32 %v676_v37, %v675_v38 }
  0xaa   : > { %v658_v33 = vpop.trf.xlu0 }
  0xab   : > { %v678_v40 = vsel %vm670_vm1, %v658_v33, 0.0 }
  0xac   : > { %v679_v43 = vadd.f32 %v678_v40, %v677_v41  ;;  %v1081_v41 = vld [vmem:[%s8637_s5] sm:$0xff] }
  0xae   : > { %v659_v39 = vpop.trf.xlu0 }
  0xaf   : > { %v680_v42 = vsel %vm670_vm1, %v659_v39, 0.0 }
  0xb0   : > { %v681_v46 = vadd.f32 %v680_v42, %v679_v43  ;;  %v1082_v42 = vld [vmem:[%s8637_s5 + $0x8] sm:$0xff] }
  0xb1   : > { %v5905_v43 = vpack.c.bf16 %v1082_v42, %v1081_v41 }
  0xb2   : > { %v660_v44 = vpop.trf.xlu0 }
  0xb3   : > { %v682_v45 = vsel %vm670_vm1, %v660_v44, 0.0 }
  0xb4   : > { %v683_v47 = vadd.f32 %v682_v45, %v681_v46  ;;  %v1084_v45 = vld [vmem:[%s8637_s5 + $0x18] sm:$0xff] }
  0xb6   : > { %v661_v48 = vpop.trf.xlu0 }
  0xb7   : > { %v684_v49 = vsel %vm670_vm1, %v661_v48, 0.0 }
  0xb8   : > { %v685_v50 = vadd.f32 %v684_v49, %v683_v47  ;;  %v1085_v47 = vld [vmem:[%s8637_s5 + $0x20] sm:$0xff]  ;;  %v1087_v49 = vld [vmem:[%s8637_s5 + $0x30] sm:$0xff] }
  0xba   : > { %v686_v51 = vrot.slane %v685_v50, 4 }
  0xbc   : > { %v687_v52 = vadd.f32 %v686_v51, %v685_v50  ;;  %v1088_v51 = vld [vmem:[%s8637_s5 + $0x38] sm:$0xff] }
  0xbe   : > { %v688_v53 = vrot.slane %v687_v52, 2 }
  0xc0   : > { %v689_v54 = vadd.f32 %v688_v53, %v687_v52  ;;  %v5917_v52 = vpack.c.bf16 %v1088_v51, %v1087_v49 }
  0xc2   : > { %v690_v55 = vrot.slane %v689_v54, 1 }
  0xc4   : > { %v691_v56 = vadd.f32 %v690_v55, %v689_v54 }
  0xc6   : > { %5482 = vmatmul.mubr.msk.f32.vlgmr.msra.gmra.mrb[0].mxu0 %vm670_vm1, %v691_v56 }
  0xc7   : > { %5901 = vmatpush3.bf16.msra.mxu0 %v5882_v25  ;;  %5522 = vmatprep.mubr.msk.f32.mxu0 %vm6627_vm0, %v6628_v21 }
  0xc8   : > { %5902 = vmatprep.subr.bf16.mxu0 %v6626_v10 }
  0xcb   : > { %5904 = vmatpush3.bf16.msra.mxu0 %v5885_v27 }
  0xcc   : > { %5906 = vmatprep.subr.bf16.mxu0 %v5905_v43 }
 0x199   : > { %v769_v57 = vpop.f32.mrb[0].mxu0 }
 0x19a   : > { %v5483_v58 = vpop.f32.mrb[1].mxu0  ;;  %5493 = vmatmul.mubr.msk.f32.vlgmr.msra.gmra.mrb[0].mxu1 %vm777_vm2, %v769_v57 }
 0x19b   : > { %5889 = vmatpush3.bf16.msra.mxu1 %v6775_v11  ;;  %5511 = vmatprep.mubr.msk.f32.mxu1 %vm6627_vm0, %v6628_v21  ;;  %v4999_v58 = vld [vmem:[%s8674_s29] ss:$0 sm:$0xff] }
 0x19c   : > { %5890 = vmatprep.subr.bf16.mxu1 %v6626_v10 }
 0x19f   : > { %5892 = vmatpush3.bf16.msra.mxu1 %v6786_v14 }
 0x1a0   : > { %5893 = vmatprep.subr.bf16.mxu1 %v6626_v10 }
 0x1a3   : > { %5895 = vmatpush3.bf16.msra.mxu1 %v6796_v17 }
 0x1a4   : > { %5896 = vmatprep.subr.bf16.mxu1 %v6626_v10 }
 0x1a7   : > { %5898 = vmatpush3.bf16.msra.mxu1 %v5879_v20 }
 0x26d   : > { %v847_v62 = vpop.f32.mrb[0].mxu1 }
 0x26e   : > { %v854_v63 = vrot.slane %v847_v62, %v6849_v61  ;;  %v5494_v0 = vpop.f32.mrb[1].mxu1 }
 0x26f   : > { %v5000_v0 = vld [vmem:[%s8675_s21] ss:$0 sm:$0xff]  ;;  %s6630_s21 = smov 48  }
 0x270   : > { %v6852_v1 = vsub.f32 %v654_v28, %v854_v63  ;;  %v6854_v2 = vsub.f32 %v655_v29, %v854_v63  ;;  %v6856_v3 = vsub.f32 %v656_v30, %v854_v63  ;;  %v6858_v4 = vsub.f32 %v657_v31, %v854_v63 }
 0x271   : > { %v6860_v5 = vsub.f32 %v658_v33, %v854_v63  ;;  %v6868_v9 = vsub.f32 %v659_v39, %v854_v63  ;;  %v6874_v14 = vsub.f32 %v660_v44, %v854_v63  ;;  %v6879_v18 = vsub.f32 %v661_v48, %v854_v63  ;;  %v1083_v44 = vld [vmem:[%s8637_s5 + $0x10] sm:$0xff]  ;;  %v1086_v48 = vld [vmem:[%s8637_s5 + $0x28] sm:$0xff] }
 0x272   : > { %v863_v6 = vmul.f32 %v6852_v1, %v6852_v1  ;;  %v864_v7 = vmul.f32 %v6854_v2, %v6854_v2  ;;  %v865_v8 = vmul.f32 %v6856_v3, %v6856_v3  ;;  %v866_v10 = vmul.f32 %v6858_v4, %v6858_v4 }
 0x273   : > { %v867_v15 = vmul.f32 %v6860_v5, %v6860_v5  ;;  %v868_v19 = vmul.f32 %v6868_v9, %v6868_v9  ;;  %v869_v23 = vmul.f32 %v6874_v14, %v6874_v14  ;;  %v870_v26 = vmul.f32 %v6879_v18, %v6879_v18 }
 0x274   : > { %v871_v11 = vsel %vm670_vm1, %v863_v6, 0.0  ;;  %v872_v12 = vsel %vm670_vm1, %v864_v7, 0.0  ;;  %v874_v16 = vsel %vm670_vm1, %v865_v8, 0.0  ;;  %v876_v20 = vsel %vm670_vm1, %v866_v10, 0.0 }
 0x275   : > { %v873_v13 = vadd.f32 %v872_v12, %v871_v11  ;;  %v878_v24 = vsel %vm670_vm1, %v867_v15, 0.0  ;;  %v880_v27 = vsel %vm670_vm1, %v868_v19, 0.0  ;;  %v882_v29 = vsel %vm670_vm1, %v869_v23, 0.0 }
 0x276   : > { %v884_v31 = vsel %vm670_vm1, %v870_v26, 0.0  ;;  %v5909_v46 = vpack.c.bf16 %v1084_v45, %v1083_v44  ;;  %v5913_v50 = vpack.c.bf16 %v1086_v48, %v1085_v47 }
 0x277   : > { %v875_v17 = vadd.f32 %v874_v16, %v873_v13 }
 0x279   : > { %v877_v22 = vadd.f32 %v876_v20, %v875_v17 }
 0x27b   : > { %v879_v25 = vadd.f32 %v878_v24, %v877_v22 }
 0x27d   : > { %v881_v28 = vadd.f32 %v880_v27, %v879_v25 }
 0x27f   : > { %v883_v30 = vadd.f32 %v882_v29, %v881_v28 }
 0x281   : > { %v885_v32 = vadd.f32 %v884_v31, %v883_v30 }
 0x283   : > { %v886_v33 = vrot.slane %v885_v32, 4 }
 0x285   : > { %v887_v34 = vadd.f32 %v886_v33, %v885_v32 }
 0x287   : > { %v888_v35 = vrot.slane %v887_v34, 2 }
 0x289   : > { %v889_v36 = vadd.f32 %v888_v35, %v887_v34 }
 0x28b   : > { %v890_v37 = vrot.slane %v889_v36, 1 }
 0x28d   : > { %v891_v38 = vadd.f32 %v890_v37, %v889_v36 }
 0x28f   : > { %5512 = vmatmul.mubr.msk.f32.vlgmr.msra.gmra.mrb[2].mxu1 %vm670_vm1, %v891_v38 }
 0x290   : > { %1464 = vmatprep.mubr.f32.mxu1 %v6628_v21 }
 0x362   : > { %v961_v39 = vpop.f32.mrb[2].mxu1 }
 0x363   : > { %v5513_v40 = vpop.f32.mrb[3].mxu1  ;;  %5523 = vmatmul.mubr.msk.f32.vlgmr.msra.gmra.mrb[2].mxu0 %vm777_vm2, %v961_v39 }
 0x364   : > { %5908 = vmatpush3.bf16.msra.mxu0 %v5905_v43 }
 0x365   : > { %5910 = vmatprep.subr.bf16.mxu0 %v5909_v46 }
 0x368   : > { %5912 = vmatpush3.bf16.msra.mxu0 %v5909_v46 }
 0x369   : > { %5914 = vmatprep.subr.bf16.mxu0 %v5913_v50 }
 0x36c   : > { %5916 = vmatpush3.bf16.msra.mxu0 %v5913_v50 }
 0x36d   : > { %5918 = vmatprep.subr.bf16.mxu0 %v5917_v52 }
 0x370   : > { %5920 = vmatpush3.bf16.msra.mxu0 %v5917_v52 }
 0x436   : > { %v1034_v53 = vpop.f32.mrb[2].mxu0 }
 0x437   : > { %v1035_v54 = vadd.f32 1e-06, %v1034_v53  ;;  %v5524_v55 = vpop.f32.mrb[3].mxu0 }
 0x439   : > { %6384 = vrsqrt.f32 %v1035_v54 }
 0x443   : > { %v6385_v56 = vpop.eup %6384 }
 0x444   : > { %v1042_v57 = vrot.slane %v6385_v56, %v6849_v61 }
 0x446   : > { %v1043_v59 = vmul.f32 %v1042_v57, %v6852_v1  ;;  %v1044_v62 = vmul.f32 %v1042_v57, %v6854_v2  ;;  %v1045_v63 = vmul.f32 %v1042_v57, %v6856_v3  ;;  %v1046_v6 = vmul.f32 %v1042_v57, %v6858_v4 }
 0x447   : > { %v1047_v11 = vmul.f32 %v1042_v57, %v6860_v5  ;;  %v1048_v1 = vmul.f32 %v1042_v57, %v6868_v9  ;;  %v1049_v16 = vmul.f32 %v1042_v57, %v6874_v14  ;;  %v1050_v19 = vmul.f32 %v1042_v57, %v6879_v18  ;;  %v5001_v18 = vld [vmem:[%s8638_s6] ss:$0 sm:$0xff] }
 0x448   : > { %v1058_v7 = vmul.f32 %v4999_v58, %v1043_v59  ;;  %v1059_v8 = vmul.f32 %v4999_v58, %v1044_v62  ;;  %v1060_v10 = vmul.f32 %v4999_v58, %v1045_v63  ;;  %v1061_v15 = vmul.f32 %v4999_v58, %v1046_v6 }
 0x449   : > { %v1062_v3 = vmul.f32 %v4999_v58, %v1047_v11  ;;  %v1063_v17 = vmul.f32 %v4999_v58, %v1048_v1  ;;  %v1064_v20 = vmul.f32 %v4999_v58, %v1049_v16  ;;  %v1065_v22 = vmul.f32 %v4999_v58, %v1050_v19 }
 0x44a   : > { %v1073_v12 = vadd.f32 %v5000_v0, %v1058_v7  ;;  %v1074_v13 = vadd.f32 %v5000_v0, %v1059_v8  ;;  %v1075_v2 = vadd.f32 %v5000_v0, %v1060_v10  ;;  %v1076_v4 = vadd.f32 %v5000_v0, %v1061_v15 }
 0x44b   : > { %v1077_v5 = vadd.f32 %v5000_v0, %v1062_v3  ;;  %v1078_v9 = vadd.f32 %v5000_v0, %v1063_v17  ;;  %v1079_v23 = vadd.f32 %v5000_v0, %v1064_v20  ;;  %v1080_v14 = vadd.f32 %v5000_v0, %v1065_v22  ;;  %v1361_v20 = vld [vmem:[%s8641_s9 + $0x8] sm:$0xff] }
 0x44c   : > { %5541 = vmatprep.mubr.msk.f32.mxu0 %vm670_vm1, %v1073_v12 }
 0x44d   : > { %5542 = vmatmul.mubr.msk.f32.vlgmr.msra.gmra.mrb[4].mxu0 %vm670_vm1, %v1074_v13 }
 0x44e   : > { %5544 = vmatprep.mubr.msk.f32.mxu0 %vm670_vm1, %v1075_v2 }
 0x451   : > { %5545 = vmatmul.mubr.msk.f32.gmra.mrb[6].mxu0 %vm670_vm1, %v1076_v4 }
 0x452   : > { %5547 = vmatprep.mubr.msk.f32.mxu0 %vm670_vm1, %v1077_v5 }
 0x455   : > { %5548 = vmatmul.mubr.msk.f32.gmra.mrb[8].mxu0 %vm670_vm1, %v1078_v9  ;;  %v1363_v9 = vld [vmem:[%s8641_s9 + $0x18] sm:$0xff] }
 0x456   : > { %5550 = vmatprep.mubr.msk.f32.mxu0 %vm670_vm1, %v1079_v23 }
 0x459   : > { %5551 = vmatmul.mubr.msk.f32.gmra.mrb[10].mxu0 %vm670_vm1, %v1080_v14  ;;  %v5921_v14 = vpack.c.bf16 %v1363_v9, %v1361_v20 }
 0x45b   : > { %5922 = vmatprep.subr.bf16.mxu1 %v5921_v14  ;;  %v5011_v14 = vld [vmem:[%s8640_s8] ss:$0 sm:$0xff] }
 0x520   : > { %v5543_v24 = vpop.f32.mrb[4].mxu0 }
 0x521   : > { %v1186_v25 = vpop.f32.mrb[5].mxu0  ;;  %v6947_v27 = vadd.f32 %v5543_v24, %v5001_v18  ;;  %v1362_v24 = vld [vmem:[%s8641_s9 + $0x10] sm:$0xff] }
 0x522   : > { %v6945_v26 = vadd.f32 %v5001_v18, %v1186_v25 }
 0x523   : > { %v1230_v33 = vsel %vm670_vm1, %v6947_v27, 0.0 }
 0x524   : > { %v5546_v28 = vpop.f32.mrb[6].mxu0  ;;  %v1227_v29 = vsel %vm670_vm1, %v6945_v26, 0.0 }
 0x525   : > { %v1196_v30 = vpop.f32.mrb[7].mxu0  ;;  %1228 = vadd.xlane.f32.xlu1 %v1227_v29  ;;  %v6955_v35 = vadd.f32 %v5546_v28, %v5001_v18 }
 0x526   : > { %v6951_v31 = vadd.f32 %v5001_v18, %v1196_v30 }
 0x527   : > { %v1236_v40 = vsel %vm670_vm1, %v6955_v35, 0.0 }
 0x528   : > { %v5549_v32 = vpop.f32.mrb[8].mxu0  ;;  %v1233_v37 = vsel %vm670_vm1, %v6951_v31, 0.0 }
 0x529   : > { %v1206_v34 = vpop.f32.mrb[9].mxu0  ;;  %1231 = vadd.xlane.f32.xlu1 %v1230_v33  ;;  %v6963_v41 = vadd.f32 %v5549_v32, %v5001_v18  ;;  %v1365_v32 = vld [vmem:[%s8641_s9 + $0x28] sm:$0xff]  ;;  %v1367_v33 = vld [vmem:[%s8641_s9 + $0x38] sm:$0xff] }
 0x52a   : > { %v6959_v39 = vadd.f32 %v5001_v18, %v1206_v34 }
 0x52b   : > { %v1242_v44 = vsel %vm670_vm1, %v6963_v41, 0.0 }
 0x52c   : > { %v5552_v36 = vpop.f32.mrb[10].mxu0  ;;  %v1239_v42 = vsel %vm670_vm1, %v6959_v39, 0.0 }
 0x52d   : > { %v1216_v38 = vpop.f32.mrb[11].mxu0  ;;  %1234 = vadd.xlane.f32.xlu1 %v1233_v37  ;;  %v6971_v45 = vadd.f32 %v5552_v36, %v5001_v18  ;;  %v5925_v37 = vpack.c.bf16 %v1367_v33, %v1365_v32 }
 0x52e   : > { %v6967_v43 = vadd.f32 %v5001_v18, %v1216_v38  ;;  %v1360_v18 = vld [vmem:[%s8641_s9] sm:$0xff] }
 0x52f   : > { %v1248_v47 = vsel %vm670_vm1, %v6971_v45, 0.0  ;;  %v5923_v28 = vpack.c.bf16 %v1362_v24, %v1360_v18  ;;  %v1364_v38 = vld [vmem:[%s8641_s9 + $0x20] sm:$0xff] }
 0x530   : > { %v1245_v46 = vsel %vm670_vm1, %v6967_v43, 0.0 }
 0x531   : > { %1237 = vadd.xlane.f32.xlu1 %v1236_v40  ;;  %5924 = vmatpush1.bf16.msra.mxu1 %v5923_v28  ;;  %v1366_v40 = vld [vmem:[%s8641_s9 + $0x30] sm:$0xff] }
 0x532   : > { %5926 = vmatprep.subr.bf16.mxu1 %v5925_v37 }
 0x535   : > { %1240 = vadd.xlane.f32.xlu1 %v1239_v42  ;;  %v5927_v42 = vpack.c.bf16 %v1366_v40, %v1364_v38 }
 0x537   : > { %5928 = vmatpush1.bf16.msra.mxu1 %v5927_v42 }
 0x539   : > { %1243 = vadd.xlane.f32.xlu1 %v1242_v44 }
 0x53d   : > { %1246 = vadd.xlane.f32.xlu1 %v1245_v46  ;;  %v1369_v46 = vld [vmem:[%s8641_s9 + $0x48] sm:$0xff] }
 0x541   : > { %1249 = vadd.xlane.f32.xlu1 %v1248_v47  ;;  %v1371_v47 = vld [vmem:[%s8641_s9 + $0x58] sm:$0xff] }
 0x5b2   : > { %v1229_v48 = vpop.xlane.xlu1 %1228 }
 0x5b3   : > { %v1252_v49 = vmul.f32 0.015625, %v1229_v48 }
 0x5b5   : > { %v6978_v50 = vsub.f32 %v6945_v26, %v1252_v49  ;;  %v5929_v49 = vpack.c.bf16 %v1371_v47, %v1369_v46 }
 0x5b6   : > { %v1232_v51 = vpop.xlane.xlu1 %1231 }
 0x5b7   : > { %v1253_v52 = vmul.f32 0.015625, %v1232_v51  ;;  %v1268_v53 = vmul.f32 %v6978_v50, %v6978_v50  ;;  %v1368_v51 = vld [vmem:[%s8641_s9 + $0x40] sm:$0xff]  ;;  %5930 = vmatprep.subr.bf16.mxu1 %v5929_v49 }
 0x5b9   : > { %v6983_v54 = vsub.f32 %v6947_v27, %v1253_v52  ;;  %v1276_v55 = vsel %vm670_vm1, %v1268_v53, 0.0  ;;  %v1370_v52 = vld [vmem:[%s8641_s9 + $0x50] sm:$0xff] }
 0x5ba   : > { %1277 = vadd.xlane.f32.xlu0 %v1276_v55  ;;  %v1235_v56 = vpop.xlane.xlu1 %1234  ;;  %v5931_v53 = vpack.c.bf16 %v1370_v52, %v1368_v51  ;;  %v1373_v55 = vld [vmem:[%s8641_s9 + $0x68] sm:$0xff] }
 0x5bb   : > { %v1254_v57 = vmul.f32 0.015625, %v1235_v56  ;;  %v1269_v58 = vmul.f32 %v6983_v54, %v6983_v54  ;;  %v1375_v56 = vld [vmem:[%s8641_s9 + $0x78] sm:$0xff] }
 0x5bc   : > { %5932 = vmatpush1.bf16.msra.mxu1 %v5931_v53 }
 0x5bd   : > { %v6989_v59 = vsub.f32 %v6951_v31, %v1254_v57  ;;  %v1279_v62 = vsel %vm670_vm1, %v1269_v58, 0.0  ;;  %v5933_v57 = vpack.c.bf16 %v1375_v56, %v1373_v55  ;;  %v1372_v58 = vld [vmem:[%s8641_s9 + $0x60] sm:$0xff] }
 0x5be   : > { %1280 = vadd.xlane.f32.xlu1 %v1279_v62  ;;  %v1238_v63 = vpop.xlane.xlu1 %1237  ;;  %v1374_v62 = vld [vmem:[%s8641_s9 + $0x70] sm:$0xff] }
 0x5bf   : > { %v1255_v0 = vmul.f32 0.015625, %v1238_v63  ;;  %v1270_v6 = vmul.f32 %v6989_v59, %v6989_v59  ;;  %v5935_v63 = vpack.c.bf16 %v1374_v62, %v1372_v58  ;;  %5934 = vmatprep.subr.bf16.mxu1 %v5933_v57 }
 0x5c1   : > { %v6995_v7 = vsub.f32 %v6955_v35, %v1255_v0  ;;  %v1282_v8 = vsel %vm670_vm1, %v1270_v6, 0.0  ;;  %5936 = vmatpush1.bf16.msra.mxu1 %v5935_v63 }
 0x5c2   : > { %1283 = vadd.xlane.f32.xlu1 %v1282_v8  ;;  %v1241_v10 = vpop.xlane.xlu1 %1240 }
 0x5c3   : > { %v1256_v11 = vmul.f32 0.015625, %v1241_v10  ;;  %v1271_v12 = vmul.f32 %v6995_v7, %v6995_v7 }
 0x5c5   : > { %v7001_v13 = vsub.f32 %v6959_v39, %v1256_v11  ;;  %v1285_v15 = vsel %vm670_vm1, %v1271_v12, 0.0 }
 0x5c6   : > { %1286 = vadd.xlane.f32.xlu1 %v1285_v15  ;;  %v1244_v1 = vpop.xlane.xlu1 %1243 }
 0x5c7   : > { %v1257_v2 = vmul.f32 0.015625, %v1244_v1  ;;  %v1272_v3 = vmul.f32 %v7001_v13, %v7001_v13 }
 0x5c9   : > { %v7007_v16 = vsub.f32 %v6963_v41, %v1257_v2  ;;  %v1288_v4 = vsel %vm670_vm1, %v1272_v3, 0.0 }
 0x5ca   : > { %1289 = vadd.xlane.f32.xlu1 %v1288_v4  ;;  %v1247_v17 = vpop.xlane.xlu1 %1246 }
 0x5cb   : > { %v1258_v19 = vmul.f32 0.015625, %v1247_v17  ;;  %v1273_v5 = vmul.f32 %v7007_v16, %v7007_v16 }
 0x5cd   : > { %v7019_v22 = vsub.f32 %v6967_v43, %v1258_v19  ;;  %v1291_v23 = vsel %vm670_vm1, %v1273_v5, 0.0  ;;  %v5010_v5 = vld [vmem:[%s8639_s7] ss:$0 sm:$0xff] }
 0x5ce   : > { %1292 = vadd.xlane.f32.xlu1 %v1291_v23  ;;  %v1250_v25 = vpop.xlane.xlu1 %1249 }
 0x5cf   : > { %v1259_v29 = vmul.f32 0.015625, %v1250_v25  ;;  %v1274_v30 = vmul.f32 %v7019_v22, %v7019_v22 }
 0x5d1   : > { %v7037_v34 = vsub.f32 %v6971_v45, %v1259_v29  ;;  %v1294_v36 = vsel %vm670_vm1, %v1274_v30, 0.0 }
 0x5d2   : > { %1295 = vadd.xlane.f32.xlu1 %v1294_v36 }
 0x5d3   : > { %v1275_v44 = vmul.f32 %v7037_v34, %v7037_v34 }
 0x5d5   : > { %v1297_v48 = vsel %vm670_vm1, %v1275_v44, 0.0 }
 0x5d6   : > { %1298 = vadd.xlane.f32.xlu1 %v1297_v48 }
 0x647   : > { %v1278_v0 = vpop.xlane.xlu0 %1277 }
 0x648   : > { %v1300_v6 = vmul.f32 0.015625, %v1278_v0 }
 0x64a   : > { %v1308_v8 = vadd.f32 1e-05, %v1300_v6 }
 0x64b   : > { %v1281_v10 = vpop.xlane.xlu1 %1280 }
 0x64c   : > { %6386 = vrsqrt.f32 %v1308_v8  ;;  %v1301_v11 = vmul.f32 0.015625, %v1281_v10 }
 0x64e   : > { %v1309_v12 = vadd.f32 1e-05, %v1301_v11 }
 0x64f   : > { %v1284_v15 = vpop.xlane.xlu1 %1283 }
 0x650   : > { %6388 = vrsqrt.f32 %v1309_v12  ;;  %v1302_v1 = vmul.f32 0.015625, %v1284_v15 }
 0x652   : > { %v1310_v2 = vadd.f32 1e-05, %v1302_v1 }
 0x653   : > { %v1287_v3 = vpop.xlane.xlu1 %1286 }
 0x654   : > { %6390 = vrsqrt.f32 %v1310_v2  ;;  %v1303_v4 = vmul.f32 0.015625, %v1287_v3 }
 0x656   : > { %v6387_v17 = vpop.eup %6386  ;;  %v1311_v19 = vadd.f32 1e-05, %v1303_v4 }
 0x657   : > { %v1324_v20 = vmul.f32 %v6387_v17, %v6978_v50  ;;  %v1290_v9 = vpop.xlane.xlu1 %1289 }
 0x658   : > { %6392 = vrsqrt.f32 %v1311_v19  ;;  %v1304_v23 = vmul.f32 0.015625, %v1290_v9 }
 0x659   : > { %v1338_v18 = vmul.f32 %v5010_v5, %v1324_v20 }
 0x65a   : > { %v6389_v24 = vpop.eup %6388  ;;  %v1312_v25 = vadd.f32 1e-05, %v1304_v23 }
 0x65b   : > { %v1293_v28 = vpop.xlane.xlu1 %1292  ;;  %v1352_v29 = vadd.f32 %v5011_v14, %v1338_v18  ;;  %v1325_v30 = vmul.f32 %v6389_v24, %v6983_v54 }
 0x65c   : > { %6394 = vrsqrt.f32 %v1312_v25  ;;  %v1305_v32 = vmul.f32 0.015625, %v1293_v28 }
 0x65d   : > { %5012 = vmatmul.mubr.msk.f32.vlgmr.msra.gmra.mrb[4].mxu1 %vm670_vm1, %v1352_v29  ;;  %v1339_v33 = vmul.f32 %v5010_v5, %v1325_v30 }
 0x65e   : > { %v6391_v50 = vpop.eup %6390  ;;  %v1313_v36 = vadd.f32 1e-05, %v1305_v32  ;;  %1470 = vmatprep.mubr.f32.mxu1 %v6628_v21 }
 0x65f   : > { %v1296_v37 = vpop.xlane.xlu1 %1295  ;;  %v1353_v38 = vadd.f32 %v5011_v14, %v1339_v33  ;;  %v1326_v40 = vmul.f32 %v6391_v50, %v6989_v59 }
 0x660   : > { %6396 = vrsqrt.f32 %v1313_v36  ;;  %v1306_v42 = vmul.f32 0.015625, %v1296_v37 }
 0x661   : > { %5013 = vmatmul.mubr.msk.f32.gmra.mrb[6].mxu1 %vm670_vm1, %v1353_v38  ;;  %v1340_v44 = vmul.f32 %v5010_v5, %v1326_v40 }
 0x662   : > { %v6393_v46 = vpop.eup %6392  ;;  %v1314_v54 = vadd.f32 1e-05, %v1306_v42  ;;  %1476 = vmatprep.mubr.f32.mxu1 %v6628_v21 }
 0x663   : > { %v1299_v47 = vpop.xlane.xlu1 %1298  ;;  %v1354_v48 = vadd.f32 %v5011_v14, %v1340_v44  ;;  %v1327_v49 = vmul.f32 %v6393_v46, %v6995_v7 }
 0x664   : > { %6398 = vrsqrt.f32 %v1314_v54  ;;  %v1307_v51 = vmul.f32 0.015625, %v1299_v47 }
 0x665   : > { %5014 = vmatmul.mubr.msk.f32.gmra.mrb[8].mxu1 %vm670_vm1, %v1354_v48  ;;  %v1341_v52 = vmul.f32 %v5010_v5, %v1327_v49 }
 0x666   : > { %v6395_v53 = vpop.eup %6394  ;;  %v1315_v59 = vadd.f32 1e-05, %v1307_v51  ;;  %1482 = vmatprep.mubr.f32.mxu1 %v6628_v21 }
 0x667   : > { %v1355_v55 = vadd.f32 %v5011_v14, %v1341_v52  ;;  %v1328_v56 = vmul.f32 %v6395_v53, %v7001_v13 }
 0x668   : > { %6400 = vrsqrt.f32 %v1315_v59 }
 0x669   : > { %5015 = vmatmul.mubr.msk.f32.gmra.mrb[10].mxu1 %vm670_vm1, %v1355_v55  ;;  %v1342_v57 = vmul.f32 %v5010_v5, %v1328_v56 }
 0x66a   : > { %v6397_v58 = vpop.eup %6396  ;;  %1488 = vmatprep.mubr.f32.mxu1 %v6628_v21 }
 0x66b   : > { %v1356_v7 = vadd.f32 %v5011_v14, %v1342_v57  ;;  %v1329_v62 = vmul.f32 %v6397_v58, %v7007_v16 }
 0x66d   : > { %5016 = vmatmul.mubr.msk.f32.gmra.mrb[12].mxu1 %vm670_vm1, %v1356_v7  ;;  %v1343_v63 = vmul.f32 %v5010_v5, %v1329_v62 }
 0x66e   : > { %v6399_v0 = vpop.eup %6398  ;;  %1494 = vmatprep.mubr.f32.mxu1 %v6628_v21 }
 0x66f   : > { %v1357_v6 = vadd.f32 %v5011_v14, %v1343_v63  ;;  %v1330_v8 = vmul.f32 %v6399_v0, %v7019_v22 }
 0x671   : > { %5017 = vmatmul.mubr.msk.f32.gmra.mrb[14].mxu1 %vm670_vm1, %v1357_v6  ;;  %v1344_v13 = vmul.f32 %v5010_v5, %v1330_v8 }
 0x672   : > { %v6401_v10 = vpop.eup %6400  ;;  %1500 = vmatprep.mubr.f32.mxu1 %v6628_v21 }
 0x673   : > { %v1358_v11 = vadd.f32 %v5011_v14, %v1344_v13  ;;  %v1331_v12 = vmul.f32 %v6401_v10, %v7037_v34 }
 0x675   : > { %5018 = vmatmul.mubr.msk.f32.gmra.mrb[16].mxu1 %vm670_vm1, %v1358_v11  ;;  %v1345_v16 = vmul.f32 %v5010_v5, %v1331_v12 }
 0x676   : > { %1506 = vmatprep.mubr.f32.mxu1 %v6628_v21 }
 0x677   : > { %v1359_v15 = vadd.f32 %v5011_v14, %v1345_v16 }
 0x679   : > { %5019 = vmatmul.mubr.msk.f32.gmra.mrb[18].mxu1 %vm670_vm1, %v1359_v15 }
 0x730   : > { %v7102_v1 = vpop.f32.mrb[4].mxu1 }
 0x731   : > { %v1468_v22 = vpop.f32.mrb[5].mxu1  ;;  %5569 = vmatprep.mubr.msk.f32.mxu0 %vm1552_vm3, %v7102_v1 }
 0x734   : > { %v7106_v2 = vpop.f32.mrb[6].mxu1 }
 0x735   : > { %v1474_v3 = vpop.f32.mrb[7].mxu1  ;;  %v7110_v34 = vpack.i.bf16 %v7106_v2, %v7102_v1 }
 0x736   : > { %v7112_v4 = vpack.i.bf16 %v1474_v3, %v1468_v22  ;;  %v5961_v17 = vpack.c.bf16 %v1474_v3, %v1468_v22 }
 0x737   : > { %6245 = vrot.lane.b32.xlu1 %v7110_v34, %s6629_s0 }
 0x738   : > { %v7116_v19 = vpop.f32.mrb[8].mxu1  ;;  %5962 = vmatprep.subr.bf16.mxu1 %v5961_v17 }
 0x739   : > { %v1480_v5 = vpop.f32.mrb[9].mxu1  ;;  %5964 = vmatpush3.bf16.msra.mxu1 %v5961_v17 }
 0x73c   : > { %v7118_v20 = vpop.f32.mrb[10].mxu1 }
 0x73d   : > { %v1486_v9 = vpop.f32.mrb[11].mxu1  ;;  %v7122_v23 = vpack.i.bf16 %v7118_v20, %v7116_v19 }
 0x73e   : > { %v7124_v14 = vpack.i.bf16 %v1486_v9, %v1480_v5  ;;  %v5965_v18 = vpack.c.bf16 %v1486_v9, %v1480_v5 }
 0x73f   : > { %6250 = vrot.lane.b32.xlu0 %v7122_v23, %s6629_s0 }
 0x740   : > { %v7128_v24 = vpop.f32.mrb[12].mxu1  ;;  %5966 = vmatprep.subr.bf16.mxu1 %v5965_v18 }
 0x741   : > { %v1492_v25 = vpop.f32.mrb[13].mxu1  ;;  %5968 = vmatpush3.bf16.msra.mxu1 %v5965_v18 }
 0x744   : > { %v7130_v28 = vpop.f32.mrb[14].mxu1 }
 0x745   : > { %v1498_v29 = vpop.f32.mrb[15].mxu1  ;;  %v7134_v30 = vpack.i.bf16 %v7130_v28, %v7128_v24 }
 0x746   : > { %v7136_v32 = vpack.i.bf16 %v1498_v29, %v1492_v25  ;;  %v5969_v33 = vpack.c.bf16 %v1498_v29, %v1492_v25 }
 0x747   : > { %6255 = vrot.lane.b32.xlu1 %v7134_v30, %s6629_s0 }
 0x748   : > { %v7140_v50 = vpop.f32.mrb[16].mxu1  ;;  %5970 = vmatprep.subr.bf16.mxu1 %v5969_v33 }
 0x749   : > { %v1504_v36 = vpop.f32.mrb[17].mxu1  ;;  %5972 = vmatpush3.bf16.msra.mxu1 %v5969_v33 }
 0x74c   : > { %v7142_v37 = vpop.f32.mrb[18].mxu1 }
 0x74d   : > { %v1510_v38 = vpop.f32.mrb[19].mxu1  ;;  %v7146_v40 = vpack.i.bf16 %v7142_v37, %v7140_v50 }
 0x74e   : > { %v7148_v42 = vpack.i.bf16 %v1510_v38, %v1504_v36  ;;  %v5973_v44 = vpack.c.bf16 %v1510_v38, %v1504_v36 }
 0x74f   : > { %6260 = vrot.lane.b32.xlu1 %v7146_v40, %s6629_s0  ;;  %s6635_s0 = smov 80  }
 0x750   : > { %5974 = vmatprep.subr.bf16.mxu1 %v5973_v44 }
 0x751   : > { %5976 = vmatpush3.bf16.msra.mxu1 %v5973_v44 }
 0x7a9   : > { %v6246_v46 = vpop.permute.xlu1 %6245 }
 0x7aa   : > { %v6248_v54 = vunpack.i.h.bf16 %v6246_v46  ;;  %v6247_v47 = vunpack.i.l.bf16 %v6246_v46 }
 0x7ac   : > { %v5937_v49 = vpack.c.bf16 %v6248_v54, %v6247_v47 }
 0x7ae   : > { %5939 = vmatprep.subr.msk.bf16.mxu0 %vm7154_vm4, %v5937_v49 }
 0x7af   : > { %5942 = vmatpush3.bf16.xpose.msk.msra.mxu0 %vm7154_vm4, %v5937_v49 }
 0x7b1   : > { %v6251_v51 = vpop.permute.xlu0 %6250 }
 0x7b2   : > { %v6253_v52 = vunpack.i.h.bf16 %v6251_v51  ;;  %v6252_v53 = vunpack.i.l.bf16 %v6251_v51 }
 0x7b4   : > { %v5943_v59 = vpack.c.bf16 %v6253_v52, %v6252_v53 }
 0x7b6   : > { %5945 = vmatprep.subr.msk.bf16.mxu0 %vm7154_vm4, %v5943_v59 }
 0x7b7   : > { %5948 = vmatpush3.bf16.xpose.msk.msra.mxu0 %vm7154_vm4, %v5943_v59 }
 0x7b9   : > { %v6256_v55 = vpop.permute.xlu1 %6255 }
 0x7ba   : > { %v6258_v56 = vunpack.i.h.bf16 %v6256_v55  ;;  %v6257_v57 = vunpack.i.l.bf16 %v6256_v55 }
 0x7bc   : > { %v5949_v58 = vpack.c.bf16 %v6258_v56, %v6257_v57 }
 0x7be   : > { %5951 = vmatprep.subr.msk.bf16.mxu0 %vm7154_vm4, %v5949_v58 }
 0x7bf   : > { %5954 = vmatpush3.bf16.xpose.msk.msra.mxu0 %vm7154_vm4, %v5949_v58 }
 0x7c1   : > { %v6261_v7 = vpop.permute.xlu1 %6260 }
 0x7c2   : > { %v6263_v62 = vunpack.i.h.bf16 %v6261_v7  ;;  %v6262_v63 = vunpack.i.l.bf16 %v6261_v7 }
 0x7c4   : > { %v5955_v0 = vpack.c.bf16 %v6263_v62, %v6262_v63 }
 0x7c6   : > { %5957 = vmatprep.subr.msk.bf16.mxu0 %vm7154_vm4, %v5955_v0 }
 0x7c7   : > { %5960 = vmatpush3.bf16.xpose.msk.msra.mxu0 %vm7154_vm4, %v5955_v0 }
 0x7ce   : > { %5570 = vmatmul.mubr.msk.f32.vlgmr.msra.gmra.mrb[12].mxu0 %vm1552_vm3, %v7106_v2 }
 0x7cf   : > { %5572 = vmatprep.mubr.msk.f32.mxu0 %vm1552_vm3, %v7116_v19 }
 0x7d2   : > { %5573 = vmatmul.mubr.msk.f32.gmra.mrb[14].mxu0 %vm1552_vm3, %v7118_v20 }
 0x7d3   : > { %5575 = vmatprep.mubr.msk.f32.mxu0 %vm1552_vm3, %v7128_v24 }
 0x7d6   : > { %5576 = vmatmul.mubr.msk.f32.gmra.mrb[16].mxu0 %vm1552_vm3, %v7130_v28 }
 0x7d7   : > { %5578 = vmatprep.mubr.msk.f32.mxu0 %vm1552_vm3, %v7140_v50 }
 0x7da   : > { %5579 = vmatmul.mubr.msk.f32.gmra.mrb[18].mxu0 %vm1552_vm3, %v7142_v37 }
 0x8a1   : > { %v5571_v6 = vpop.f32.mrb[12].mxu0 }
 0x8a2   : > { %v1651_v8 = vpop.f32.mrb[13].mxu0  ;;  %v1693_v13 = vsel %vm670_vm1, %v5571_v6, -inf }
 0x8a3   : > { %1694 = vmax.xlane.f32.xlu0 %v1693_v13  ;;  %v1690_v10 = vsel %vm670_vm1, %v1651_v8, -inf }
 0x8a4   : > { %1691 = vmax.xlane.f32.xlu1 %v1690_v10 }
 0x8a5   : > { %v5574_v11 = vpop.f32.mrb[14].mxu0 }
 0x8a6   : > { %v1661_v12 = vpop.f32.mrb[15].mxu0  ;;  %v1699_v16 = vsel %vm670_vm1, %v5574_v11, -inf }
 0x8a7   : > { %v1696_v17 = vsel %vm670_vm1, %v1661_v12, -inf }
 0x8a8   : > { %1700 = vmax.xlane.f32.xlu1 %v1699_v16 }
 0x8a9   : > { %v5577_v15 = vpop.f32.mrb[16].mxu0 }
 0x8aa   : > { %v1671_v22 = vpop.f32.mrb[17].mxu0  ;;  %v1705_v3 = vsel %vm670_vm1, %v5577_v15, -inf }
 0x8ab   : > { %1706 = vmax.xlane.f32.xlu0 %v1705_v3  ;;  %v1702_v25 = vsel %vm670_vm1, %v1671_v22, -inf }
 0x8ac   : > { %1697 = vmax.xlane.f32.xlu1 %v1696_v17 }
 0x8ad   : > { %v5580_v5 = vpop.f32.mrb[18].mxu0 }
 0x8ae   : > { %v1681_v9 = vpop.f32.mrb[19].mxu0  ;;  %v1711_v18 = vsel %vm670_vm1, %v5580_v5, -inf }
 0x8af   : > { %1712 = vmax.xlane.f32.xlu0 %v1711_v18  ;;  %v1708_v29 = vsel %vm670_vm1, %v1681_v9, -inf }
 0x8b0   : > { %1703 = vmax.xlane.f32.xlu1 %v1702_v25 }
 0x8b4   : > { %1709 = vmax.xlane.f32.xlu1 %v1708_v29 }
 0x8c5   : > { %6265 = vrot.lane.b32.xlu1 %v7110_v34, %s6630_s21 }
 0x930   : > { %v1695_v33 = vpop.xlane.xlu0 %1694 }
 0x931   : > { %v1715_v36 = vsub.f32 %v5571_v6, %v1695_v33  ;;  %v1692_v38 = vpop.xlane.xlu1 %1691 }
 0x932   : > { %v1714_v44 = vsub.f32 %v1651_v8, %v1692_v38 }
 0x933   : > { %v1724_v46 = vmul.f32 1.442695, %v1715_v36 }
 0x934   : > { %v1722_v54 = vmul.f32 1.442695, %v1714_v44 }
 0x935   : > { %6402 = vpow2.f32 %v1724_v46  ;;  %v1701_v47 = vpop.xlane.xlu1 %1700 }
 0x936   : > { %6404 = vpow2.f32 %v1722_v54  ;;  %v1717_v49 = vsub.f32 %v5574_v11, %v1701_v47 }
 0x938   : > { %v1728_v51 = vmul.f32 1.442695, %v1717_v49  ;;  %v1707_v52 = vpop.xlane.xlu0 %1706 }
 0x939   : > { %v1719_v53 = vsub.f32 %v5577_v15, %v1707_v52  ;;  %v1698_v59 = vpop.xlane.xlu1 %1697  ;;  %v1908_v52 = vld [vmem:[%s8642_s10 + $0x8] sm:$0xff] }
 0x93a   : > { %6406 = vpow2.f32 %v1728_v51  ;;  %v1716_v55 = vsub.f32 %v1661_v12, %v1698_v59  ;;  %v1907_v51 = vld [vmem:[%s8642_s10] sm:$0xff] }
 0x93b   : > { %v1732_v56 = vmul.f32 1.442695, %v1719_v53  ;;  %v5977_v53 = vpack.c.bf16 %v1908_v52, %v1907_v51 }
 0x93c   : > { %v1726_v57 = vmul.f32 1.442695, %v1716_v55  ;;  %v1713_v58 = vpop.xlane.xlu0 %1712 }
 0x93d   : > { %6408 = vpow2.f32 %v1732_v56  ;;  %v1721_v7 = vsub.f32 %v5580_v5, %v1713_v58  ;;  %v1704_v62 = vpop.xlane.xlu1 %1703  ;;  %5978 = vmatprep.subr.bf16.mxu0 %v5977_v53 }
 0x93e   : > { %6410 = vpow2.f32 %v1726_v57  ;;  %v1718_v63 = vsub.f32 %v1671_v22, %v1704_v62  ;;  %5980 = vmatpush3.bf16.msra.mxu0 %v5977_v53 }
 0x93f   : > { %v7198_v0 = vpop.eup %6402  ;;  %v1736_v6 = vmul.f32 1.442695, %v1721_v7 }
 0x940   : > { %v7200_v8 = vpop.eup %6404  ;;  %v1730_v13 = vmul.f32 1.442695, %v1718_v63  ;;  %v1741_v10 = vsel %vm670_vm1, %v7198_v0, 0.0 }
 0x941   : > { %6412 = vpow2.f32 %v1736_v6  ;;  %1742 = vadd.xlane.f32.xlu0 %v1741_v10  ;;  %v1710_v11 = vpop.xlane.xlu1 %1709  ;;  %v1738_v12 = vsel %vm670_vm1, %v7200_v8, 0.0 }
 0x942   : > { %6414 = vpow2.f32 %v1730_v13  ;;  %v1720_v16 = vsub.f32 %v1681_v9, %v1710_v11  ;;  %1739 = vadd.xlane.f32.xlu1 %v1738_v12 }
 0x944   : > { %v7206_v15 = vpop.eup %6406  ;;  %v1734_v22 = vmul.f32 1.442695, %v1720_v16 }
 0x945   : > { %v6266_v3 = vpop.permute.xlu1 %6265  ;;  %v1747_v17 = vsel %vm670_vm1, %v7206_v15, 0.0 }
 0x946   : > { %6416 = vpow2.f32 %v1734_v22  ;;  %v6268_v5 = vunpack.i.h.bf16 %v6266_v3  ;;  %v6267_v18 = vunpack.i.l.bf16 %v6266_v3  ;;  %1748 = vadd.xlane.f32.xlu0 %v1747_v17 }
 0x947   : > { %v7210_v25 = vpop.eup %6408 }
 0x948   : > { %v7212_v29 = vpop.eup %6410  ;;  %v7214_v33 = vpack.c.bf16 %v6268_v5, %v6267_v18  ;;  %v1753_v9 = vsel %vm670_vm1, %v7210_v25, 0.0 }
 0x949   : > { %v1744_v36 = vsel %vm670_vm1, %v7212_v29, 0.0 }
 0x94a   : > { %1754 = vadd.xlane.f32.xlu0 %v1753_v9  ;;  %1745 = vadd.xlane.f32.xlu1 %v1744_v36 }
 0x94b   : > { %v7220_v38 = vpop.eup %6412  ;;  %5983 = vmatprep.subr.msk.bf16.mxu1 %vm7154_vm4, %v7214_v33 }
 0x94c   : > { %v7225_v44 = vpop.eup %6414  ;;  %v1759_v46 = vsel %vm670_vm1, %v7220_v38, 0.0 }
 0x94d   : > { %v1750_v54 = vsel %vm670_vm1, %v7225_v44, 0.0 }
 0x94e   : > { %1760 = vadd.xlane.f32.xlu0 %v1759_v46  ;;  %1751 = vadd.xlane.f32.xlu1 %v1750_v54 }
 0x950   : > { %v7231_v47 = vpop.eup %6416 }
 0x951   : > { %v1756_v49 = vsel %vm670_vm1, %v7231_v47, 0.0 }
 0x952   : > { %1757 = vadd.xlane.f32.xlu0 %v1756_v49 }
 0x95f   : > { %6275 = vrot.lane.b32.xlu1 %v7134_v30, %s6630_s21 }
 0x963   : > { %6280 = vrot.lane.b32.xlu1 %v7146_v40, %s6630_s21 }
 0x967   : > { %2046 = vrot.lane.b32.xlu1 %v7102_v1, %s6631_s24 }
 0x968   : > { %6270 = vrot.lane.b32.xlu0 %v7122_v23, %s6630_s21 }
 0x96b   : > { %2048 = vrot.lane.b32.xlu1 %v7106_v2, %s6631_s24 }
 0x96c   : > { %2050 = vrot.lane.b32.xlu0 %v7116_v19, %s6631_s24 }
 0x96f   : > { %2052 = vrot.lane.b32.xlu1 %v7118_v20, %s6631_s24 }
 0x970   : > { %2054 = vrot.lane.b32.xlu0 %v7128_v24, %s6631_s24 }
 0x973   : > { %2056 = vrot.lane.b32.xlu1 %v7130_v28, %s6631_s24 }
 0x974   : > { %2058 = vrot.lane.b32.xlu0 %v7140_v50, %s6631_s24 }
 0x977   : > { %2060 = vrot.lane.b32.xlu1 %v7142_v37, %s6631_s24 }
 0x978   : > { %6285 = vrot.lane.b32.xlu0 %v7110_v34, %s6632_s25 }
 0x97b   : > { %6290 = vrot.lane.b32.xlu1 %v7122_v23, %s6632_s25 }
 0x97c   : > { %6295 = vrot.lane.b32.xlu0 %v7134_v30, %s6632_s25 }
 0x97f   : > { %6300 = vrot.lane.b32.xlu1 %v7146_v40, %s6632_s25 }
 0x980   : > { %2603 = vrot.lane.b32.xlu0 %v7102_v1, %s6633_s26 }
 0x983   : > { %2605 = vrot.lane.b32.xlu1 %v7106_v2, %s6633_s26 }
 0x984   : > { %2607 = vrot.lane.b32.xlu0 %v7116_v19, %s6633_s26 }
 0x987   : > { %2609 = vrot.lane.b32.xlu1 %v7118_v20, %s6633_s26 }
 0x988   : > { %2611 = vrot.lane.b32.xlu0 %v7128_v24, %s6633_s26 }
 0x98b   : > { %2613 = vrot.lane.b32.xlu1 %v7130_v28, %s6633_s26 }
 0x98c   : > { %2615 = vrot.lane.b32.xlu0 %v7140_v50, %s6633_s26 }
 0x98f   : > { %2617 = vrot.lane.b32.xlu1 %v7142_v37, %s6633_s26 }
 0x9ce   : > { %v1743_v59 = vpop.xlane.xlu0 %1742 }
 0x9cf   : > { %6418 = vrcp.f32 %v1743_v59  ;;  %v1740_v55 = vpop.xlane.xlu1 %1739 }
 0x9d0   : > { %6420 = vrcp.f32 %v1740_v55 }
 0x9d3   : > { %v1749_v56 = vpop.xlane.xlu0 %1748 }
 0x9d4   : > { %6422 = vrcp.f32 %v1749_v56 }
 0x9d7   : > { %v1755_v57 = vpop.xlane.xlu0 %1754  ;;  %v1746_v58 = vpop.xlane.xlu1 %1745 }
 0x9d8   : > { %6424 = vrcp.f32 %v1746_v58 }
 0x9d9   : > { %v6419_v7 = vpop.eup %6418  ;;  %6426 = vrcp.f32 %v1755_v57 }
 0x9da   : > { %v6421_v62 = vpop.eup %6420  ;;  %v1771_v10 = vmul.f32 %v6419_v7, %v7198_v0 }
 0x9db   : > { %v1761_v63 = vpop.xlane.xlu0 %1760  ;;  %v1752_v6 = vpop.xlane.xlu1 %1751  ;;  %v1770_v13 = vmul.f32 %v6421_v62, %v7200_v8 }
 0x9dc   : > { %6428 = vrcp.f32 %v1752_v6 }
 0x9dd   : > { %5597 = vmatprep.mubr.msk.f32.mxu1 %vm670_vm1, %v1770_v13 }
 0x9de   : > { %5598 = vmatmul.mubr.msk.f32.vlgmr.msra.gmra.mrb[20].mxu1 %vm670_vm1, %v1771_v10  ;;  %v6423_v16 = vpop.eup %6422 }
 0x9df   : > { %5986 = vmatpush3.bf16.xpose.msk.msra.mxu1 %vm7154_vm4, %v7214_v33  ;;  %v1758_v11 = vpop.xlane.xlu0 %1757  ;;  %v6276_v12 = vpop.permute.xlu1 %6275  ;;  %v1773_v54 = vmul.f32 %v6423_v16, %v7206_v15 }
 0x9e0   : > { %6430 = vrcp.f32 %v1758_v11  ;;  %v6278_v17 = vunpack.i.h.bf16 %v6276_v12  ;;  %v6277_v0 = vunpack.i.l.bf16 %v6276_v12 }
 0x9e1   : > { %6432 = vrcp.f32 %v1761_v63 }
 0x9e2   : > { %v6425_v22 = vpop.eup %6424  ;;  %v5993_v52 = vpack.c.bf16 %v6278_v17, %v6277_v0 }
 0x9e3   : > { %v6271_v3 = vpop.permute.xlu0 %6270  ;;  %v6281_v8 = vpop.permute.xlu1 %6280  ;;  %v1772_v9 = vmul.f32 %v6425_v22, %v7212_v29 }
 0x9e4   : > { %v6273_v5 = vunpack.i.h.bf16 %v6271_v3  ;;  %v6272_v18 = vunpack.i.l.bf16 %v6271_v3  ;;  %v6427_v36 = vpop.eup %6426  ;;  %v6283_v58 = vunpack.i.h.bf16 %v6281_v8  ;;  %v6282_v7 = vunpack.i.l.bf16 %v6281_v8 }
 0x9e5   : > { %5600 = vmatprep.mubr.msk.f32.mxu1 %vm670_vm1, %v1772_v9  ;;  %v1775_v15 = vmul.f32 %v6427_v36, %v7210_v25 }
 0x9e6   : > { %v5987_v46 = vpack.c.bf16 %v6273_v5, %v6272_v18  ;;  %v6429_v49 = vpop.eup %6428  ;;  %5601 = vmatmul.mubr.msk.f32.gmra.mrb[22].mxu1 %vm670_vm1, %v1773_v54  ;;  %v5999_v6 = vpack.c.bf16 %v6283_v58, %v6282_v7 }
 0x9e7   : > { %v2051_v33 = vpop.permute.xlu0 %2050  ;;  %v2047_v51 = vpop.permute.xlu1 %2046  ;;  %v1774_v53 = vmul.f32 %v6429_v49, %v7225_v44 }
 0x9e8   : > { %5989 = vmatprep.subr.msk.bf16.mxu1 %vm7154_vm4, %v5987_v46 }
 0x9e9   : > { %5992 = vmatpush3.bf16.xpose.msk.msra.mxu1 %vm7154_vm4, %v5987_v46  ;;  %5603 = vmatprep.mubr.msk.f32.mxu1 %vm670_vm1, %v1774_v53 }
 0x9ea   : > { %v6431_v29 = vpop.eup %6430  ;;  %5995 = vmatprep.subr.msk.bf16.mxu1 %vm7154_vm4, %v5993_v52  ;;  %5604 = vmatmul.mubr.msk.f32.gmra.mrb[24].mxu1 %vm670_vm1, %v1775_v15 }
 0x9eb   : > { %v6433_v59 = vpop.eup %6432  ;;  %v2055_v55 = vpop.permute.xlu0 %2054  ;;  %v1776_v57 = vmul.f32 %v6431_v29, %v7231_v47 }
 0x9ec   : > { %v2049_v56 = vpop.permute.xlu1 %2048  ;;  %v1777_v44 = vmul.f32 %v6433_v59, %v7220_v38 }
 0x9ed   : > { %5606 = vmatprep.mubr.msk.f32.mxu1 %vm670_vm1, %v1776_v57 }
 0x9ee   : > { %5607 = vmatmul.mubr.msk.f32.gmra.mrb[26].mxu1 %vm670_vm1, %v1777_v44 }
 0x9ef   : > { %v2059_v62 = vpop.permute.xlu0 %2058  ;;  %5641 = vmatprep.mubr.msk.f32.mxu1 %vm1552_vm3, %v2047_v51 }
 0x9f0   : > { %v2053_v63 = vpop.permute.xlu1 %2052 }
 0x9f1   : > { %5998 = vmatpush3.bf16.xpose.msk.msra.mxu1 %vm7154_vm4, %v5993_v52 }
 0x9f2   : > { %6001 = vmatprep.subr.msk.bf16.mxu1 %vm7154_vm4, %v5999_v6 }
 0x9f3   : > { %v6286_v25 = vpop.permute.xlu0 %6285 }
 0x9f4   : > { %v2057_v47 = vpop.permute.xlu1 %2056  ;;  %v6288_v13 = vunpack.i.h.bf16 %v6286_v25  ;;  %v6287_v10 = vunpack.i.l.bf16 %v6286_v25 }
 0x9f6   : > { %v6025_v12 = vpack.c.bf16 %v6288_v13, %v6287_v10 }
 0x9f7   : > { %v6296_v8 = vpop.permute.xlu0 %6295 }
 0x9f8   : > { %v2061_v11 = vpop.permute.xlu1 %2060  ;;  %v6298_v17 = vunpack.i.h.bf16 %v6296_v8  ;;  %v6297_v0 = vunpack.i.l.bf16 %v6296_v8 }
 0x9f9   : > { %6004 = vmatpush3.bf16.xpose.msk.msra.mxu1 %vm7154_vm4, %v5999_v6 }
 0x9fa   : > { %6027 = vmatprep.subr.msk.bf16.mxu1 %vm7154_vm4, %v6025_v12  ;;  %v6037_v5 = vpack.c.bf16 %v6298_v17, %v6297_v0 }
 0x9fb   : > { %v2604_v9 = vpop.permute.xlu0 %2603 }
 0x9fc   : > { %v6291_v38 = vpop.permute.xlu1 %6290 }
 0x9fd   : > { %v6293_v16 = vunpack.i.h.bf16 %v6291_v38  ;;  %v6292_v22 = vunpack.i.l.bf16 %v6291_v38 }
 0x9ff   : > { %v6031_v3 = vpack.c.bf16 %v6293_v16, %v6292_v22 }
 0xa00   : > { %5642 = vmatmul.mubr.msk.f32.vlgmr.msra.gmra.mrb[28].mxu1 %vm1552_vm3, %v2049_v56  ;;  %v6301_v18 = vpop.permute.xlu1 %6300 }
 0xa01   : > { %5644 = vmatprep.mubr.msk.f32.mxu1 %vm1552_vm3, %v2051_v33  ;;  %6030 = vmatpush3.bf16.xpose.msk.msra.mxu1 %vm7154_vm4, %v6025_v12  ;;  %v6303_v36 = vunpack.i.h.bf16 %v6301_v18  ;;  %v6302_v46 = vunpack.i.l.bf16 %v6301_v18  ;;  %v2608_v33 = vpop.permute.xlu0 %2607 }
 0xa02   : > { %6033 = vmatprep.subr.msk.bf16.mxu1 %vm7154_vm4, %v6031_v3 }
 0xa03   : > { %v6043_v54 = vpack.c.bf16 %v6303_v36, %v6302_v46 }
 0xa04   : > { %5645 = vmatmul.mubr.msk.f32.gmra.mrb[30].mxu1 %vm1552_vm3, %v2053_v63  ;;  %v2606_v49 = vpop.permute.xlu1 %2605 }
 0xa05   : > { %5647 = vmatprep.mubr.msk.f32.mxu1 %vm1552_vm3, %v2055_v55  ;;  %v2612_v52 = vpop.permute.xlu0 %2611 }
 0xa08   : > { %5648 = vmatmul.mubr.msk.f32.gmra.mrb[32].mxu1 %vm1552_vm3, %v2057_v47  ;;  %v2610_v51 = vpop.permute.xlu1 %2609 }
 0xa09   : > { %5650 = vmatprep.mubr.msk.f32.mxu1 %vm1552_vm3, %v2059_v62  ;;  %6036 = vmatpush3.bf16.xpose.msk.msra.mxu1 %vm7154_vm4, %v6031_v3  ;;  %v2616_v29 = vpop.permute.xlu0 %2615 }
 0xa0a   : > { %6039 = vmatprep.subr.msk.bf16.mxu1 %vm7154_vm4, %v6037_v5 }
 0xa0c   : > { %5651 = vmatmul.mubr.msk.f32.gmra.mrb[34].mxu1 %vm1552_vm3, %v2061_v11  ;;  %v2614_v53 = vpop.permute.xlu1 %2613 }
 0xa0d   : > { %5713 = vmatprep.mubr.msk.f32.mxu1 %vm1552_vm3, %v2604_v9 }
 0xa10   : > { %v2618_v15 = vpop.permute.xlu1 %2617 }
 0xa11   : > { %6042 = vmatpush3.bf16.xpose.msk.msra.mxu1 %vm7154_vm4, %v6037_v5 }
 0xa12   : > { %6045 = vmatprep.subr.msk.bf16.mxu1 %vm7154_vm4, %v6043_v54 }
 0xa19   : > { %6048 = vmatpush3.bf16.xpose.msk.msra.mxu1 %vm7154_vm4, %v6043_v54 }
 0xa20   : > { %5714 = vmatmul.mubr.msk.f32.vlgmr.msra.gmra.mrb[36].mxu1 %vm1552_vm3, %v2606_v49 }
 0xa21   : > { %5716 = vmatprep.mubr.msk.f32.mxu1 %vm1552_vm3, %v2608_v33 }
 0xa24   : > { %5717 = vmatmul.mubr.msk.f32.gmra.mrb[38].mxu1 %vm1552_vm3, %v2610_v51 }
 0xa25   : > { %5719 = vmatprep.mubr.msk.f32.mxu1 %vm1552_vm3, %v2612_v52 }
 0xa28   : > { %5720 = vmatmul.mubr.msk.f32.gmra.mrb[40].mxu1 %vm1552_vm3, %v2614_v53 }
 0xa29   : > { %5722 = vmatprep.mubr.msk.f32.mxu1 %vm1552_vm3, %v2616_v29 }
 0xa2c   : > { %5723 = vmatmul.mubr.msk.f32.gmra.mrb[42].mxu1 %vm1552_vm3, %v2618_v15 }
 0xab1   : > { %v5599_v59 = vpop.f32.mrb[20].mxu1 }
 0xab2   : > { %v1868_v55 = vpop.f32.mrb[21].mxu1 }
 0xab3   : > { %5613 = vmatprep.mubr.msk.f32.mxu0 %vm1552_vm3, %v1868_v55 }
 0xab4   : > { %5614 = vmatmul.mubr.msk.f32.vlgmr.msra.gmra.mrb[20].mxu0 %vm1552_vm3, %v5599_v59 }
 0xab9   : > { %v5602_v56 = vpop.f32.mrb[22].mxu1 }
 0xaba   : > { %v1878_v57 = vpop.f32.mrb[23].mxu1 }
 0xabb   : > { %5616 = vmatprep.mubr.msk.f32.mxu0 %vm1552_vm3, %v1878_v57 }
 0xabc   : > { %5617 = vmatmul.mubr.msk.f32.gmra.mrb[22].mxu0 %vm1552_vm3, %v5602_v56 }
 0xabd   : > { %v5605_v58 = vpop.f32.mrb[24].mxu1 }
 0xabe   : > { %v1888_v7 = vpop.f32.mrb[25].mxu1 }
 0xabf   : > { %5619 = vmatprep.mubr.msk.f32.mxu0 %vm1552_vm3, %v1888_v7 }
 0xac0   : > { %5620 = vmatmul.mubr.msk.f32.gmra.mrb[24].mxu0 %vm1552_vm3, %v5605_v58 }
 0xac1   : > { %v5608_v44 = vpop.f32.mrb[26].mxu1 }
 0xac2   : > { %v1898_v62 = vpop.f32.mrb[27].mxu1 }
 0xac3   : > { %5622 = vmatprep.mubr.msk.f32.mxu0 %vm1552_vm3, %v1898_v62 }
 0xac4   : > { %5623 = vmatmul.mubr.msk.f32.gmra.mrb[26].mxu0 %vm1552_vm3, %v5608_v44 }
 0xad3   : > { %v5643_v63 = vpop.f32.mrb[28].mxu1 }
 0xad4   : > { %v2176_v6 = vpop.f32.mrb[29].mxu1  ;;  %v2218_v25 = vsel %vm670_vm1, %v5643_v63, -inf }
 0xad5   : > { %2219 = vmax.xlane.f32.xlu1 %v2218_v25  ;;  %v2215_v47 = vsel %vm670_vm1, %v2176_v6, -inf }
 0xad6   : > { %2216 = vmax.xlane.f32.xlu0 %v2215_v47 }
 0xad7   : > { %v5646_v13 = vpop.f32.mrb[30].mxu1 }
 0xad8   : > { %v2186_v10 = vpop.f32.mrb[31].mxu1  ;;  %v2224_v16 = vsel %vm670_vm1, %v5646_v13, -inf }
 0xad9   : > { %v2221_v11 = vsel %vm670_vm1, %v2186_v10, -inf }
 0xada   : > { %2222 = vmax.xlane.f32.xlu0 %v2221_v11 }
 0xadb   : > { %v5649_v12 = vpop.f32.mrb[32].mxu1 }
 0xadc   : > { %v2196_v38 = vpop.f32.mrb[33].mxu1  ;;  %v2230_v17 = vsel %vm670_vm1, %v5649_v12, -inf }
 0xadd   : > { %v2227_v22 = vsel %vm670_vm1, %v2196_v38, -inf }
 0xade   : > { %2225 = vmax.xlane.f32.xlu0 %v2224_v16  ;;  %2228 = vmax.xlane.f32.xlu1 %v2227_v22 }
 0xadf   : > { %v5652_v3 = vpop.f32.mrb[34].mxu1 }
 0xae0   : > { %v2206_v8 = vpop.f32.mrb[35].mxu1  ;;  %v2236_v5 = vsel %vm670_vm1, %v5652_v3, -inf }
 0xae1   : > { %v2233_v0 = vsel %vm670_vm1, %v2206_v8, -inf }
 0xae2   : > { %2231 = vmax.xlane.f32.xlu0 %v2230_v17  ;;  %2234 = vmax.xlane.f32.xlu1 %v2233_v0 }
 0xae6   : > { %2237 = vmax.xlane.f32.xlu0 %v2236_v5 }
 0xaf3   : > { %v7362_v18 = vpop.f32.mrb[36].mxu1  ;;  %6305 = vrot.lane.b32.xlu1 %v7112_v4, %s6631_s24 }
 0xaf4   : > { %v7366_v9 = vpop.f32.mrb[37].mxu1 }
 0xaf7   : > { %v7368_v36 = vpop.f32.mrb[38].mxu1 }
 0xaf8   : > { %v7370_v46 = vpop.f32.mrb[39].mxu1 }
 0xafb   : > { %v7372_v54 = vpop.f32.mrb[40].mxu1 }
 0xafc   : > { %v7374_v49 = vpop.f32.mrb[41].mxu1 }
 0xaff   : > { %v7376_v33 = vpop.f32.mrb[42].mxu1 }
 0xb00   : > { %v7378_v51 = vpop.f32.mrb[43].mxu1 }
 0xb62   : > { %v2220_v52 = vpop.xlane.xlu1 %2219 }
 0xb63   : > { %v2240_v53 = vsub.f32 %v5643_v63, %v2220_v52  ;;  %v2217_v29 = vpop.xlane.xlu0 %2216 }
 0xb64   : > { %v2239_v15 = vsub.f32 %v2176_v6, %v2217_v29 }
 0xb65   : > { %v2249_v59 = vmul.f32 1.442695, %v2240_v53 }
 0xb66   : > { %v2247_v55 = vmul.f32 1.442695, %v2239_v15 }
 0xb67   : > { %6434 = vpow2.f32 %v2249_v59  ;;  %v2223_v56 = vpop.xlane.xlu0 %2222 }
 0xb68   : > { %6436 = vpow2.f32 %v2247_v55  ;;  %v2241_v57 = vsub.f32 %v2186_v10, %v2223_v56 }
 0xb6a   : > { %v2251_v58 = vmul.f32 1.442695, %v2241_v57 }
 0xb6b   : > { %v2226_v7 = vpop.xlane.xlu0 %2225  ;;  %v2229_v44 = vpop.xlane.xlu1 %2228 }
 0xb6c   : > { %6438 = vpow2.f32 %v2251_v58  ;;  %v2242_v62 = vsub.f32 %v5646_v13, %v2226_v7  ;;  %v2243_v25 = vsub.f32 %v2196_v38, %v2229_v44 }
 0xb6e   : > { %v2253_v47 = vmul.f32 1.442695, %v2242_v62  ;;  %v2255_v11 = vmul.f32 1.442695, %v2243_v25 }
 0xb6f   : > { %v2232_v16 = vpop.xlane.xlu0 %2231  ;;  %v2235_v22 = vpop.xlane.xlu1 %2234 }
 0xb70   : > { %6440 = vpow2.f32 %v2253_v47  ;;  %v2244_v63 = vsub.f32 %v5649_v12, %v2232_v16  ;;  %v2245_v5 = vsub.f32 %v2206_v8, %v2235_v22 }
 0xb71   : > { %v7380_v17 = vpop.eup %6434  ;;  %6442 = vpow2.f32 %v2255_v11 }
 0xb72   : > { %v7382_v6 = vpop.eup %6436  ;;  %v2257_v0 = vmul.f32 1.442695, %v2244_v63  ;;  %v2266_v10 = vsel %vm670_vm1, %v7380_v17, 0.0  ;;  %v2259_v59 = vmul.f32 1.442695, %v2245_v5 }
 0xb73   : > { %2267 = vadd.xlane.f32.xlu0 %v2266_v10  ;;  %v2238_v52 = vpop.xlane.xlu0 %2237  ;;  %v6306_v13 = vpop.permute.xlu1 %6305  ;;  %v2263_v38 = vsel %vm670_vm1, %v7382_v6, 0.0 }
 0xb74   : > { %6444 = vpow2.f32 %v2257_v0  ;;  %v2246_v53 = vsub.f32 %v5652_v3, %v2238_v52  ;;  %v6308_v29 = vunpack.i.h.bf16 %v6306_v13  ;;  %v6307_v12 = vunpack.i.l.bf16 %v6306_v13  ;;  %2264 = vadd.xlane.f32.xlu1 %v2263_v38 }
 0xb76   : > { %v7388_v15 = vpop.eup %6438  ;;  %v2261_v55 = vmul.f32 1.442695, %v2246_v53  ;;  %v6005_v56 = vpack.c.bf16 %v6308_v29, %v6307_v12 }
 0xb77   : > { %v2269_v8 = vsel %vm670_vm1, %v7388_v15, 0.0 }
 0xb78   : > { %6446 = vpow2.f32 %v2261_v55  ;;  %2270 = vadd.xlane.f32.xlu1 %v2269_v8  ;;  %6006 = vmatprep.subr.bf16.mxu0 %v6005_v56 }
 0xb79   : > { %6008 = vmatpush3.bf16.msra.mxu0 %v6005_v56  ;;  %6448 = vpow2.f32 %v2259_v59 }
 0xb7a   : > { %v7392_v57 = vpop.eup %6440 }
 0xb7b   : > { %v7394_v58 = vpop.eup %6442  ;;  %v2272_v3 = vsel %vm670_vm1, %v7392_v57, 0.0 }
 0xb7c   : > { %2273 = vadd.xlane.f32.xlu0 %v2272_v3  ;;  %v2275_v7 = vsel %vm670_vm1, %v7394_v58, 0.0 }
 0xb7d   : > { %2276 = vadd.xlane.f32.xlu1 %v2275_v7 }
 0xb7e   : > { %v7400_v44 = vpop.eup %6444 }
 0xb7f   : > { %v2278_v62 = vsel %vm670_vm1, %v7400_v44, 0.0 }
 0xb80   : > { %2279 = vadd.xlane.f32.xlu0 %v2278_v62 }
 0xb82   : > { %v7404_v25 = vpop.eup %6446 }
 0xb83   : > { %v2284_v47 = vsel %vm670_vm1, %v7404_v25, 0.0  ;;  %v7408_v11 = vpop.eup %6448 }
 0xb84   : > { %2285 = vadd.xlane.f32.xlu0 %v2284_v47  ;;  %v2281_v16 = vsel %vm670_vm1, %v7408_v11, 0.0 }
 0xb88   : > { %2282 = vadd.xlane.f32.xlu0 %v2281_v16 }
 0xb8e   : > { %6315 = vrot.lane.b32.xlu1 %v7136_v32, %s6631_s24 }
 0xb92   : > { %6320 = vrot.lane.b32.xlu1 %v7148_v42, %s6631_s24 }
 0xb96   : > { %6325 = vrot.lane.b32.xlu1 %v7110_v34, %s6634_s30  ;;  %v2778_v34 = vsel %vm670_vm1, %v7370_v46, -inf }
 0xb9a   : > { %6330 = vrot.lane.b32.xlu1 %v7122_v23, %s6634_s30  ;;  %v2790_v23 = vsel %vm670_vm1, %v7378_v51, -inf }
 0xb9e   : > { %6340 = vrot.lane.b32.xlu1 %v7146_v40, %s6634_s30  ;;  %6310 = vrot.lane.b32.xlu0 %v7124_v14, %s6631_s24 }
 0xba2   : > { %3154 = vrot.lane.b32.xlu1 %v7106_v2, %s6635_s0  ;;  %6335 = vrot.lane.b32.xlu0 %v7134_v30, %s6634_s30  ;;  %v2772_v2 = vsel %vm670_vm1, %v7366_v9, -inf  ;;  %s8709_s30 = sshll.u32 %s8711_s22, 6 }
 0xba3   : > { %s8603_s24 = scalar_lea.vmem %s8652_s20, %s8709_s30 }
 0xba6   : > { %3158 = vrot.lane.b32.xlu1 %v7118_v20, %s6635_s0  ;;  %3152 = vrot.lane.b32.xlu0 %v7102_v1, %s6635_s0  ;;  %v2775_v1 = vsel %vm670_vm1, %v7362_v18, -inf  ;;  %v2781_v20 = vsel %vm670_vm1, %v7368_v36, -inf }
 0xbaa   : > { %3162 = vrot.lane.b32.xlu1 %v7130_v28, %s6635_s0  ;;  %3156 = vrot.lane.b32.xlu0 %v7116_v19, %s6635_s0  ;;  %v2784_v19 = vsel %vm670_vm1, %v7374_v49, -inf  ;;  %v2793_v28 = vsel %vm670_vm1, %v7376_v33, -inf }
 0xbae   : > { %3166 = vrot.lane.b32.xlu1 %v7142_v37, %s6635_s0  ;;  %3160 = vrot.lane.b32.xlu0 %v7128_v24, %s6635_s0  ;;  %v2787_v24 = vsel %vm670_vm1, %v7372_v54, -inf }
 0xbb2   : > { %3164 = vrot.lane.b32.xlu0 %v7140_v50, %s6635_s0 }
 0xbd1   : > { %2773 = vmax.xlane.f32.xlu0 %v2772_v2 }
 0xbd2   : > { %2776 = vmax.xlane.f32.xlu1 %v2775_v1 }
 0xbd5   : > { %2779 = vmax.xlane.f32.xlu0 %v2778_v34 }
 0xbd6   : > { %2785 = vmax.xlane.f32.xlu1 %v2784_v19 }
 0xbd9   : > { %2782 = vmax.xlane.f32.xlu0 %v2781_v20 }
 0xbda   : > { %2791 = vmax.xlane.f32.xlu1 %v2790_v23 }
 0xbdd   : > { %2788 = vmax.xlane.f32.xlu0 %v2787_v24 }
 0xbe1   : > { %2794 = vmax.xlane.f32.xlu0 %v2793_v28 }
 0xbeb   : > { %6345 = vrot.lane.b32.xlu1 %v7112_v4, %s6633_s26 }
 0xc00   : > { %v2268_v50 = vpop.xlane.xlu0 %2267 }
 0xc01   : > { %v2265_v30 = vpop.xlane.xlu1 %2264 }
 0xc02   : > { %6450 = vrcp.f32 %v2265_v30  ;;  %v2464_v30 = vld [vmem:[%s8642_s10 + $0x10] sm:$0xff] }
 0xc03   : > { %6452 = vrcp.f32 %v2268_v50  ;;  %v2465_v50 = vld [vmem:[%s8642_s10 + $0x18] sm:$0xff] }
 0xc05   : > { %v2271_v37 = vpop.xlane.xlu1 %2270 }
 0xc06   : > { %6454 = vrcp.f32 %v2271_v37 }
 0xc09   : > { %v2274_v40 = vpop.xlane.xlu0 %2273 }
 0xc0a   : > { %v2277_v22 = vpop.xlane.xlu1 %2276  ;;  %6456 = vrcp.f32 %v2274_v40 }
 0xc0b   : > { %6458 = vrcp.f32 %v2277_v22  ;;  %v6021_v22 = vpack.c.bf16 %v2465_v50, %v2464_v30 }
 0xc0c   : > { %v6451_v63 = vpop.eup %6450 }
 0xc0d   : > { %v2280_v0 = vpop.xlane.xlu0 %2279  ;;  %v2295_v5 = vmul.f32 %v6451_v63, %v7382_v6 }
 0xc0e   : > { %v6316_v10 = vpop.permute.xlu1 %6315  ;;  %6460 = vrcp.f32 %v2280_v0 }
 0xc0f   : > { %5669 = vmatprep.mubr.msk.f32.mxu0 %vm670_vm1, %v2295_v5  ;;  %v6318_v56 = vunpack.i.h.bf16 %v6316_v10  ;;  %v6317_v8 = vunpack.i.l.bf16 %v6316_v10  ;;  %v6453_v5 = vpop.eup %6452 }
 0xc10   : > { %v6455_v10 = vpop.eup %6454  ;;  %v2296_v0 = vmul.f32 %v6453_v5, %v7380_v17 }
 0xc11   : > { %v2286_v52 = vpop.xlane.xlu0 %2285  ;;  %v6013_v34 = vpack.c.bf16 %v6318_v56, %v6317_v8 }
 0xc12   : > { %v6321_v13 = vpop.permute.xlu1 %6320 }
 0xc13   : > { %v6323_v19 = vunpack.i.h.bf16 %v6321_v13  ;;  %v6322_v20 = vunpack.i.l.bf16 %v6321_v13 }
 0xc15   : > { %v2283_v38 = vpop.xlane.xlu0 %2282  ;;  %v6017_v37 = vpack.c.bf16 %v6323_v19, %v6322_v20 }
 0xc16   : > { %v6326_v53 = vpop.permute.xlu1 %6325  ;;  %6462 = vrcp.f32 %v2283_v38  ;;  %v2297_v38 = vmul.f32 %v6455_v10, %v7388_v15 }
 0xc17   : > { %v6328_v29 = vunpack.i.h.bf16 %v6326_v53  ;;  %v6327_v12 = vunpack.i.l.bf16 %v6326_v53  ;;  %6464 = vrcp.f32 %v2286_v52 }
 0xc19   : > { %v6069_v59 = vpack.c.bf16 %v6328_v29, %v6327_v12  ;;  %v6311_v55 = vpop.permute.xlu0 %6310  ;;  %v6457_v29 = vpop.eup %6456 }
 0xc1a   : > { %v6313_v3 = vunpack.i.h.bf16 %v6311_v55  ;;  %v6312_v7 = vunpack.i.l.bf16 %v6311_v55  ;;  %v6331_v62 = vpop.permute.xlu1 %6330  ;;  %v6459_v12 = vpop.eup %6458  ;;  %v2298_v52 = vmul.f32 %v6457_v29, %v7392_v57 }
 0xc1b   : > { %v6333_v47 = vunpack.i.h.bf16 %v6331_v62  ;;  %v6332_v16 = vunpack.i.l.bf16 %v6331_v62  ;;  %6071 = vmatprep.subr.msk.bf16.mxu1 %vm7154_vm4, %v6069_v59  ;;  %v6461_v55 = vpop.eup %6460  ;;  %v2299_v17 = vmul.f32 %v6459_v12, %v7394_v58 }
 0xc1c   : > { %v6009_v6 = vpack.c.bf16 %v6313_v3, %v6312_v7  ;;  %6074 = vmatpush3.bf16.xpose.msk.msra.mxu1 %vm7154_vm4, %v6069_v59  ;;  %v2300_v15 = vmul.f32 %v6461_v55, %v7400_v44 }
 0xc1d   : > { %v6075_v2 = vpack.c.bf16 %v6333_v47, %v6332_v16  ;;  %v6336_v1 = vpop.permute.xlu0 %6335 }
 0xc1e   : > { %6010 = vmatprep.subr.bf16.mxu0 %v6009_v6  ;;  %v6338_v23 = vunpack.i.h.bf16 %v6336_v1  ;;  %v6337_v24 = vunpack.i.l.bf16 %v6336_v1  ;;  %v6341_v63 = vpop.permute.xlu1 %6340 }
 0xc1f   : > { %6077 = vmatprep.subr.msk.bf16.mxu1 %vm7154_vm4, %v6075_v2  ;;  %6012 = vmatpush3.bf16.msra.mxu0 %v6009_v6  ;;  %v6343_v13 = vunpack.i.h.bf16 %v6341_v63  ;;  %v6342_v53 = vunpack.i.l.bf16 %v6341_v63 }
 0xc20   : > { %6014 = vmatprep.subr.bf16.mxu0 %v6013_v34  ;;  %v6081_v40 = vpack.c.bf16 %v6338_v23, %v6337_v24  ;;  %v6463_v56 = vpop.eup %6462 }
 0xc21   : > { %v3153_v28 = vpop.permute.xlu0 %3152  ;;  %v6087_v59 = vpack.c.bf16 %v6343_v13, %v6342_v53  ;;  %v6465_v8 = vpop.eup %6464  ;;  %v2301_v3 = vmul.f32 %v6463_v56, %v7408_v11 }
 0xc22   : > { %5785 = vmatprep.mubr.msk.f32.mxu1 %vm1552_vm3, %v3153_v28  ;;  %v3155_v57 = vpop.permute.xlu1 %3154  ;;  %v2302_v58 = vmul.f32 %v6465_v8, %v7404_v25 }
 0xc23   : > { %6016 = vmatpush3.bf16.msra.mxu0 %v6013_v34 }
 0xc24   : > { %6080 = vmatpush3.bf16.xpose.msk.msra.mxu1 %vm7154_vm4, %v6075_v2  ;;  %6018 = vmatprep.subr.bf16.mxu0 %v6017_v37 }
 0xc25   : > { %6083 = vmatprep.subr.msk.bf16.mxu1 %vm7154_vm4, %v6081_v40  ;;  %v3157_v7 = vpop.permute.xlu0 %3156 }
 0xc26   : > { %v3159_v62 = vpop.permute.xlu1 %3158 }
 0xc27   : > { %6020 = vmatpush3.bf16.msra.mxu0 %v6017_v37 }
 0xc28   : > { %6022 = vmatprep.subr.bf16.mxu0 %v6021_v22 }
 0xc29   : > { %v3161_v44 = vpop.permute.xlu0 %3160 }
 0xc2a   : > { %5670 = vmatmul.mubr.msk.f32.vlgmr.msra.gmra.mrb[28].mxu0 %vm670_vm1, %v2296_v0  ;;  %v3163_v11 = vpop.permute.xlu1 %3162 }
 0xc2b   : > { %5672 = vmatprep.mubr.msk.f32.mxu0 %vm670_vm1, %v2297_v38  ;;  %6024 = vmatpush3.bf16.msra.mxu0 %v6021_v22 }
 0xc2c   : > { %6086 = vmatpush3.bf16.xpose.msk.msra.mxu1 %vm7154_vm4, %v6081_v40 }
 0xc2d   : > { %6089 = vmatprep.subr.msk.bf16.mxu1 %vm7154_vm4, %v6087_v59  ;;  %v3165_v47 = vpop.permute.xlu0 %3164 }
 0xc2e   : > { %5673 = vmatmul.mubr.msk.f32.gmra.mrb[30].mxu0 %vm670_vm1, %v2298_v52  ;;  %v3167_v48 = vpop.permute.xlu1 %3166 }
 0xc2f   : > { %5675 = vmatprep.mubr.msk.f32.mxu0 %vm670_vm1, %v2299_v17 }
 0xc32   : > { %5676 = vmatmul.mubr.msk.f32.gmra.mrb[32].mxu0 %vm670_vm1, %v2300_v15 }
 0xc33   : > { %5678 = vmatprep.mubr.msk.f32.mxu0 %vm670_vm1, %v2301_v3 }
 0xc34   : > { %6092 = vmatpush3.bf16.xpose.msk.msra.mxu1 %vm7154_vm4, %v6087_v59 }
 0xc36   : > { %5679 = vmatmul.mubr.msk.f32.gmra.mrb[34].mxu0 %vm670_vm1, %v2302_v58 }
 0xc3b   : > { %5786 = vmatmul.mubr.msk.f32.vlgmr.msra.gmra.mrb[44].mxu1 %vm1552_vm3, %v3155_v57 }
 0xc3c   : > { %5788 = vmatprep.mubr.msk.f32.mxu1 %vm1552_vm3, %v3157_v7 }
 0xc3f   : > { %5789 = vmatmul.mubr.msk.f32.gmra.mrb[46].mxu1 %vm1552_vm3, %v3159_v62 }
 0xc40   : > { %5791 = vmatprep.mubr.msk.f32.mxu1 %vm1552_vm3, %v3161_v44 }
 0xc43   : > { %5792 = vmatmul.mubr.msk.f32.gmra.mrb[48].mxu1 %vm1552_vm3, %v3163_v11 }
 0xc44   : > { %5794 = vmatprep.mubr.msk.f32.mxu1 %vm1552_vm3, %v3165_v47 }
 0xc47   : > { %5795 = vmatmul.mubr.msk.f32.gmra.mrb[50].mxu1 %vm1552_vm3, %v3167_v48 }
 0xc48   : > { %3977 = vmatprep.mubr.f32.mxu1 %v6628_v21 }
 0xc5e   : > { %v2774_v25 = vpop.xlane.xlu0 %2773 }
 0xc5f   : > { %v2796_v16 = vsub.f32 %v7366_v9, %v2774_v25  ;;  %v2777_v6 = vpop.xlane.xlu1 %2776 }
 0xc60   : > { %v2797_v2 = vsub.f32 %v7362_v18, %v2777_v6 }
 0xc61   : > { %v2804_v1 = vmul.f32 1.442695, %v2796_v16 }
 0xc62   : > { %v2806_v34 = vmul.f32 1.442695, %v2797_v2  ;;  %v2780_v19 = vpop.xlane.xlu0 %2779 }
 0xc63   : > { %6466 = vpow2.f32 %v2804_v1  ;;  %v2798_v20 = vsub.f32 %v7370_v46, %v2780_v19  ;;  %v2786_v23 = vpop.xlane.xlu1 %2785 }
 0xc64   : > { %6468 = vpow2.f32 %v2806_v34  ;;  %v2800_v24 = vsub.f32 %v7374_v49, %v2786_v23 }
 0xc65   : > { %v2808_v28 = vmul.f32 1.442695, %v2798_v20 }
 0xc66   : > { %v2812_v30 = vmul.f32 1.442695, %v2800_v24  ;;  %v2783_v50 = vpop.xlane.xlu0 %2782 }
 0xc67   : > { %6470 = vpow2.f32 %v2808_v28  ;;  %v2799_v37 = vsub.f32 %v7368_v36, %v2783_v50  ;;  %v2792_v9 = vpop.xlane.xlu1 %2791 }
 0xc68   : > { %6472 = vpow2.f32 %v2812_v30  ;;  %v2802_v13 = vsub.f32 %v7378_v51, %v2792_v9 }
 0xc69   : > { %v2810_v40 = vmul.f32 1.442695, %v2799_v37 }
 0xc6a   : > { %v2789_v18 = vpop.xlane.xlu0 %2788  ;;  %v2816_v59 = vmul.f32 1.442695, %v2802_v13 }
 0xc6b   : > { %6474 = vpow2.f32 %v2810_v40  ;;  %v2801_v63 = vsub.f32 %v7372_v54, %v2789_v18  ;;  %v6346_v22 = vpop.permute.xlu1 %6345 }
 0xc6c   : > { %v6348_v5 = vunpack.i.h.bf16 %v6346_v22  ;;  %v6347_v46 = vunpack.i.l.bf16 %v6346_v22 }
 0xc6d   : > { %v6467_v10 = vpop.eup %6466  ;;  %v2814_v49 = vmul.f32 1.442695, %v2801_v63 }
 0xc6e   : > { %v7510_v53 = vpop.eup %6468  ;;  %v6049_v0 = vpack.c.bf16 %v6348_v5, %v6347_v46  ;;  %v2795_v29 = vpop.xlane.xlu0 %2794  ;;  %v2820_v36 = vsel %vm670_vm1, %v6467_v10, 0.0 }
 0xc6f   : > { %6476 = vpow2.f32 %v2814_v49  ;;  %v2803_v38 = vsub.f32 %v7376_v33, %v2795_v29  ;;  %2821 = vadd.xlane.f32.xlu1 %v2820_v36  ;;  %v2823_v54 = vsel %vm670_vm1, %v7510_v53, 0.0 }
 0xc70   : > { %2824 = vadd.xlane.f32.xlu0 %v2823_v54  ;;  %6050 = vmatprep.subr.bf16.mxu0 %v6049_v0 }
 0xc71   : > { %v7516_v12 = vpop.eup %6470  ;;  %v2818_v51 = vmul.f32 1.442695, %v2803_v38 }
 0xc72   : > { %v2826_v52 = vsel %vm670_vm1, %v7516_v12, 0.0  ;;  %v7520_v55 = vpop.eup %6472 }
 0xc73   : > { %6478 = vpow2.f32 %v2818_v51  ;;  %2827 = vadd.xlane.f32.xlu1 %v2826_v52  ;;  %v2832_v56 = vsel %vm670_vm1, %v7520_v55, 0.0 }
 0xc74   : > { %6480 = vpow2.f32 %v2816_v59 }
 0xc75   : > { %v7522_v17 = vpop.eup %6474 }
 0xc76   : > { %v2829_v33 = vsel %vm670_vm1, %v7522_v17, 0.0 }
 0xc77   : > { %2830 = vadd.xlane.f32.xlu0 %v2829_v33  ;;  %2833 = vadd.xlane.f32.xlu1 %v2832_v56 }
 0xc79   : > { %v7528_v15 = vpop.eup %6476 }
 0xc7a   : > { %v2835_v8 = vsel %vm670_vm1, %v7528_v15, 0.0 }
 0xc7b   : > { %2836 = vadd.xlane.f32.xlu0 %v2835_v8 }
 0xc7d   : > { %v7532_v3 = vpop.eup %6478 }
 0xc7e   : > { %v2841_v57 = vsel %vm670_vm1, %v7532_v3, 0.0  ;;  %v7536_v58 = vpop.eup %6480 }
 0xc7f   : > { %2842 = vadd.xlane.f32.xlu0 %v2841_v57  ;;  %v2838_v7 = vsel %vm670_vm1, %v7536_v58, 0.0 }
 0xc83   : > { %2839 = vadd.xlane.f32.xlu0 %v2838_v7 }
 0xc88   : > { %6355 = vrot.lane.b32.xlu1 %v7136_v32, %s6633_s26 }
 0xc8c   : > { %6360 = vrot.lane.b32.xlu1 %v7148_v42, %s6633_s26 }
 0xc99   : > { %6350 = vrot.lane.b32.xlu0 %v7124_v14, %s6633_s26 }
 0xcfc   : > { %v2822_v62 = vpop.xlane.xlu1 %2821 }
 0xcfd   : > { %v5671_v44 = vpop.f32.mrb[28].mxu0  ;;  %6482 = vrcp.f32 %v2822_v62  ;;  %v2825_v47 = vpop.xlane.xlu0 %2824 }
 0xcfe   : > { %v2425_v11 = vpop.f32.mrb[29].mxu0  ;;  %6484 = vrcp.f32 %v2825_v47 }
 0xcff   : > { %5685 = vmatprep.mubr.msk.f32.mxu0 %vm1552_vm3, %v2425_v11 }
 0xd00   : > { %5686 = vmatmul.mubr.msk.f32.vlgmr.msra.gmra.mrb[20].mxu0 %vm1552_vm3, %v5671_v44  ;;  %v2828_v16 = vpop.xlane.xlu1 %2827 }
 0xd01   : > { %6052 = vmatpush3.bf16.msra.mxu0 %v6049_v0  ;;  %v5674_v48 = vpop.f32.mrb[30].mxu0  ;;  %6486 = vrcp.f32 %v2828_v16 }
 0xd02   : > { %v2435_v25 = vpop.f32.mrb[31].mxu0 }
 0xd03   : > { %5688 = vmatprep.mubr.msk.f32.mxu0 %vm1552_vm3, %v2435_v25 }
 0xd04   : > { %v2831_v6 = vpop.xlane.xlu0 %2830  ;;  %5689 = vmatmul.mubr.msk.f32.gmra.mrb[22].mxu0 %vm1552_vm3, %v5674_v48  ;;  %v2834_v23 = vpop.xlane.xlu1 %2833 }
 0xd05   : > { %v5677_v2 = vpop.f32.mrb[32].mxu0  ;;  %6488 = vrcp.f32 %v2831_v6 }
 0xd06   : > { %v2445_v1 = vpop.f32.mrb[33].mxu0  ;;  %6490 = vrcp.f32 %v2834_v23 }
 0xd07   : > { %5691 = vmatprep.mubr.msk.f32.mxu0 %vm1552_vm3, %v2445_v1  ;;  %v6483_v34 = vpop.eup %6482 }
 0xd08   : > { %v2837_v19 = vpop.xlane.xlu0 %2836  ;;  %5692 = vmatmul.mubr.msk.f32.gmra.mrb[24].mxu0 %vm1552_vm3, %v5677_v2  ;;  %v2852_v28 = vmul.f32 %v6483_v34, %v6467_v10  ;;  %v6356_v40 = vpop.permute.xlu1 %6355 }
 0xd09   : > { %v5680_v20 = vpop.f32.mrb[34].mxu0  ;;  %v6358_v49 = vunpack.i.h.bf16 %v6356_v40  ;;  %v6357_v0 = vunpack.i.l.bf16 %v6356_v40  ;;  %6492 = vrcp.f32 %v2837_v19  ;;  %v6485_v48 = vpop.eup %6484 }
 0xd0a   : > { %v2455_v24 = vpop.f32.mrb[35].mxu0  ;;  %v2853_v16 = vmul.f32 %v6485_v48, %v7510_v53 }
 0xd0b   : > { %5694 = vmatprep.mubr.msk.f32.mxu0 %vm1552_vm3, %v2455_v24  ;;  %v6057_v56 = vpack.c.bf16 %v6358_v49, %v6357_v0  ;;  %v6487_v25 = vpop.eup %6486 }
 0xd0c   : > { %v2843_v30 = vpop.xlane.xlu0 %2842  ;;  %5695 = vmatmul.mubr.msk.f32.gmra.mrb[26].mxu0 %vm1552_vm3, %v5680_v20  ;;  %v6361_v38 = vpop.permute.xlu1 %6360  ;;  %v2854_v2 = vmul.f32 %v6487_v25, %v7516_v12 }
 0xd0d   : > { %5741 = vmatprep.mubr.msk.f32.mxu0 %vm670_vm1, %v2852_v28  ;;  %v6363_v8 = vunpack.i.h.bf16 %v6361_v38  ;;  %v6362_v57 = vunpack.i.l.bf16 %v6361_v38 }
 0xd0e   : > { %v7555_v50 = vpop.f32.mrb[44].mxu1 }
 0xd0f   : > { %v7557_v37 = vpop.f32.mrb[45].mxu1  ;;  %v3324_v9 = vsel %vm670_vm1, %v7555_v50, -inf  ;;  %v6061_v47 = vpack.c.bf16 %v6363_v8, %v6362_v57  ;;  %v6489_v6 = vpop.eup %6488 }
 0xd10   : > { %3325 = vmax.xlane.f32.xlu0 %v3324_v9  ;;  %v2840_v18 = vpop.xlane.xlu0 %2839  ;;  %v3321_v63 = vsel %vm670_vm1, %v7557_v37, -inf  ;;  %v6491_v1 = vpop.eup %6490  ;;  %v2855_v34 = vmul.f32 %v6489_v6, %v7522_v17 }
 0xd11   : > { %3322 = vmax.xlane.f32.xlu1 %v3321_v63  ;;  %6494 = vrcp.f32 %v2840_v18  ;;  %v2856_v20 = vmul.f32 %v6491_v1, %v7520_v55  ;;  %v3013_v55 = vld [vmem:[%s8642_s10 + $0x20] sm:$0xff] }
 0xd12   : > { %v7563_v22 = vpop.f32.mrb[46].mxu1  ;;  %6496 = vrcp.f32 %v2843_v30 }
 0xd13   : > { %v7565_v5 = vpop.f32.mrb[47].mxu1  ;;  %v3330_v46 = vsel %vm670_vm1, %v7563_v22, -inf  ;;  %v6493_v19 = vpop.eup %6492 }
 0xd14   : > { %3331 = vmax.xlane.f32.xlu0 %v3330_v46  ;;  %v6351_v10 = vpop.permute.xlu0 %6350  ;;  %v3327_v13 = vsel %vm670_vm1, %v7565_v5, -inf  ;;  %v2857_v53 = vmul.f32 %v6493_v19, %v7528_v15  ;;  %v3014_v15 = vld [vmem:[%s8642_s10 + $0x28] sm:$0xff] }
 0xd15   : > { %v6353_v29 = vunpack.i.h.bf16 %v6351_v10  ;;  %v6352_v36 = vunpack.i.l.bf16 %v6351_v10  ;;  %3328 = vmax.xlane.f32.xlu1 %v3327_v13  ;;  %v6065_v28 = vpack.c.bf16 %v3014_v15, %v3013_v55 }
 0xd16   : > { %v7571_v54 = vpop.f32.mrb[48].mxu1 }
 0xd17   : > { %v6053_v59 = vpack.c.bf16 %v6353_v29, %v6352_v36  ;;  %v7573_v51 = vpop.f32.mrb[49].mxu1  ;;  %v3336_v52 = vsel %vm670_vm1, %v7571_v54, -inf }
 0xd18   : > { %3337 = vmax.xlane.f32.xlu0 %v3336_v52  ;;  %v3333_v33 = vsel %vm670_vm1, %v7573_v51, -inf }
 0xd19   : > { %3334 = vmax.xlane.f32.xlu1 %v3333_v33  ;;  %6054 = vmatprep.subr.bf16.mxu0 %v6053_v59 }
 0xd1a   : > { %v7579_v7 = vpop.f32.mrb[50].mxu1  ;;  %6056 = vmatpush3.bf16.msra.mxu0 %v6053_v59 }
 0xd1b   : > { %v7581_v62 = vpop.f32.mrb[51].mxu1  ;;  %v3342_v44 = vsel %vm670_vm1, %v7579_v7, -inf  ;;  %6058 = vmatprep.subr.bf16.mxu0 %v6057_v56  ;;  %v6495_v23 = vpop.eup %6494 }
 0xd1c   : > { %3343 = vmax.xlane.f32.xlu0 %v3342_v44  ;;  %v3339_v11 = vsel %vm670_vm1, %v7581_v62, -inf  ;;  %v6497_v24 = vpop.eup %6496  ;;  %v2858_v12 = vmul.f32 %v6495_v23, %v7536_v58 }
 0xd1d   : > { %3340 = vmax.xlane.f32.xlu1 %v3339_v11  ;;  %v2859_v17 = vmul.f32 %v6497_v24, %v7532_v3 }
 0xd1e   : > { %6060 = vmatpush3.bf16.msra.mxu0 %v6057_v56 }
 0xd1f   : > { %6062 = vmatprep.subr.bf16.mxu0 %v6061_v47 }
 0xd22   : > { %6064 = vmatpush3.bf16.msra.mxu0 %v6061_v47 }
 0xd23   : > { %6066 = vmatprep.subr.bf16.mxu0 %v6065_v28 }
 0xd25   : > { %5742 = vmatmul.mubr.msk.f32.vlgmr.msra.gmra.mrb[36].mxu0 %vm670_vm1, %v2853_v16 }
 0xd26   : > { %5744 = vmatprep.mubr.msk.f32.mxu0 %vm670_vm1, %v2854_v2  ;;  %6068 = vmatpush3.bf16.msra.mxu0 %v6065_v28 }
 0xd29   : > { %5745 = vmatmul.mubr.msk.f32.gmra.mrb[38].mxu0 %vm670_vm1, %v2855_v34 }
 0xd2a   : > { %5747 = vmatprep.mubr.msk.f32.mxu0 %vm670_vm1, %v2856_v20 }
 0xd2d   : > { %5748 = vmatmul.mubr.msk.f32.gmra.mrb[40].mxu0 %vm670_vm1, %v2857_v53 }
 0xd2e   : > { %6365 = vrot.lane.b32.xlu1 %v7112_v4, %s6635_s0  ;;  %5750 = vmatprep.mubr.msk.f32.mxu0 %vm670_vm1, %v2858_v12 }
 0xd31   : > { %5751 = vmatmul.mubr.msk.f32.gmra.mrb[42].mxu0 %vm670_vm1, %v2859_v17 }
 0xd32   : > { %6370 = vrot.lane.b32.xlu0 %v7124_v14, %s6635_s0 }
 0xd9d   : > { %v3326_v4 = vpop.xlane.xlu0 %3325 }
 0xd9e   : > { %v3346_v58 = vsub.f32 %v7555_v50, %v3326_v4  ;;  %v3323_v3 = vpop.xlane.xlu1 %3322 }
 0xd9f   : > { %v3345_v30 = vsub.f32 %v7557_v37, %v3323_v3 }
 0xda0   : > { %v3355_v9 = vmul.f32 1.442695, %v3346_v58 }
 0xda1   : > { %v3353_v40 = vmul.f32 1.442695, %v3345_v30  ;;  %v3332_v18 = vpop.xlane.xlu0 %3331 }
 0xda2   : > { %6498 = vpow2.f32 %v3355_v9  ;;  %v3348_v63 = vsub.f32 %v7563_v22, %v3332_v18  ;;  %v3329_v46 = vpop.xlane.xlu1 %3328 }
 0xda3   : > { %6500 = vpow2.f32 %v3353_v40  ;;  %v3347_v10 = vsub.f32 %v7565_v5, %v3329_v46 }
 0xda4   : > { %v3359_v13 = vmul.f32 1.442695, %v3348_v63 }
 0xda5   : > { %v3357_v14 = vmul.f32 1.442695, %v3347_v10  ;;  %v3338_v49 = vpop.xlane.xlu0 %3337 }
 0xda6   : > { %6502 = vpow2.f32 %v3359_v13  ;;  %v3350_v0 = vsub.f32 %v7571_v54, %v3338_v49  ;;  %v3335_v50 = vpop.xlane.xlu1 %3334 }
 0xda7   : > { %6504 = vpow2.f32 %v3357_v14  ;;  %v3349_v37 = vsub.f32 %v7573_v51, %v3335_v50 }
 0xda8   : > { %v3363_v29 = vmul.f32 1.442695, %v3350_v0 }
 0xda9   : > { %v3361_v36 = vmul.f32 1.442695, %v3349_v37  ;;  %v3344_v6 = vpop.xlane.xlu0 %3343 }
 0xdaa   : > { %6506 = vpow2.f32 %v3363_v29  ;;  %v3341_v38 = vpop.xlane.xlu1 %3340  ;;  %v3352_v2 = vsub.f32 %v7579_v7, %v3344_v6 }
 0xdab   : > { %6508 = vpow2.f32 %v3361_v36  ;;  %v3351_v1 = vsub.f32 %v7581_v62, %v3341_v38  ;;  %v3562_v38 = vld [vmem:[%s8642_s10 + $0x30] sm:$0xff] }
 0xdac   : > { %v7617_v22 = vpop.eup %6498  ;;  %v3367_v34 = vmul.f32 1.442695, %v3352_v2 }
 0xdad   : > { %v7619_v59 = vpop.eup %6500  ;;  %v3372_v5 = vsel %vm670_vm1, %v7617_v22, 0.0  ;;  %v3365_v19 = vmul.f32 1.442695, %v3351_v1 }
 0xdae   : > { %3373 = vadd.xlane.f32.xlu0 %v3372_v5  ;;  %v6366_v52 = vpop.permute.xlu1 %6365  ;;  %v3369_v54 = vsel %vm670_vm1, %v7619_v59, 0.0  ;;  %6510 = vpow2.f32 %v3367_v34  ;;  %v3563_v5 = vld [vmem:[%s8642_s10 + $0x38] sm:$0xff] }
 0xdaf   : > { %v6368_v33 = vunpack.i.h.bf16 %v6366_v52  ;;  %v6367_v56 = vunpack.i.l.bf16 %v6366_v52  ;;  %3370 = vadd.xlane.f32.xlu1 %v3369_v54  ;;  %6512 = vpow2.f32 %v3365_v19 }
 0xdb0   : > { %v7625_v51 = vpop.eup %6502 }
 0xdb1   : > { %v7627_v8 = vpop.eup %6504  ;;  %v6093_v57 = vpack.c.bf16 %v6368_v33, %v6367_v56  ;;  %v3378_v44 = vsel %vm670_vm1, %v7625_v51, 0.0 }
 0xdb2   : > { %3379 = vadd.xlane.f32.xlu0 %v3378_v44  ;;  %v3375_v11 = vsel %vm670_vm1, %v7627_v8, 0.0 }
 0xdb3   : > { %3376 = vadd.xlane.f32.xlu1 %v3375_v11  ;;  %6094 = vmatprep.subr.bf16.mxu0 %v6093_v57 }
 0xdb4   : > { %v7633_v47 = vpop.eup %6506 }
 0xdb5   : > { %v7635_v48 = vpop.eup %6508  ;;  %v3384_v25 = vsel %vm670_vm1, %v7633_v47, 0.0 }
 0xdb6   : > { %3385 = vadd.xlane.f32.xlu0 %v3384_v25  ;;  %v3381_v16 = vsel %vm670_vm1, %v7635_v48, 0.0 }
 0xdb7   : > { %3382 = vadd.xlane.f32.xlu1 %v3381_v16 }
 0xdb8   : > { %v7647_v20 = vpop.eup %6510 }
 0xdb9   : > { %v7649_v23 = vpop.eup %6512  ;;  %v3390_v53 = vsel %vm670_vm1, %v7647_v20, 0.0 }
 0xdc8   : > { %6375 = vrot.lane.b32.xlu1 %v7136_v32, %s6635_s0  ;;  %v3387_v32 = vsel %vm670_vm1, %v7649_v23, 0.0 }
 0xdcc   : > { %6380 = vrot.lane.b32.xlu0 %v7148_v42, %s6635_s0  ;;  %v6371_v42 = vpop.permute.xlu0 %6370 }
 0xdcd   : > { %v6373_v7 = vunpack.i.h.bf16 %v6371_v42  ;;  %v6372_v24 = vunpack.i.l.bf16 %v6371_v42 }
 0xdcf   : > { %v6097_v17 = vpack.c.bf16 %v6373_v7, %v6372_v24  ;;  %v5020_v24 = vld [vmem:[%s8643_s11] ss:$0 sm:$0xff] }
 0xdeb   : > { %3391 = vadd.xlane.f32.xlu0 %v3390_v53 }
 0xdec   : > { %3388 = vadd.xlane.f32.xlu1 %v3387_v32 }
 0xdf8   : > { %v5743_v62 = vpop.f32.mrb[36].mxu0 }
 0xdf9   : > { %v2974_v12 = vpop.f32.mrb[37].mxu0 }
 0xdfa   : > { %5757 = vmatprep.mubr.msk.f32.mxu0 %vm1552_vm3, %v2974_v12 }
 0xdfb   : > { %5758 = vmatmul.mubr.msk.f32.vlgmr.msra.gmra.mrb[20].mxu0 %vm1552_vm3, %v5743_v62  ;;  %v1521_v62 = vadd.f32 %v5020_v24, %v6947_v27  ;;  %v1522_v27 = vadd.f32 %v5020_v24, %v6951_v31 }
 0xdfc   : > { %6096 = vmatpush3.bf16.msra.mxu0 %v6093_v57  ;;  %v5746_v55 = vpop.f32.mrb[38].mxu0 }
 0xdfd   : > { %6098 = vmatprep.subr.bf16.mxu0 %v6097_v17  ;;  %v2984_v15 = vpop.f32.mrb[39].mxu0 }
 0xdfe   : > { %5760 = vmatprep.mubr.msk.f32.mxu0 %vm1552_vm3, %v2984_v15 }
 0xdff   : > { %5761 = vmatmul.mubr.msk.f32.gmra.mrb[22].mxu0 %vm1552_vm3, %v5746_v55 }
 0xe00   : > { %6100 = vmatpush3.bf16.msra.mxu0 %v6097_v17  ;;  %v5749_v28 = vpop.f32.mrb[40].mxu0  ;;  %v1520_v17 = vadd.f32 %v5020_v24, %v6945_v26 }
 0xe01   : > { %v2994_v4 = vpop.f32.mrb[41].mxu0 }
 0xe02   : > { %5763 = vmatprep.mubr.msk.f32.mxu0 %vm1552_vm3, %v2994_v4 }
 0xe03   : > { %5764 = vmatmul.mubr.msk.f32.gmra.mrb[24].mxu0 %vm1552_vm3, %v5749_v28 }
 0xe04   : > { %v5752_v58 = vpop.f32.mrb[42].mxu0 }
 0xe05   : > { %v3004_v3 = vpop.f32.mrb[43].mxu0 }
 0xe06   : > { %5766 = vmatprep.mubr.msk.f32.mxu0 %vm1552_vm3, %v3004_v3 }
 0xe07   : > { %5767 = vmatmul.mubr.msk.f32.gmra.mrb[26].mxu0 %vm1552_vm3, %v5752_v58  ;;  %v1523_v58 = vadd.f32 %v5020_v24, %v6955_v35 }
 0xe3b   : > { %v3374_v30 = vpop.xlane.xlu0 %3373 }
 0xe3c   : > { %v3371_v9 = vpop.xlane.xlu1 %3370 }
 0xe3d   : > { %6514 = vrcp.f32 %v3371_v9 }
 0xe3e   : > { %6516 = vrcp.f32 %v3374_v30 }
 0xe3f   : > { %v3380_v40 = vpop.xlane.xlu0 %3379 }
 0xe40   : > { %v3377_v18 = vpop.xlane.xlu1 %3376 }
 0xe41   : > { %6518 = vrcp.f32 %v3377_v18 }
 0xe42   : > { %6520 = vrcp.f32 %v3380_v40 }
 0xe43   : > { %v3386_v63 = vpop.xlane.xlu0 %3385 }
 0xe44   : > { %v3383_v46 = vpop.xlane.xlu1 %3382 }
 0xe45   : > { %6522 = vrcp.f32 %v3383_v46 }
 0xe46   : > { %6524 = vrcp.f32 %v3386_v63  ;;  %v1525_v63 = vadd.f32 %v5020_v24, %v6963_v41 }
 0xe47   : > { %v6515_v10 = vpop.eup %6514  ;;  %v6381_v13 = vpop.permute.xlu0 %6380 }
 0xe48   : > { %v6376_v14 = vpop.permute.xlu1 %6375  ;;  %v3401_v49 = vmul.f32 %v6515_v10, %v7619_v59  ;;  %v6383_v0 = vunpack.i.h.bf16 %v6381_v13  ;;  %v6382_v50 = vunpack.i.l.bf16 %v6381_v13  ;;  %v6109_v59 = vpack.c.bf16 %v3563_v5, %v3562_v38  ;;  %v6517_v54 = vpop.eup %6516 }
 0xe49   : > { %v6378_v37 = vunpack.i.h.bf16 %v6376_v14  ;;  %v6377_v29 = vunpack.i.l.bf16 %v6376_v14  ;;  %v3402_v56 = vmul.f32 %v6517_v54, %v7617_v22  ;;  %v1524_v10 = vadd.f32 %v5020_v24, %v6959_v39 }
 0xe4a   : > { %5813 = vmatprep.mubr.msk.f32.mxu0 %vm670_vm1, %v3401_v49  ;;  %v6105_v52 = vpack.c.bf16 %v6383_v0, %v6382_v50  ;;  %v1527_v0 = vadd.f32 %v5020_v24, %v6971_v45 }
 0xe4b   : > { %v6101_v36 = vpack.c.bf16 %v6378_v37, %v6377_v29  ;;  %v6519_v33 = vpop.eup %6518  ;;  %v1526_v37 = vadd.f32 %v5020_v24, %v6967_v43 }
 0xe4c   : > { %v6521_v57 = vpop.eup %6520  ;;  %v3403_v44 = vmul.f32 %v6519_v33, %v7627_v8 }
 0xe4d   : > { %6102 = vmatprep.subr.bf16.mxu0 %v6101_v36  ;;  %v3404_v25 = vmul.f32 %v6521_v57, %v7625_v51 }
 0xe4e   : > { %6104 = vmatpush3.bf16.msra.mxu0 %v6101_v36 }
 0xe4f   : > { %6106 = vmatprep.subr.bf16.mxu0 %v6105_v52  ;;  %v6523_v11 = vpop.eup %6522 }
 0xe50   : > { %v6525_v16 = vpop.eup %6524  ;;  %v3405_v6 = vmul.f32 %v6523_v11, %v7635_v48 }
 0xe51   : > { %v3406_v22 = vmul.f32 %v6525_v16, %v7633_v47 }
 0xe52   : > { %6108 = vmatpush3.bf16.msra.mxu0 %v6105_v52 }
 0xe53   : > { %6110 = vmatprep.subr.bf16.mxu0 %v6109_v59 }
 0xe55   : > { %5814 = vmatmul.mubr.msk.f32.vlgmr.msra.gmra.mrb[44].mxu0 %vm670_vm1, %v3402_v56 }
 0xe56   : > { %5816 = vmatprep.mubr.msk.f32.mxu0 %vm670_vm1, %v3403_v44  ;;  %6112 = vmatpush3.bf16.msra.mxu0 %v6109_v59 }
 0xe59   : > { %5817 = vmatmul.mubr.msk.f32.gmra.mrb[46].mxu0 %vm670_vm1, %v3404_v25 }
 0xe5a   : > { %5819 = vmatprep.mubr.msk.f32.mxu0 %vm670_vm1, %v3405_v6 }
 0xe5d   : > { %5820 = vmatmul.mubr.msk.f32.gmra.mrb[48].mxu0 %vm670_vm1, %v3406_v22 }
 0xe78   : > { %v3392_v8 = vpop.xlane.xlu0 %3391 }
 0xe79   : > { %6526 = vrcp.f32 %v3392_v8  ;;  %v3389_v2 = vpop.xlane.xlu1 %3388 }
 0xe7a   : > { %6528 = vrcp.f32 %v3389_v2 }
 0xe83   : > { %v6527_v1 = vpop.eup %6526 }
 0xe84   : > { %v6529_v34 = vpop.eup %6528  ;;  %v3408_v51 = vmul.f32 %v6527_v1, %v7647_v20 }
 0xe85   : > { %v3407_v19 = vmul.f32 %v6529_v34, %v7649_v23 }
 0xe87   : > { %5822 = vmatprep.mubr.msk.f32.mxu0 %vm670_vm1, %v3407_v19 }
 0xe88   : > { %5823 = vmatmul.mubr.msk.f32.gmra.mrb[50].mxu0 %vm670_vm1, %v3408_v51 }
 0xf28   : > { %v5815_v48 = vpop.f32.mrb[44].mxu0 }
 0xf29   : > { %v3523_v53 = vpop.f32.mrb[45].mxu0 }
 0xf2a   : > { %5829 = vmatprep.mubr.msk.f32.mxu0 %vm1552_vm3, %v3523_v53 }
 0xf2b   : > { %5830 = vmatmul.mubr.msk.f32.vlgmr.msra.gmra.mrb[20].mxu0 %vm1552_vm3, %v5815_v48 }
 0xf2c   : > { %v5818_v47 = vpop.f32.mrb[46].mxu0 }
 0xf2d   : > { %v3533_v32 = vpop.f32.mrb[47].mxu0 }
 0xf2e   : > { %5832 = vmatprep.mubr.msk.f32.mxu0 %vm1552_vm3, %v3533_v32 }
 0xf2f   : > { %5833 = vmatmul.mubr.msk.f32.gmra.mrb[22].mxu0 %vm1552_vm3, %v5818_v47 }
 0xf30   : > { %v5821_v42 = vpop.f32.mrb[48].mxu0 }
 0xf31   : > { %v3543_v23 = vpop.f32.mrb[49].mxu0 }
 0xf32   : > { %5835 = vmatprep.mubr.msk.f32.mxu0 %vm1552_vm3, %v3543_v23 }
 0xf33   : > { %5836 = vmatmul.mubr.msk.f32.gmra.mrb[24].mxu0 %vm1552_vm3, %v5821_v42 }
 0xf5b   : > { %v5824_v20 = vpop.f32.mrb[50].mxu0 }
 0xf5c   : > { %v3553_v7 = vpop.f32.mrb[51].mxu0 }
 0xf5d   : > { %5838 = vmatprep.mubr.msk.f32.mxu0 %vm1552_vm3, %v3553_v7 }
 0xf5e   : > { %5839 = vmatmul.mubr.msk.f32.gmra.mrb[26].mxu0 %vm1552_vm3, %v5824_v20 }
 0xf5f   : > { %4090 = vmatprep.mubr.f32.mxu0 %v6628_v21 }
 0xffe   : > { %v5831_v12 = vpop.f32.mrb[20].mxu0 }
 0xfff   : > { %v7699_v55 = vadd.f32 %v5831_v12, %v1521_v62  ;;  %v3654_v15 = vpop.f32.mrb[21].mxu0  ;;  %v3836_v12 = vld [vmem:[%s8646_s14 + $0x8] sm:$0xff] }
0x1000   : > { %v7701_v28 = vadd.f32 %v3654_v15, %v1520_v17  ;;  %v3840_v17 = vld [vmem:[%s8646_s14 + $0x28] sm:$0xff]  ;;  %v3838_v15 = vld [vmem:[%s8646_s14 + $0x18] sm:$0xff] }
0x1001   : > { %8678 = vst [vmem:[#allocation2_spill] sm:$0xff] %v7699_v55  ;;  %v3706_v4 = vsel %vm670_vm1, %v7699_v55, 0.0 }
0x1002   : > { %8679 = vst [vmem:[#allocation3_spill] sm:$0xff] %v7701_v28  ;;  %3707 = vadd.xlane.f32.xlu0 %v3706_v4  ;;  %v5834_v3 = vpop.f32.mrb[22].mxu0  ;;  %v3703_v30 = vsel %vm670_vm1, %v7701_v28, 0.0  ;;  %v3842_v4 = vld [vmem:[%s8646_s14 + $0x38] sm:$0xff] }
0x1003   : > { %v7709_v9 = vadd.f32 %v5834_v3, %v1523_v58  ;;  %3704 = vadd.xlane.f32.xlu1 %v3703_v30  ;;  %v3664_v26 = vpop.f32.mrb[23].mxu0  ;;  %v6113_v58 = vpack.c.bf16 %v3840_v17, %v3836_v12  ;;  %v6129_v3 = vpack.c.bf16 %v3842_v4, %v3838_v15  ;;  %v3835_v30 = vld [vmem:[%s8646_s14] sm:$0xff] }
0x1004   : > { %v7711_v40 = vadd.f32 %v3664_v26, %v1522_v27  ;;  %v3839_v27 = vld [vmem:[%s8646_s14 + $0x20] sm:$0xff]  ;;  %v3837_v26 = vld [vmem:[%s8646_s14 + $0x10] sm:$0xff] }
0x1005   : > { %8680 = vst [vmem:[#allocation4_spill] sm:$0xff] %v7709_v9  ;;  %v3712_v18 = vsel %vm670_vm1, %v7709_v9, 0.0  ;;  %6114 = vmatprep.subr.bf16.mxu1 %v6113_v58  ;;  %6130 = vmatprep.subr.bf16.mxu0 %v6129_v3 }
0x1006   : > { %8681 = vst [vmem:[#allocation5_spill] sm:$0xff] %v7711_v40  ;;  %3713 = vadd.xlane.f32.xlu0 %v3712_v18  ;;  %v5837_v35 = vpop.f32.mrb[24].mxu0  ;;  %v3709_v46 = vsel %vm670_vm1, %v7711_v40, 0.0  ;;  %v6115_v18 = vpack.c.bf16 %v3839_v27, %v3835_v30 }
0x1007   : > { %v7719_v13 = vadd.f32 %v5837_v35, %v1525_v63  ;;  %3710 = vadd.xlane.f32.xlu1 %v3709_v46  ;;  %v3674_v31 = vpop.f32.mrb[25].mxu0  ;;  %v3841_v63 = vld [vmem:[%s8646_s14 + $0x30] sm:$0xff]  ;;  %v3844_v46 = vld [vmem:[%s8646_s14 + $0x48] sm:$0xff] }
0x1008   : > { %v7721_v14 = vadd.f32 %v3674_v31, %v1524_v10  ;;  %v6131_v35 = vpack.c.bf16 %v3841_v63, %v3837_v26  ;;  %v3848_v10 = vld [vmem:[%s8646_s14 + $0x68] sm:$0xff]  ;;  %v3846_v31 = vld [vmem:[%s8646_s14 + $0x58] sm:$0xff]  ;;  %6116 = vmatpush1.bf16.msra.mxu1 %v6115_v18 }
0x1009   : > { %8682 = vst [vmem:[#allocation6_spill] sm:$0xff] %v7719_v13  ;;  %v3718_v49 = vsel %vm670_vm1, %v7719_v13, 0.0 }
0x100a   : > { %8683 = vst [vmem:[#allocation7_spill] sm:$0xff] %v7721_v14  ;;  %3719 = vadd.xlane.f32.xlu0 %v3718_v49  ;;  %v3715_v41 = vsel %vm670_vm1, %v7721_v14, 0.0  ;;  %v6117_v49 = vpack.c.bf16 %v3848_v10, %v3844_v46  ;;  %6132 = vmatpush1.bf16.msra.mxu0 %v6131_v35 }
0x100b   : > { %3716 = vadd.xlane.f32.xlu1 %v3715_v41  ;;  %v3850_v41 = vld [vmem:[%s8646_s14 + $0x78] sm:$0xff] }
0x100c   : > { %6118 = vmatprep.subr.bf16.mxu1 %v6117_v49 }
0x1031   : > { %v5840_v50 = vpop.f32.mrb[26].mxu0 }
0x1032   : > { %v7729_v39 = vadd.f32 %v5840_v50, %v1527_v0  ;;  %v3684_v29 = vpop.f32.mrb[27].mxu0  ;;  %v3843_v0 = vld [vmem:[%s8646_s14 + $0x40] sm:$0xff] }
0x1033   : > { %v7731_v36 = vadd.f32 %v3684_v29, %v1526_v37  ;;  %v3847_v50 = vld [vmem:[%s8646_s14 + $0x60] sm:$0xff]  ;;  %v6133_v37 = vpack.c.bf16 %v3850_v41, %v3846_v31 }
0x1034   : > { %8684 = vst [vmem:[#allocation8_spill] sm:$0xff] %v7729_v39  ;;  %v3724_v38 = vsel %vm670_vm1, %v7729_v39, 0.0  ;;  %v6119_v29 = vpack.c.bf16 %v3847_v50, %v3843_v0 }
0x1035   : > { %8685 = vst [vmem:[#allocation9_spill] sm:$0xff] %v7731_v36  ;;  %3725 = vadd.xlane.f32.xlu0 %v3724_v38  ;;  %v3721_v5 = vsel %vm670_vm1, %v7731_v36, 0.0  ;;  %v3845_v38 = vld [vmem:[%s8646_s14 + $0x50] sm:$0xff]  ;;  %6134 = vmatprep.subr.bf16.mxu0 %v6133_v37 }
0x1036   : > { %3722 = vadd.xlane.f32.xlu1 %v3721_v5  ;;  %v3849_v5 = vld [vmem:[%s8646_s14 + $0x70] sm:$0xff]  ;;  %6120 = vmatpush1.bf16.msra.mxu1 %v6119_v29 }
0x108f   : > { %v3708_v52 = vpop.xlane.xlu0 %3707 }
0x1090   : > { %v3728_v59 = vmul.f32 0.015625, %v3708_v52  ;;  %v3705_v54 = vpop.xlane.xlu1 %3704  ;;  %v6135_v52 = vpack.c.bf16 %v3849_v5, %v3845_v38 }
0x1091   : > { %v3727_v45 = vmul.f32 0.015625, %v3705_v54  ;;  %v3856_v54 = vld [vmem:[%s8646_s14 + $0xa8] sm:$0xff] }
0x1092   : > { %v7738_v33 = vsub.f32 %v7699_v55, %v3728_v59  ;;  %v3852_v59 = vld [vmem:[%s8646_s14 + $0x88] sm:$0xff]  ;;  %6136 = vmatpush1.bf16.msra.mxu0 %v6135_v52 }
0x1093   : > { %v7741_v43 = vsub.f32 %v7701_v28, %v3727_v45  ;;  %v3714_v56 = vpop.xlane.xlu0 %3713  ;;  %v3854_v45 = vld [vmem:[%s8646_s14 + $0x98] sm:$0xff] }
0x1094   : > { %v3730_v57 = vmul.f32 0.015625, %v3714_v56  ;;  %v3711_v44 = vpop.xlane.xlu1 %3710  ;;  %v3744_v11 = vmul.f32 %v7738_v33, %v7738_v33  ;;  %v6121_v56 = vpack.c.bf16 %v3856_v54, %v3852_v59 }
0x1095   : > { %v3729_v25 = vmul.f32 0.015625, %v3711_v44  ;;  %v3743_v16 = vmul.f32 %v7741_v43, %v7741_v43  ;;  %v3851_v44 = vld [vmem:[%s8646_s14 + $0x80] sm:$0xff] }
0x1096   : > { %v7748_v6 = vsub.f32 %v7709_v9, %v3730_v57  ;;  %v3754_v22 = vsel %vm670_vm1, %v3744_v11, 0.0  ;;  %v3858_v57 = vld [vmem:[%s8646_s14 + $0xb8] sm:$0xff]  ;;  %v3855_v11 = vld [vmem:[%s8646_s14 + $0xa0] sm:$0xff]  ;;  %6122 = vmatprep.subr.bf16.mxu1 %v6121_v56 }
0x1097   : > { %v7752_v8 = vsub.f32 %v7711_v40, %v3729_v25  ;;  %v3720_v2 = vpop.xlane.xlu0 %3719  ;;  %3755 = vadd.xlane.f32.xlu0 %v3754_v22  ;;  %v3751_v1 = vsel %vm670_vm1, %v3743_v16, 0.0  ;;  %v6137_v25 = vpack.c.bf16 %v3858_v57, %v3854_v45  ;;  %v6123_v16 = vpack.c.bf16 %v3855_v11, %v3851_v44  ;;  %v3853_v22 = vld [vmem:[%s8646_s14 + $0x90] sm:$0xff]  ;;  %v7884_v11 = vld [vmem:[%s8644_s12] ss:$0 sm:$0xff] }
0x1098   : > { %v3732_v34 = vmul.f32 0.015625, %v3720_v2  ;;  %v3717_v19 = vpop.xlane.xlu1 %3716  ;;  %3752 = vadd.xlane.f32.xlu1 %v3751_v1  ;;  %v3746_v51 = vmul.f32 %v7748_v6, %v7748_v6  ;;  %v3857_v2 = vld [vmem:[%s8646_s14 + $0xb0] sm:$0xff] }
0x1099   : > { %v3731_v48 = vmul.f32 0.015625, %v3717_v19  ;;  %v3745_v53 = vmul.f32 %v7752_v8, %v7752_v8  ;;  %v6139_v1 = vpack.c.bf16 %v3857_v2, %v3853_v22  ;;  %6138 = vmatprep.subr.bf16.mxu0 %v6137_v25  ;;  %v3864_v19 = vld [vmem:[%s8646_s14 + $0xe8] sm:$0xff]  ;;  %6124 = vmatpush1.bf16.msra.mxu1 %v6123_v16  ;;  %v7891_v2 = vld [vmem:[%s8645_s13] ss:$0 sm:$0xff] }
0x109a   : > { %v7760_v47 = vsub.f32 %v7719_v13, %v3732_v34  ;;  %v3760_v32 = vsel %vm670_vm1, %v3746_v51, 0.0  ;;  %v3860_v34 = vld [vmem:[%s8646_s14 + $0xc8] sm:$0xff]  ;;  %v3862_v51 = vld [vmem:[%s8646_s14 + $0xd8] sm:$0xff] }
0x109b   : > { %v7764_v42 = vsub.f32 %v7721_v14, %v3731_v48  ;;  %3761 = vadd.xlane.f32.xlu0 %v3760_v32  ;;  %v3757_v23 = vsel %vm670_vm1, %v3745_v53, 0.0  ;;  %v6125_v48 = vpack.c.bf16 %v3864_v19, %v3860_v34  ;;  %v3866_v53 = vld [vmem:[%s8646_s14 + $0xf8] sm:$0xff]  ;;  %v3859_v32 = vld [vmem:[%s8646_s14 + $0xc0] sm:$0xff]  ;;  %6140 = vmatpush1.bf16.msra.mxu0 %v6139_v1 }
0x109c   : > { %3758 = vadd.xlane.f32.xlu1 %v3757_v23  ;;  %v3748_v20 = vmul.f32 %v7760_v47, %v7760_v47  ;;  %v3863_v23 = vld [vmem:[%s8646_s14 + $0xe0] sm:$0xff] }
0x109d   : > { %v3747_v7 = vmul.f32 %v7764_v42, %v7764_v42  ;;  %6126 = vmatprep.subr.bf16.mxu1 %v6125_v48 }
0x109e   : > { %v3766_v24 = vsel %vm670_vm1, %v3748_v20, 0.0  ;;  %v6141_v20 = vpack.c.bf16 %v3866_v53, %v3862_v51 }
0x109f   : > { %3767 = vadd.xlane.f32.xlu0 %v3766_v24  ;;  %v3763_v62 = vsel %vm670_vm1, %v3747_v7, 0.0  ;;  %v6127_v7 = vpack.c.bf16 %v3863_v23, %v3859_v32  ;;  %v3861_v24 = vld [vmem:[%s8646_s14 + $0xd0] sm:$0xff] }
0x10a0   : > { %3764 = vadd.xlane.f32.xlu1 %v3763_v62  ;;  %v3865_v62 = vld [vmem:[%s8646_s14 + $0xf0] sm:$0xff]  ;;  %6142 = vmatprep.subr.bf16.mxu0 %v6141_v20 }
0x10a1   : > { %v6143_v12 = vpack.c.bf16 %v3865_v62, %v3861_v24  ;;  %6128 = vmatpush1.bf16.msra.mxu1 %v6127_v7 }
0x10a3   : > { %6144 = vmatpush1.bf16.msra.mxu0 %v6143_v12 }
0x10c2   : > { %v3726_v17 = vpop.xlane.xlu0 %3725 }
0x10c3   : > { %v3734_v15 = vmul.f32 0.015625, %v3726_v17  ;;  %v3723_v4 = vpop.xlane.xlu1 %3722 }
0x10c4   : > { %v3733_v58 = vmul.f32 0.015625, %v3723_v4 }
0x10c5   : > { %v7870_v3 = vsub.f32 %v7729_v39, %v3734_v15 }
0x10c6   : > { %v7873_v30 = vsub.f32 %v7731_v36, %v3733_v58 }
0x10c7   : > { %v3750_v27 = vmul.f32 %v7870_v3, %v7870_v3 }
0x10c8   : > { %v3749_v26 = vmul.f32 %v7873_v30, %v7873_v30 }
0x10c9   : > { %v3772_v18 = vsel %vm670_vm1, %v3750_v27, 0.0 }
0x10ca   : > { %3773 = vadd.xlane.f32.xlu0 %v3772_v18  ;;  %v3769_v63 = vsel %vm670_vm1, %v3749_v26, 0.0 }
0x10cb   : > { %3770 = vadd.xlane.f32.xlu1 %v3769_v63 }
0x1124   : > { %v3756_v35 = vpop.xlane.xlu0 %3755 }
0x1125   : > { %v3776_v46 = vmul.f32 0.015625, %v3756_v35  ;;  %v3753_v10 = vpop.xlane.xlu1 %3752 }
0x1126   : > { %v3775_v31 = vmul.f32 0.015625, %v3753_v10 }
0x1127   : > { %v3784_v49 = vadd.f32 1e-05, %v3776_v46 }
0x1128   : > { %v3783_v41 = vadd.f32 1e-05, %v3775_v31  ;;  %v3762_v0 = vpop.xlane.xlu0 %3761 }
0x1129   : > { %6530 = vrsqrt.f32 %v3784_v49  ;;  %v3778_v50 = vmul.f32 0.015625, %v3762_v0  ;;  %v3759_v37 = vpop.xlane.xlu1 %3758 }
0x112a   : > { %6532 = vrsqrt.f32 %v3783_v41  ;;  %v3777_v29 = vmul.f32 0.015625, %v3759_v37  ;;  %v4587_v37 = vld [vmem:[%s8648_s16] sm:$0xff] }
0x112b   : > { %v3786_v38 = vadd.f32 1e-05, %v3778_v50 }
0x112c   : > { %v3785_v5 = vadd.f32 1e-05, %v3777_v29  ;;  %v3768_v52 = vpop.xlane.xlu0 %3767 }
0x112d   : > { %v3765_v59 = vpop.xlane.xlu1 %3764  ;;  %v3780_v45 = vmul.f32 0.015625, %v3768_v52 }
0x112e   : > { %6534 = vrsqrt.f32 %v3785_v5  ;;  %v3779_v54 = vmul.f32 0.015625, %v3765_v59  ;;  %v4606_v5 = vld [vmem:[%s8648_s16 + $0x98] sm:$0xff]  ;;  %v4589_v59 = vld [vmem:[%s8648_s16 + $0x10] sm:$0xff] }
0x112f   : > { %6536 = vrsqrt.f32 %v3786_v38  ;;  %v3788_v25 = vadd.f32 1e-05, %v3780_v45  ;;  %v4605_v38 = vld [vmem:[%s8648_s16 + $0x90] sm:$0xff] }
0x1130   : > { %v3787_v56 = vadd.f32 1e-05, %v3779_v54  ;;  %v6149_v52 = vpack.c.bf16 %v4606_v5, %v4605_v38  ;;  %v4590_v54 = vld [vmem:[%s8648_s16 + $0x18] sm:$0xff] }
0x1131   : > { %v6151_v45 = vpack.c.bf16 %v4590_v54, %v4589_v59 }
0x1132   : > { %6538 = vrsqrt.f32 %v3787_v56  ;;  %v4607_v56 = vld [vmem:[%s8648_s16 + $0xa0] sm:$0xff] }
0x1133   : > { %v6531_v57 = vpop.eup %6530  ;;  %6540 = vrsqrt.f32 %v3788_v25  ;;  %v4592_v25 = vld [vmem:[%s8648_s16 + $0x28] sm:$0xff] }
0x1134   : > { %v6533_v44 = vpop.eup %6532  ;;  %v3800_v22 = vmul.f32 %v6531_v57, %v7738_v33  ;;  %v4608_v57 = vld [vmem:[%s8648_s16 + $0xa8] sm:$0xff] }
0x1135   : > { %v3799_v16 = vmul.f32 %v6533_v44, %v7741_v43  ;;  %v6153_v44 = vpack.c.bf16 %v4608_v57, %v4607_v56 }
0x1136   : > { %v3814_v51 = vmul.f32 %v7884_v11, %v3800_v22  ;;  %v4609_v22 = vld [vmem:[%s8648_s16 + $0xb0] sm:$0xff] }
0x1137   : > { %v3813_v1 = vmul.f32 %v7884_v11, %v3799_v16 }
0x1138   : > { %v6535_v34 = vpop.eup %6534  ;;  %v3828_v33 = vadd.f32 %v7891_v2, %v3814_v51 }
0x1139   : > { %v3827_v19 = vadd.f32 %v7891_v2, %v3813_v1  ;;  %v3801_v48 = vmul.f32 %v6535_v34, %v7752_v8  ;;  %v6537_v53 = vpop.eup %6536  ;;  %v4593_v34 = vld [vmem:[%s8648_s16 + $0x30] sm:$0xff] }
0x113a   : > { %v3802_v32 = vmul.f32 %v6537_v53, %v7748_v6  ;;  %v4612_v53 = vld [vmem:[%s8648_s16 + $0xc8] sm:$0xff] }
0x113b   : > { %5151 = vmatmul.mubr.msk.f32.vlgmr.msra.gmra.mrb[52].mxu1 %vm670_vm1, %v3827_v19  ;;  %5159 = vmatmul.mubr.msk.f32.vlgmr.msra.gmra.mrb[52].mxu0 %vm670_vm1, %v3827_v19  ;;  %v3815_v43 = vmul.f32 %v7884_v11, %v3801_v48  ;;  %v4594_v19 = vld [vmem:[%s8648_s16 + $0x38] sm:$0xff]  ;;  %v4611_v48 = vld [vmem:[%s8648_s16 + $0xc0] sm:$0xff] }
0x113c   : > { %3983 = vmatprep.mubr.f32.mxu1 %v6628_v21  ;;  %4096 = vmatprep.mubr.f32.mxu0 %v6628_v21  ;;  %v6539_v23 = vpop.eup %6538  ;;  %v3816_v20 = vmul.f32 %v7884_v11, %v3802_v32  ;;  %v6159_v51 = vpack.c.bf16 %v4594_v19, %v4593_v34  ;;  %v4596_v32 = vld [vmem:[%s8648_s16 + $0x48] sm:$0xff] }
0x113d   : > { %v3829_v8 = vadd.f32 %v7891_v2, %v3815_v43  ;;  %v3803_v7 = vmul.f32 %v6539_v23, %v7764_v42  ;;  %v6541_v24 = vpop.eup %6540  ;;  %v4595_v43 = vld [vmem:[%s8648_s16 + $0x40] sm:$0xff] }
0x113e   : > { %v3830_v6 = vadd.f32 %v7891_v2, %v3816_v20  ;;  %v3804_v12 = vmul.f32 %v6541_v24, %v7760_v47  ;;  %v6163_v23 = vpack.c.bf16 %v4596_v32, %v4595_v43  ;;  %v4614_v20 = vld [vmem:[%s8648_s16 + $0xd8] sm:$0xff]  ;;  %v4597_v24 = vld [vmem:[%s8648_s16 + $0x50] sm:$0xff] }
0x113f   : > { %5152 = vmatmul.mubr.msk.f32.gmra.mrb[54].mxu1 %vm670_vm1, %v3828_v33  ;;  %5160 = vmatmul.mubr.msk.f32.gmra.mrb[54].mxu0 %vm670_vm1, %v3828_v33  ;;  %v3817_v62 = vmul.f32 %v7884_v11, %v3803_v7  ;;  %v6161_v33 = vpack.c.bf16 %v4612_v53, %v4611_v48 }
0x1140   : > { %3989 = vmatprep.mubr.f32.mxu1 %v6628_v21  ;;  %4102 = vmatprep.mubr.f32.mxu0 %v6628_v21  ;;  %v3818_v17 = vmul.f32 %v7884_v11, %v3804_v12  ;;  %v4615_v12 = vld [vmem:[%s8648_s16 + $0xe0] sm:$0xff] }
0x1141   : > { %v3831_v42 = vadd.f32 %v7891_v2, %v3817_v62 }
0x1142   : > { %v3832_v47 = vadd.f32 %v7891_v2, %v3818_v17 }
0x1143   : > { %5153 = vmatmul.mubr.msk.f32.gmra.mrb[56].mxu1 %vm670_vm1, %v3829_v8  ;;  %5161 = vmatmul.mubr.msk.f32.gmra.mrb[56].mxu0 %vm670_vm1, %v3829_v8  ;;  %v4613_v8 = vld [vmem:[%s8648_s16 + $0xd0] sm:$0xff] }
0x1144   : > { %3995 = vmatprep.mubr.f32.mxu1 %v6628_v21  ;;  %4108 = vmatprep.mubr.f32.mxu0 %v6628_v21  ;;  %v6165_v7 = vpack.c.bf16 %v4614_v20, %v4613_v8 }
0x1147   : > { %5154 = vmatmul.mubr.msk.f32.gmra.mrb[58].mxu1 %vm670_vm1, %v3830_v6  ;;  %5162 = vmatmul.mubr.msk.f32.gmra.mrb[58].mxu0 %vm670_vm1, %v3830_v6  ;;  %v4598_v6 = vld [vmem:[%s8648_s16 + $0x58] sm:$0xff] }
0x1148   : > { %4001 = vmatprep.mubr.f32.mxu1 %v6628_v21  ;;  %4114 = vmatprep.mubr.f32.mxu0 %v6628_v21  ;;  %v6167_v62 = vpack.c.bf16 %v4598_v6, %v4597_v24 }
0x114b   : > { %5155 = vmatmul.mubr.msk.f32.gmra.mrb[60].mxu1 %vm670_vm1, %v3831_v42  ;;  %5163 = vmatmul.mubr.msk.f32.gmra.mrb[60].mxu0 %vm670_vm1, %v3831_v42  ;;  %v4616_v42 = vld [vmem:[%s8648_s16 + $0xe8] sm:$0xff] }
0x114c   : > { %4007 = vmatprep.mubr.f32.mxu1 %v6628_v21  ;;  %4120 = vmatprep.mubr.f32.mxu0 %v6628_v21  ;;  %v6169_v17 = vpack.c.bf16 %v4616_v42, %v4615_v12 }
0x114f   : > { %5156 = vmatmul.mubr.msk.f32.gmra.mrb[62].mxu1 %vm670_vm1, %v3832_v47  ;;  %5164 = vmatmul.mubr.msk.f32.gmra.mrb[62].mxu0 %vm670_vm1, %v3832_v47  ;;  %v4599_v47 = vld [vmem:[%s8648_s16 + $0x60] sm:$0xff] }
0x1150   : > { %4013 = vmatprep.mubr.f32.mxu1 %v6628_v21  ;;  %4126 = vmatprep.mubr.f32.mxu0 %v6628_v21 }
0x1157   : > { %v3774_v15 = vpop.xlane.xlu0 %3773 }
0x1158   : > { %v3782_v4 = vmul.f32 0.015625, %v3774_v15  ;;  %v3771_v58 = vpop.xlane.xlu1 %3770  ;;  %v4600_v15 = vld [vmem:[%s8648_s16 + $0x68] sm:$0xff] }
0x1159   : > { %v3781_v27 = vmul.f32 0.015625, %v3771_v58  ;;  %v4617_v58 = vld [vmem:[%s8648_s16 + $0xf0] sm:$0xff] }
0x115a   : > { %v3790_v26 = vadd.f32 1e-05, %v3782_v4  ;;  %v6171_v4 = vpack.c.bf16 %v4600_v15, %v4599_v47 }
0x115b   : > { %v3789_v18 = vadd.f32 1e-05, %v3781_v27  ;;  %v4618_v27 = vld [vmem:[%s8648_s16 + $0xf8] sm:$0xff] }
0x115c   : > { %6542 = vrsqrt.f32 %v3790_v26  ;;  %v6173_v26 = vpack.c.bf16 %v4618_v27, %v4617_v58 }
0x115d   : > { %6544 = vrsqrt.f32 %v3789_v18  ;;  %v4601_v18 = vld [vmem:[%s8648_s16 + $0x70] sm:$0xff] }
0x1166   : > { %v6543_v63 = vpop.eup %6542 }
0x1167   : > { %v6545_v35 = vpop.eup %6544  ;;  %v3806_v10 = vmul.f32 %v6543_v63, %v7870_v3  ;;  %v4603_v3 = vld [vmem:[%s8648_s16 + $0x80] sm:$0xff]  ;;  %v4602_v63 = vld [vmem:[%s8648_s16 + $0x78] sm:$0xff] }
0x1168   : > { %v3805_v46 = vmul.f32 %v6545_v35, %v7873_v30  ;;  %v4604_v30 = vld [vmem:[%s8648_s16 + $0x88] sm:$0xff]  ;;  %v6175_v35 = vpack.c.bf16 %v4602_v63, %v4601_v18 }
0x1169   : > { %v3820_v41 = vmul.f32 %v7884_v11, %v3806_v10  ;;  %v6145_v50 = vpack.c.bf16 %v4604_v30, %v4603_v3  ;;  %v3867_v10 = vld [vmem:[%s8647_s15] sm:$0xf] }
0x116a   : > { %v3819_v31 = vmul.f32 %v7884_v11, %v3805_v46  ;;  %v4591_v11 = vld [vmem:[%s8648_s16 + $0x20] sm:$0xff]  ;;  %v3879_v46 = vsub.s32 2, %v6846_v60 }
0x116b   : > { %v3834_v0 = vadd.f32 %v7891_v2, %v3820_v41  ;;  %6146 = vmatprep.subr.bf16.mxu1 %v6145_v50  ;;  %v6155_v16 = vpack.c.bf16 %v4592_v25, %v4591_v11 }
0x116c   : > { %v3833_v49 = vadd.f32 %v7891_v2, %v3819_v31  ;;  %v4610_v2 = vld [vmem:[%s8648_s16 + $0xb8] sm:$0xff]  ;;  %v3875_v31 = vsub.s32 1, %v6846_v60  ;;  %v8047_v41 = vrot.slane %v3867_v10, %v3879_v46 }
0x116d   : > { %v6157_v1 = vpack.c.bf16 %v4610_v2, %v4609_v22 }
0x116e   : > { %5157 = vmatmul.mubr.msk.f32.gmra.mrb[64].mxu1 %vm670_vm1, %v3833_v49  ;;  %5165 = vmatmul.mubr.msk.f32.gmra.mrb[64].mxu0 %vm670_vm1, %v3833_v49  ;;  %v3883_v49 = vsub.s32 3, %v6846_v60 }
0x116f   : > { %4019 = vmatprep.mubr.f32.mxu1 %v6628_v21  ;;  %4132 = vmatprep.mubr.f32.mxu0 %v6628_v21  ;;  %v4588_v21 = vld [vmem:[%s8648_s16 + $0x8] sm:$0xff] }
0x1170   : > { %v6147_v29 = vpack.c.bf16 %v4588_v21, %v4587_v37  ;;  %v8051_v3 = vrot.slane %v3867_v10, %v3883_v49 }
0x1172   : > { %5158 = vmatmul.mubr.msk.f32.gmra.mrb[66].mxu1 %vm670_vm1, %v3834_v0  ;;  %5166 = vmatmul.mubr.msk.f32.gmra.mrb[66].mxu0 %vm670_vm1, %v3834_v0  ;;  %v8049_v0 = vrot.slane %v3867_v10, %v3875_v31 }
0x1173   : > { %6148 = vmatpush3.bf16.msra.mxu1 %v6147_v29 }
0x1174   : > { %6150 = vmatprep.subr.bf16.mxu1 %v6149_v52 }
0x1177   : > { %6152 = vmatpush3.bf16.msra.mxu1 %v6151_v45 }
0x1178   : > { %6154 = vmatprep.subr.bf16.mxu1 %v6153_v44 }
0x117b   : > { %6156 = vmatpush3.bf16.msra.mxu1 %v6155_v16 }
0x117c   : > { %6158 = vmatprep.subr.bf16.mxu1 %v6157_v1 }
0x117f   : > { %6160 = vmatpush3.bf16.msra.mxu1 %v6159_v51 }
0x1180   : > { %6162 = vmatprep.subr.bf16.mxu1 %v6161_v33 }
0x1183   : > { %6164 = vmatpush3.bf16.msra.mxu1 %v6163_v23  ;;  %v8080_v23 = vrot.slane %v3867_v10, %v6849_v61 }
0x1184   : > { %6166 = vmatprep.subr.bf16.mxu1 %v6165_v7 }
0x1187   : > { %6168 = vmatpush3.bf16.msra.mxu1 %v6167_v62 }
0x1188   : > { %6170 = vmatprep.subr.bf16.mxu1 %v6169_v17 }
0x118b   : > { %6172 = vmatpush3.bf16.msra.mxu1 %v6171_v4 }
0x118c   : > { %6174 = vmatprep.subr.bf16.mxu1 %v6173_v26 }
0x118f   : > { %6176 = vmatpush3.bf16.msra.mxu1 %v6175_v35 }
0x120e   : > { %v3979_v30 = vpop.f32.mrb[52].mxu1  ;;  %v4092_v50 = vpop.f32.mrb[52].mxu0 }
0x120f   : > { %v4093_v37 = vadd.f32 %v4092_v50, %v8047_v41  ;;  %v3981_v21 = vpop.f32.mrb[53].mxu1  ;;  %v4094_v29 = vpop.f32.mrb[53].mxu0  ;;  %v8103_v27 = vadd.f32 %v3979_v30, %v8080_v23 }
0x1210   : > { %v8055_v38 = vadd.f32 %v3981_v21, %v8049_v0  ;;  %v4095_v5 = vadd.f32 %v4094_v29, %v8051_v3 }
0x1211   : > { %v8058_v52 = vmul.f32 0.70710677, %v4093_v37  ;;  %v8107_v63 = vmul.f32 0.5, %v4093_v37 }
0x1212   : > { %8686 = vst [vmem:[#allocation10_spill] sm:$0xff] %v8055_v38  ;;  %v8060_v60 = vmul.f32 0.70710677, %v4095_v5  ;;  %v3985_v59 = vpop.f32.mrb[54].mxu1  ;;  %v4098_v54 = vpop.f32.mrb[54].mxu0  ;;  %v8114_v31 = vmul.f32 0.5, %v4095_v5 }
0x1213   : > { %v4203_v45 = vand.u32 2147483647, %v8058_v52  ;;  %v8064_v56 = vadd.f32 %v4098_v54, %v8047_v41  ;;  %v3987_v57 = vpop.f32.mrb[55].mxu1  ;;  %v4100_v44 = vpop.f32.mrb[55].mxu0  ;;  %vm4171_vm5 = vcmp.ge.f32.partialorder %v8058_v52, 0.0  ;;  %v8117_v49 = vadd.f32 %v3985_v59, %v8080_v23 }
0x1214   : > { %v4204_v11 = vand.u32 2147483647, %v8060_v60  ;;  %v8068_v25 = vadd.f32 %v3987_v57, %v8049_v0  ;;  %v8074_v1 = vadd.f32 %v4100_v44, %v8051_v3  ;;  %vm4172_vm6 = vcmp.ge.f32.partialorder %v8060_v60, 0.0 }
0x1215   : > { %v4219_v16 = vmul.f32 0.3275911, %v4203_v45  ;;  %v8071_v2 = vmul.f32 0.70710677, %v8064_v56  ;;  %v4427_v32 = vsub.f32 0.0, %v4203_v45  ;;  %8689 = vst [vmem:[#allocation13_spill] sm:$0xff] %v8117_v49 }
0x1216   : > { %8687 = vst [vmem:[#allocation11_spill] sm:$0xff] %v8068_v25  ;;  %v4220_v22 = vmul.f32 0.3275911, %v4204_v11  ;;  %v8076_v34 = vpop.f32.mrb[56].mxu1  ;;  %v4104_v51 = vpop.f32.mrb[56].mxu0  ;;  %v4428_v7 = vsub.f32 0.0, %v4204_v11 }
0x1217   : > { %v4235_v19 = vadd.f32 1.0, %v4219_v16  ;;  %v3993_v48 = vpop.f32.mrb[57].mxu1  ;;  %v4205_v33 = vand.u32 2147483647, %v8071_v2  ;;  %v4106_v43 = vpop.f32.mrb[57].mxu0  ;;  %v8088_v6 = vadd.f32 %v4104_v51, %v8047_v41  ;;  %v4443_v15 = vmul.f32 %v4427_v32, %v4203_v45 }
0x1218   : > { %v4236_v53 = vadd.f32 1.0, %v4220_v22  ;;  %v8085_v24 = vmul.f32 0.70710677, %v8074_v1  ;;  %v8091_v62 = vadd.f32 %v3993_v48, %v8049_v0  ;;  %v8094_v61 = vadd.f32 %v4106_v43, %v8051_v3 }
0x1219   : > { %6546 = vrcp.f32 %v4235_v19  ;;  %v4221_v8 = vmul.f32 0.3275911, %v4205_v33  ;;  %v8100_v58 = vmul.f32 0.70710677, %v8088_v6  ;;  %v4444_v35 = vmul.f32 %v4428_v7, %v4204_v11 }
0x121a   : > { %6548 = vrcp.f32 %v4236_v53  ;;  %v8082_v20 = vpop.f32.mrb[58].mxu1  ;;  %8688 = vst [vmem:[#allocation12_spill] sm:$0xff] %v8091_v62  ;;  %v4110_v12 = vpop.f32.mrb[58].mxu0  ;;  %v8097_v4 = vand.u32 2147483647, %v8085_v24  ;;  %v4429_v45 = vsub.f32 0.0, %v4205_v33 }
0x121b   : > { %v3999_v42 = vpop.f32.mrb[59].mxu1  ;;  %v4237_v17 = vadd.f32 1.0, %v4221_v8  ;;  %v4112_v47 = vpop.f32.mrb[59].mxu0  ;;  %v8111_v10 = vand.u32 2147483647, %v8100_v58  ;;  %v8130_v5 = vadd.f32 %v4110_v12, %v8047_v41  ;;  %v8657_v22 = vmov -1.0  }
0x121c   : > { %v4222_v46 = vmul.f32 0.3275911, %v8097_v4  ;;  %v8120_v30 = vmul.f32 0.70710677, %v8094_v61  ;;  %v4459_v37 = vmul.f32 1.442695, %v4443_v15  ;;  %v8133_v59 = vadd.f32 %v3999_v42, %v8049_v0 }
0x121d   : > { %6550 = vrcp.f32 %v4237_v17  ;;  %v4223_v54 = vmul.f32 0.3275911, %v8111_v10  ;;  %v8144_v19 = vsel %vm4171_vm5, 1.0, %v8657_v22  ;;  %v4461_v51 = vmul.f32 1.442695, %v4444_v35 }
0x121e   : > { %v8105_v26 = vpop.f32.mrb[60].mxu1  ;;  %v4116_v18 = vpop.f32.mrb[60].mxu0  ;;  %v4238_v29 = vadd.f32 1.0, %v4222_v46  ;;  %v8127_v57 = vand.u32 2147483647, %v8120_v30  ;;  %8690 = vst [vmem:[#allocation14_spill] sm:$0xff] %v8133_v59  ;;  %v8166_v17 = vadd.f32 %v8076_v34, %v8080_v23  ;;  %v4445_v35 = vmul.f32 %v4429_v45, %v4205_v33 }
0x121f   : > { %v4005_v50 = vpop.f32.mrb[61].mxu1  ;;  %v8122_v21 = vpop.f32.mrb[61].mxu0  ;;  %v4239_v48 = vadd.f32 1.0, %v4223_v54  ;;  %v8156_v7 = vsel %vm4172_vm6, 1.0, %v8657_v22  ;;  %v8159_v52 = vmul.f32 0.5, %v8064_v56  ;;  %vm4173_vm7 = vcmp.ge.f32.partialorder %v8071_v2, 0.0 }
0x1220   : > { %6552 = vrcp.f32 %v4238_v29  ;;  %v4224_v12 = vmul.f32 0.3275911, %v8127_v57  ;;  %8691 = vst [vmem:[#allocation15_spill] sm:$0xff] %v8166_v17  ;;  %v8169_v56 = vmul.f32 0.70710677, %v8130_v5  ;;  %v8172_v29 = vadd.f32 %v4112_v47, %v8051_v3 }
0x1221   : > { %6554 = vpow2.f32 %v4459_v37  ;;  %v8178_v54 = vsel %vm4173_vm7, 1.0, %v8657_v22  ;;  %v8181_v34 = vmul.f32 0.5, %v8074_v1  ;;  %vm4174_vm8 = vcmp.ge.f32.partialorder %v8085_v24, 0.0 }
0x1222   : > { %v8135_v44 = vpop.f32.mrb[62].mxu1  ;;  %v8137_v11 = vpop.f32.mrb[62].mxu0  ;;  %6556 = vrcp.f32 %v4239_v48  ;;  %v4240_v60 = vadd.f32 1.0, %v4224_v12  ;;  %v8187_v47 = vand.u32 2147483647, %v8169_v56  ;;  %v8191_v12 = vmul.f32 0.5, %v8088_v6 }
0x1223   : > { %v8139_v16 = vpop.eup %6546  ;;  %v8146_v53 = vpop.f32.mrb[63].mxu1  ;;  %6558 = vpow2.f32 %v4461_v51  ;;  %v4463_v48 = vmul.f32 1.442695, %v4445_v35  ;;  %v8199_v24 = vsel %vm4174_vm8, 1.0, %v8657_v22  ;;  %v8205_v35 = vadd.f32 %v4005_v50, %v8049_v0 }
0x1224   : > { %v8148_v43 = vpop.f32.mrb[63].mxu0  ;;  %v8150_v32 = vpop.eup %6548  ;;  %v4283_v8 = vmul.f32 1.0614054, %v8139_v16  ;;  %6560 = vrcp.f32 %v4240_v60  ;;  %v8195_v60 = vadd.f32 %v4116_v18, %v8047_v41  ;;  %vm4175_vm9 = vcmp.ge.f32.partialorder %v8100_v58, 0.0 }
0x1225   : > { %v4284_v42 = vmul.f32 1.0614054, %v8150_v32  ;;  %8692 = vst [vmem:[#allocation16_spill] sm:$0xff] %v8205_v35  ;;  %6562 = vpow2.f32 %v4463_v48  ;;  %v8215_v50 = vmul.f32 0.5, %v8094_v61  ;;  %v8693_v58 = vmov -1.0  }
0x1226   : > { %v4299_v15 = vadd.f32 -1.4531521, %v4283_v8  ;;  %v4430_v8 = vsub.f32 0.0, %v8097_v4  ;;  %v4431_v61 = vsub.f32 0.0, %v8111_v10  ;;  %vm4176_vm10 = vcmp.ge.f32.partialorder %v8120_v30, 0.0 }
0x1227   : > { %v4300_v46 = vadd.f32 -1.4531521, %v4284_v42  ;;  %v8174_v37 = vpop.eup %6550  ;;  %vm4177_vm11 = vcmp.ge.f32.partialorder %v8169_v56, 0.0 }
0x1228   : > { %v4315_v2 = vmul.f32 %v8139_v16, %v4299_v15  ;;  %v4285_v45 = vmul.f32 1.0614054, %v8174_v37  ;;  %v4225_v15 = vmul.f32 0.3275911, %v8187_v47  ;;  %v4446_v22 = vmul.f32 %v4430_v8, %v8097_v4 }
0x1229   : > { %v4316_v33 = vmul.f32 %v8150_v32, %v4300_v46 }
0x122a   : > { %v4331_v51 = vadd.f32 1.4214138, %v4315_v2  ;;  %v4301_v1 = vadd.f32 -1.4531521, %v4285_v45  ;;  %v8202_v2 = vmul.f32 0.70710677, %v8172_v29  ;;  %v8207_v6 = vpop.eup %6552 }
0x122b   : > { %v4332_v42 = vadd.f32 1.4214138, %v4316_v33  ;;  %v4241_v18 = vadd.f32 1.0, %v4225_v15  ;;  %v6555_v36 = vpop.eup %6554  ;;  %v8221_v15 = vsel %vm4175_vm9, 1.0, %v8693_v58 }
0x122c   : > { %v4347_v46 = vmul.f32 %v8139_v16, %v4331_v51  ;;  %v4317_v45 = vmul.f32 %v8174_v37, %v4301_v1  ;;  %v4286_v51 = vmul.f32 1.0614054, %v8207_v6  ;;  %v8217_v9 = vpop.eup %6556  ;;  %v8224_v48 = vand.u32 2147483647, %v8202_v2 }
0x122d   : > { %v4348_v33 = vmul.f32 %v8150_v32, %v4332_v42  ;;  %6564 = vrcp.f32 %v4241_v18  ;;  %v4287_v8 = vmul.f32 1.0614054, %v8217_v9  ;;  %vm4178_vm12 = vcmp.ge.f32.partialorder %v8202_v2, 0.0 }
0x122e   : > { %v4363_v39 = vadd.f32 -0.28449672, %v4347_v46  ;;  %v4333_v14 = vadd.f32 1.4214138, %v4317_v45  ;;  %v4302_v1 = vadd.f32 -1.4531521, %v4286_v51  ;;  %v6559_v46 = vpop.eup %6558 }
0x122f   : > { %v4364_v13 = vadd.f32 -0.28449672, %v4348_v33  ;;  %v4432_v33 = vsub.f32 0.0, %v8127_v57  ;;  %v8230_v45 = vpop.eup %6560  ;;  %v4465_v51 = vmul.f32 1.442695, %v4446_v22 }
0x1230   : > { %v4379_v42 = vmul.f32 %v8139_v16, %v4363_v39  ;;  %v4349_v4 = vmul.f32 %v8174_v37, %v4333_v14  ;;  %v4318_v39 = vmul.f32 %v8207_v6, %v4302_v1  ;;  %v4226_v40 = vmul.f32 0.3275911, %v8224_v48 }
0x1231   : > { %v4380_v55 = vmul.f32 %v8150_v32, %v4364_v13  ;;  %v4303_v35 = vadd.f32 -1.4531521, %v4287_v8  ;;  %v8237_v14 = vadd.f32 %v8122_v21, %v8051_v3  ;;  %v4288_v62 = vmul.f32 1.0614054, %v8230_v45 }
0x1232   : > { %v4395_v18 = vadd.f32 0.2548296, %v4379_v42  ;;  %v4365_v28 = vadd.f32 -0.28449672, %v4349_v4  ;;  %v4334_v17 = vadd.f32 1.4214138, %v4318_v39  ;;  %v4447_v1 = vmul.f32 %v4431_v61, %v8111_v10 }
0x1233   : > { %v4242_v49 = vadd.f32 1.0, %v4226_v40  ;;  %v4319_v22 = vmul.f32 %v8217_v9, %v4303_v35  ;;  %v4448_v13 = vmul.f32 %v4432_v33, %v8127_v57  ;;  %v4304_v25 = vadd.f32 -1.4531521, %v4288_v62  ;;  %v6563_v40 = vpop.eup %6562 }
0x1234   : > { %v4411_v59 = vmul.f32 %v8139_v16, %v4395_v18  ;;  %v4381_v42 = vmul.f32 %v8174_v37, %v4365_v28  ;;  %v4350_v8 = vmul.f32 %v8207_v6, %v4334_v17  ;;  %v4396_v21 = vadd.f32 0.2548296, %v4380_v55 }
0x1235   : > { %6566 = vrcp.f32 %v4242_v49  ;;  %v4335_v16 = vadd.f32 1.4214138, %v4319_v22  ;;  %v8248_v18 = vadd.f32 %v8082_v20, %v8080_v23  ;;  %v4320_v10 = vmul.f32 %v8230_v45, %v4304_v25 }
0x1236   : > { %v4491_v4 = vmul.f32 %v6555_v36, %v4411_v59  ;;  %v4397_v38 = vadd.f32 0.2548296, %v4381_v42  ;;  %v4366_v39 = vadd.f32 -0.28449672, %v4350_v8  ;;  %6568 = vpow2.f32 %v4465_v51 }
0x1237   : > { %v8252_v57 = vpop.eup %6564  ;;  %v4351_v36 = vmul.f32 %v8217_v9, %v4335_v16  ;;  %v4467_v62 = vmul.f32 1.442695, %v4447_v1  ;;  %v4469_v55 = vmul.f32 1.442695, %v4448_v13  ;;  %v4336_v20 = vadd.f32 1.4214138, %v4320_v10 }
0x1238   : > { %v4507_v28 = vsub.f32 1.0, %v4491_v4  ;;  %v4382_v59 = vmul.f32 %v8207_v6, %v4366_v39  ;;  %v4289_v17 = vmul.f32 1.0614054, %v8252_v57  ;;  %v4412_v35 = vmul.f32 %v8150_v32, %v4396_v21 }
0x1239   : > { %v4413_v61 = vmul.f32 %v8174_v37, %v4397_v38  ;;  %v4367_v33 = vadd.f32 -0.28449672, %v4351_v36  ;;  %v8261_v25 = vmul.f32 0.70710677, %v8195_v60  ;;  %v4352_v22 = vmul.f32 %v8230_v45, %v4336_v20 }
0x123a   : > { %v4523_v49 = vmul.f32 %v4507_v28, %v8144_v19  ;;  %v4398_v42 = vadd.f32 0.2548296, %v4382_v59  ;;  %v4305_v1 = vadd.f32 -1.4531521, %v4289_v17  ;;  %6570 = vpow2.f32 %v4467_v62 }
0x123b   : > { %v4383_v19 = vmul.f32 %v8217_v9, %v4367_v33  ;;  %v8268_v13 = vsel %vm4176_vm10, 1.0, %v8693_v58  ;;  %v4433_v32 = vsub.f32 0.0, %v8187_v47  ;;  %v4368_v37 = vadd.f32 -0.28449672, %v4352_v22 }
0x123c   : > { %v4539_v51 = vadd.f32 1.0, %v4523_v49  ;;  %6572 = vpow2.f32 %v4469_v55  ;;  %v4321_v4 = vmul.f32 %v8252_v57, %v4305_v1  ;;  %v4492_v8 = vmul.f32 %v6559_v46, %v4412_v35 }
0x123d   : > { %v4493_v21 = vmul.f32 %v6563_v40, %v4413_v61  ;;  %v4414_v16 = vmul.f32 %v8207_v6, %v4398_v42  ;;  %v8275_v28 = vand.u32 2147483647, %v8261_v25  ;;  %v4399_v10 = vadd.f32 0.2548296, %v4383_v19 }
0x123e   : > { %v4555_v38 = vmul.f32 %v4539_v51, %v8107_v63  ;;  %v4384_v36 = vmul.f32 %v8230_v45, %v4368_v37  ;;  %v4337_v63 = vadd.f32 1.4214138, %v4321_v4  ;;  %v8284_v62 = vmul.f32 0.5, %v8130_v5 }
0x123f   : > { %v8277_v39 = vpop.eup %6566  ;;  %v4449_v46 = vmul.f32 %v4433_v32, %v8187_v47  ;;  %v4227_v6 = vmul.f32 0.3275911, %v8275_v28  ;;  %v4434_v59 = vsub.f32 0.0, %v8224_v48  ;;  %v4508_v35 = vsub.f32 1.0, %v4492_v8 }
0x1240   : > { %v8280_v30 = vmul.f32 %v4555_v38, %v8103_v27  ;;  %v4290_v40 = vmul.f32 1.0614054, %v8277_v39  ;;  %v4400_v49 = vadd.f32 0.2548296, %v4384_v36  ;;  %v4353_v27 = vmul.f32 %v8252_v57, %v4337_v63  ;;  %v6569_v5 = vpop.eup %6568 }
0x1241   : > { %v8289_v55 = vpop.f32.mrb[64].mxu1  ;;  %v8294_v20 = vpop.f32.mrb[64].mxu0  ;;  %v4509_v47 = vsub.f32 1.0, %v4493_v21  ;;  %v4243_v33 = vadd.f32 1.0, %v4227_v6  ;;  %v4494_v42 = vmul.f32 %v6569_v5, %v4414_v16  ;;  %v4415_v22 = vmul.f32 %v8217_v9, %v4399_v10 }
0x1242   : > { %v8296_v17 = vpop.f32.mrb[65].mxu1  ;;  %v4306_v61 = vadd.f32 -1.4531521, %v4290_v40  ;;  %v8298_v51 = vpop.f32.mrb[65].mxu0  ;;  %v8304_v1 = vadd.f32 %v8105_v26, %v8080_v23  ;;  %v4416_v19 = vmul.f32 %v8230_v45, %v4400_v49  ;;  %v4471_v32 = vmul.f32 1.442695, %v4449_v46 }
0x1243   : > { %6574 = vrcp.f32 %v4243_v33  ;;  %v8315_v9 = vsel %vm4177_vm11, 1.0, %v8693_v58  ;;  %v4369_v8 = vadd.f32 -0.28449672, %v4353_v27  ;;  %v8318_v21 = vmul.f32 0.5, %v8172_v29 }
0x1244   : > { %v4322_v38 = vmul.f32 %v8277_v39, %v4306_v61  ;;  %v4450_v26 = vmul.f32 %v4434_v59, %v8224_v48  ;;  %v6571_v10 = vpop.eup %6570  ;;  %v4524_v36 = vmul.f32 %v4508_v35, %v8156_v7  ;;  %v4525_v63 = vmul.f32 %v4509_v47, %v8178_v54 }
0x1245   : > { %v8308_v37 = vpop.f32.mrb[66].mxu1  ;;  %v8310_v4 = vpop.f32.mrb[66].mxu0  ;;  %v8328_v56 = vmul.f32 0.70710677, %v8237_v14  ;;  %v4510_v6 = vsub.f32 1.0, %v4494_v42  ;;  %v4495_v49 = vmul.f32 %v6571_v10, %v4415_v22  ;;  %v8333_v29 = vsel %vm4178_vm12, 1.0, %v8693_v58 }
0x1246   : > { %v8321_v45 = vpop.f32.mrb[67].mxu1  ;;  %v8323_v16 = vpop.f32.mrb[67].mxu0  ;;  %v4338_v46 = vadd.f32 1.4214138, %v4322_v38  ;;  %v8336_v48 = vmul.f32 0.5, %v8195_v60  ;;  %6576 = vpow2.f32 %v4471_v32  ;;  %v4385_v59 = vmul.f32 %v8252_v57, %v4369_v8 }
0x1247   : > { %v6573_v40 = vpop.eup %6572  ;;  %v4212_v54 = vand.u32 2147483647, %v8328_v56  ;;  %v4473_v5 = vmul.f32 1.442695, %v4450_v26  ;;  %v4435_v35 = vsub.f32 0.0, %v8275_v28  ;;  %v8344_v47 = vadd.f32 %v8137_v11, %v8047_v41 }
0x1248   : > { %v4496_v27 = vmul.f32 %v6573_v40, %v4416_v19  ;;  %v4354_v7 = vmul.f32 %v8277_v39, %v4338_v46  ;;  %v4540_v2 = vadd.f32 1.0, %v4524_v36  ;;  %v4541_v61 = vadd.f32 1.0, %v4525_v63 }
0x1249   : > { %v4228_v60 = vmul.f32 0.3275911, %v4212_v54  ;;  %v4526_v42 = vmul.f32 %v4510_v6, %v8199_v24  ;;  %v4511_v22 = vsub.f32 1.0, %v4495_v49  ;;  %vm4179_vm13 = vcmp.ge.f32.partialorder %v8261_v25, 0.0 }
0x124a   : > { %v4370_v33 = vadd.f32 -0.28449672, %v4354_v7  ;;  %v8349_v19 = vmul.f32 0.70710677, %v8344_v47  ;;  %v4512_v32 = vsub.f32 1.0, %v4496_v27  ;;  %v8354_v11 = vadd.f32 %v8146_v53, %v8049_v0 }
0x124b   : > { %v4244_v8 = vadd.f32 1.0, %v4228_v60  ;;  %v4401_v26 = vadd.f32 0.2548296, %v4385_v59  ;;  %6578 = vpow2.f32 %v4473_v5  ;;  %v4451_v10 = vmul.f32 %v4435_v35, %v8275_v28 }
0x124c   : > { %v4386_v38 = vmul.f32 %v8277_v39, %v4370_v33  ;;  %v4213_v24 = vand.u32 2147483647, %v8349_v19  ;;  %v4556_v25 = vmul.f32 %v4540_v2, %v8114_v31  ;;  %v8362_v63 = vmul.f32 %v4541_v61, %v8159_v52 }
0x124d   : > { %v8358_v36 = vpop.eup %6574  ;;  %v8365_v46 = vsel %vm4179_vm13, 1.0, %v8693_v58  ;;  %6580 = vrcp.f32 %v4244_v8  ;;  %v4542_v40 = vadd.f32 1.0, %v4526_v42  ;;  %v4527_v53 = vmul.f32 %v4511_v22, %v8221_v15 }
0x124e   : > { %v4291_v6 = vmul.f32 1.0614054, %v8358_v36  ;;  %v4229_v49 = vmul.f32 0.3275911, %v4213_v24  ;;  %v4528_v28 = vmul.f32 %v4512_v32, %v8268_v13  ;;  %v4402_v27 = vadd.f32 0.2548296, %v4386_v38 }
0x124f   : > { %v8371_v7 = vmul.f32 0.5, %v8237_v14  ;;  %v8375_v31 = vadd.f32 %v8148_v43, %v8051_v3  ;;  %v4417_v52 = vmul.f32 %v8252_v57, %v4401_v26  ;;  %v4475_v5 = vmul.f32 1.442695, %v4451_v10 }
0x1250   : > { %v4307_v59 = vadd.f32 -1.4531521, %v4291_v6  ;;  %v4245_v35 = vadd.f32 1.0, %v4229_v49  ;;  %v6577_v2 = vpop.eup %6576  ;;  %v4436_v15 = vsub.f32 0.0, %v4212_v54  ;;  %v8380_v61 = vadd.f32 %v8135_v44, %v8080_v23 }
0x1251   : > { %v8383_v13 = vmul.f32 0.70710677, %v8375_v31  ;;  %v8387_v14 = vadd.f32 %v8294_v20, %v8047_v41  ;;  %v8390_v43 = vmul.f32 %v4542_v40, %v8181_v34  ;;  %v4543_v57 = vadd.f32 1.0, %v4527_v53 }
0x1252   : > { %v4323_v33 = vmul.f32 %v8358_v36, %v4307_v59  ;;  %6582 = vrcp.f32 %v4245_v35  ;;  %v4544_v60 = vadd.f32 1.0, %v4528_v28  ;;  %v4418_v42 = vmul.f32 %v8277_v39, %v4402_v27 }
0x1253   : > { %vm4180_vm14 = vcmp.ge.f32.partialorder %v8328_v56, 0.0  ;;  %v4214_v44 = vand.u32 2147483647, %v8383_v13  ;;  %v4497_v22 = vmul.f32 %v6577_v2, %v4417_v52  ;;  %6584 = vpow2.f32 %v4475_v5  ;;  %v8694_v5 = vld [vmem:[#allocation10_spill] sm:$0xff] }
0x1254   : > { %v4339_v32 = vadd.f32 1.4214138, %v4323_v33  ;;  %v8397_v20 = vmul.f32 0.70710677, %v8387_v14  ;;  %v4452_v38 = vmul.f32 %v4436_v15, %v4212_v54  ;;  %v4437_v34 = vsub.f32 0.0, %v4213_v24 }
0x1255   : > { %v4230_v8 = vmul.f32 0.3275911, %v4214_v44  ;;  %v8401_v26 = vadd.f32 %v8296_v17, %v8049_v0  ;;  %v6579_v10 = vpop.eup %6578  ;;  %v8405_v56 = vsel %vm4180_vm14, 1.0, %v8693_v58  ;;  %v8410_v53 = vadd.f32 %v8298_v51, %v8051_v3 }
0x1256   : > { %v4355_v39 = vmul.f32 %v8358_v36, %v4339_v32  ;;  %v4215_v40 = vand.u32 2147483647, %v8397_v20  ;;  %v8415_v54 = vmul.f32 %v4543_v57, %v8191_v12  ;;  %v8418_v17 = vmul.f32 %v4544_v60, %v8215_v50 }
0x1257   : > { %v8412_v6 = vpop.eup %6580  ;;  %v4498_v49 = vmul.f32 %v6579_v10, %v4418_v42  ;;  %v4246_v28 = vadd.f32 1.0, %v4230_v8  ;;  %v4572_v35 = vmul.f32 %v4556_v25, %v8694_v5  ;;  %v4513_v2 = vsub.f32 1.0, %v4497_v22 }
0x1258   : > { %v4371_v27 = vadd.f32 -0.28449672, %v4355_v39  ;;  %v4292_v52 = vmul.f32 1.0614054, %v8412_v6  ;;  %v4231_v59 = vmul.f32 0.3275911, %v4215_v40  ;;  %v4453_v51 = vmul.f32 %v4437_v34, %v4213_v24 }
0x1259   : > { %v4477_v15 = vmul.f32 1.442695, %v4452_v38  ;;  %6586 = vrcp.f32 %v4246_v28  ;;  %vm4181_vm15 = vcmp.ge.f32.partialorder %v8349_v19, 0.0  ;;  %v4438_v12 = vsub.f32 0.0, %v4214_v44  ;;  %4690 = vmatprep.mubr.f32.mxu1 %v4572_v35 }
0x125a   : > { %v4387_v33 = vmul.f32 %v8358_v36, %v4371_v27  ;;  %v4308_v32 = vadd.f32 -1.4531521, %v4292_v52  ;;  %v4247_v50 = vadd.f32 1.0, %v4231_v59  ;;  %v4514_v57 = vsub.f32 1.0, %v4498_v49  ;;  %4691 = vmatmul.mubr.f32.vlgmr.msra.gmra.mrb[68].mxu1 %v8280_v30 }
0x125b   : > { %v4439_v60 = vsub.f32 0.0, %v4215_v40  ;;  %v8425_v42 = vmul.f32 0.70710677, %v8410_v53  ;;  %v8430_v25 = vadd.f32 %v8308_v37, %v8080_v23  ;;  %v8437_v34 = vadd.f32 %v8310_v4, %v8047_v41 }
0x125c   : > { %v8432_v24 = vpop.eup %6582  ;;  %v4403_v22 = vadd.f32 0.2548296, %v4387_v33  ;;  %v4324_v38 = vmul.f32 %v8412_v6, %v4308_v32  ;;  %6588 = vrcp.f32 %v4247_v50  ;;  %v4529_v8 = vmul.f32 %v4513_v2, %v8315_v9 }
0x125d   : > { %6590 = vpow2.f32 %v4477_v15  ;;  %v4293_v10 = vmul.f32 1.0614054, %v8432_v24  ;;  %v8443_v30 = vadd.f32 %v8321_v45, %v8049_v0  ;;  %v6585_v37 = vpop.eup %6584  ;;  %v4454_v28 = vmul.f32 %v4438_v12, %v4214_v44 }
0x125e   : > { %v4419_v39 = vmul.f32 %v8358_v36, %v4403_v22  ;;  %v4340_v49 = vadd.f32 1.4214138, %v4324_v38  ;;  %v4216_v27 = vand.u32 2147483647, %v8425_v42  ;;  %v4479_v59 = vmul.f32 1.442695, %v4453_v51 }
0x125f   : > { %v4309_v52 = vadd.f32 -1.4531521, %v4293_v10  ;;  %v4455_v41 = vmul.f32 %v4439_v60, %v4215_v40  ;;  %v8448_v4 = vmul.f32 0.70710677, %v8437_v34  ;;  %v4530_v9 = vmul.f32 %v4514_v57, %v8333_v29 }
0x1260   : > { %v4499_v5 = vmul.f32 %v6585_v37, %v4419_v39  ;;  %v4356_v35 = vmul.f32 %v8412_v6, %v4340_v49  ;;  %v4232_v0 = vmul.f32 0.3275911, %v4216_v27  ;;  %v4545_v45 = vadd.f32 1.0, %v4529_v8 }
0x1261   : > { %v4325_v2 = vmul.f32 %v8432_v24, %v4309_v52  ;;  %v8454_v36 = vand.u32 2147483647, %v8448_v4  ;;  %v8458_v44 = vadd.f32 %v8323_v16, %v8051_v3  ;;  %v4481_v51 = vmul.f32 1.442695, %v4454_v28 }
0x1262   : > { %v4515_v40 = vsub.f32 1.0, %v4499_v5  ;;  %v4372_v15 = vadd.f32 -0.28449672, %v4356_v35  ;;  %v4248_v33 = vadd.f32 1.0, %v4232_v0  ;;  %6592 = vpow2.f32 %v4479_v59 }
0x1263   : > { %v8460_v32 = vpop.eup %6586  ;;  %v4341_v29 = vadd.f32 1.4214138, %v4325_v2  ;;  %v4483_v12 = vmul.f32 1.442695, %v4455_v41  ;;  %v4233_v50 = vmul.f32 0.3275911, %v8454_v36  ;;  %v4561_v37 = vmul.f32 %v4545_v45, %v8284_v62 }
0x1264   : > { %v4546_v57 = vadd.f32 1.0, %v4530_v9  ;;  %v4388_v60 = vmul.f32 %v8412_v6, %v4372_v15  ;;  %v4294_v22 = vmul.f32 1.0614054, %v8460_v32  ;;  %6594 = vrcp.f32 %v4248_v33 }
0x1265   : > { %v4531_v3 = vmul.f32 %v4515_v40, %v8365_v46  ;;  %v8469_v16 = vsel %vm4181_vm15, 1.0, %v8693_v58  ;;  %v4357_v38 = vmul.f32 %v8432_v24, %v4341_v29  ;;  %v4249_v8 = vadd.f32 1.0, %v4233_v50  ;;  %v8695_v40 = vld [vmem:[#allocation11_spill] sm:$0xff] }
0x1266   : > { %v8472_v10 = vpop.eup %6588  ;;  %v4404_v39 = vadd.f32 0.2548296, %v4388_v60  ;;  %v4310_v49 = vadd.f32 -1.4531521, %v4294_v22  ;;  %6596 = vpow2.f32 %v4481_v51  ;;  %v4440_v46 = vsub.f32 0.0, %v4216_v27  ;;  %v8696_v51 = vld [vmem:[#allocation13_spill] sm:$0xff] }
0x1267   : > { %v6591_v28 = vpop.eup %6590  ;;  %v4373_v52 = vadd.f32 -0.28449672, %v4357_v38  ;;  %v4295_v59 = vmul.f32 1.0614054, %v8472_v10  ;;  %6598 = vpow2.f32 %v4483_v12  ;;  %v4562_v19 = vmul.f32 %v4546_v57, %v8318_v21  ;;  %v8697_v22 = vld [vmem:[#allocation12_spill] sm:$0xff] }
0x1268   : > { %v4420_v41 = vmul.f32 %v8412_v6, %v4404_v39  ;;  %v4326_v9 = vmul.f32 %v8460_v32, %v4310_v49  ;;  %6600 = vrcp.f32 %v4249_v8  ;;  %v4547_v5 = vadd.f32 1.0, %v4531_v3 }
0x1269   : > { %v4389_v35 = vmul.f32 %v8432_v24, %v4373_v52  ;;  %v4311_v62 = vadd.f32 -1.4531521, %v4295_v59  ;;  %v8481_v0 = vmul.f32 0.70710677, %v8458_v44  ;;  %v4574_v15 = vmul.f32 %v8390_v43, %v8695_v40  ;;  %v8698_v52 = vld [vmem:[#allocation15_spill] sm:$0xff] }
0x126a   : > { %v4500_v45 = vmul.f32 %v6591_v28, %v4420_v41  ;;  %v4342_v2 = vadd.f32 1.4214138, %v4326_v9  ;;  %v4573_v21 = vmul.f32 %v8362_v63, %v8696_v51  ;;  %v4456_v29 = vmul.f32 %v4440_v46, %v4216_v27  ;;  %v8699_v46 = vld [vmem:[#allocation14_spill] sm:$0xff]  ;;  %v4740_v51 = vld [vmem:[%s8650_s18 + $0x8] sm:$0xff] }
0x126b   : > { %v4405_v33 = vadd.f32 0.2548296, %v4389_v35  ;;  %v4327_v6 = vmul.f32 %v8472_v10, %v4311_v62  ;;  %v8489_v12 = vand.u32 2147483647, %v8481_v0  ;;  %v4441_v60 = vsub.f32 0.0, %v8454_v36  ;;  %4695 = vmatprep.mubr.f32.mxu1 %v4574_v15 }
0x126c   : > { %v4516_v50 = vsub.f32 1.0, %v4500_v45  ;;  %v4358_v57 = vmul.f32 %v8460_v32, %v4342_v2  ;;  %v4576_v3 = vmul.f32 %v8418_v17, %v8697_v22  ;;  %v6593_v43 = vpop.eup %6592  ;;  %v4563_v38 = vmul.f32 %v4547_v5, %v8336_v48  ;;  %4696 = vmatmul.mubr.f32.gmra.mrb[70].mxu1 %v4573_v21  ;;  %v4739_v2 = vld [vmem:[%s8650_s18] sm:$0xff] }
0x126d   : > { %v4421_v63 = vmul.f32 %v8432_v24, %v4405_v33  ;;  %v4343_v8 = vadd.f32 1.4214138, %v4327_v6  ;;  %v4234_v27 = vmul.f32 0.3275911, %v8489_v12  ;;  %v4575_v59 = vmul.f32 %v8415_v54, %v8698_v52 }
0x126e   : > { %v8498_v39 = vpop.eup %6594  ;;  %v4532_v49 = vmul.f32 %v4516_v50, %v8405_v56  ;;  %v4374_v28 = vadd.f32 -0.28449672, %v4358_v57  ;;  %4700 = vmatprep.mubr.f32.mxu1 %v4576_v3  ;;  %v4578_v17 = vmul.f32 %v4562_v19, %v8699_v46  ;;  %v4485_v45 = vmul.f32 1.442695, %v4456_v29 }
0x126f   : > { %v4501_v41 = vmul.f32 %v6593_v43, %v4421_v63  ;;  %v4359_v48 = vmul.f32 %v8472_v10, %v4343_v8  ;;  %v4296_v24 = vmul.f32 1.0614054, %v8498_v39  ;;  %v4250_v9 = vadd.f32 1.0, %v4234_v27  ;;  %v8700_v63 = vld [vmem:[#allocation16_spill] sm:$0xff] }
0x1270   : > { %v6597_v5 = vpop.eup %6596  ;;  %v4548_v35 = vadd.f32 1.0, %v4532_v49  ;;  %v4390_v62 = vmul.f32 %v8460_v32, %v4374_v28  ;;  %v4577_v56 = vmul.f32 %v4561_v37, %v8248_v18  ;;  %4701 = vmatmul.mubr.f32.gmra.mrb[72].mxu1 %v4575_v59  ;;  %v4457_v18 = vmul.f32 %v4441_v60, %v8454_v36 }
0x1271   : > { %v6599_v54 = vpop.eup %6598  ;;  %v4517_v40 = vsub.f32 1.0, %v4501_v41  ;;  %v4375_v19 = vadd.f32 -0.28449672, %v4359_v48  ;;  %v4312_v15 = vadd.f32 -1.4531521, %v4296_v24  ;;  %6602 = vrcp.f32 %v4250_v9  ;;  %4705 = vmatprep.mubr.f32.mxu1 %v4578_v17 }
0x1272   : > { %v8514_v21 = vpop.eup %6600  ;;  %v4564_v33 = vmul.f32 %v4548_v35, %v8371_v7  ;;  %v4406_v6 = vadd.f32 0.2548296, %v4390_v62  ;;  %v4579_v37 = vmul.f32 %v4563_v38, %v8304_v1  ;;  %v4149_v3 = vmul.f32 0.5, %v8344_v47 }
0x1273   : > { %v4533_v29 = vmul.f32 %v4517_v40, %v8469_v16  ;;  %v4391_v50 = vmul.f32 %v8472_v10, %v4375_v19  ;;  %v4328_v57 = vmul.f32 %v8498_v39, %v4312_v15  ;;  %v4297_v22 = vmul.f32 1.0614054, %v8514_v21 }
0x1274   : > { %v4422_v43 = vmul.f32 %v8460_v32, %v4406_v6  ;;  %v4580_v7 = vmul.f32 %v4564_v33, %v8700_v63  ;;  %v6177_v8 = vpack.c.bf16 %v4740_v51, %v4739_v2  ;;  %vm4182_vm0 = vcmp.ge.f32.partialorder %v8383_v13, 0.0  ;;  %4706 = vmatmul.mubr.f32.gmra.mrb[74].mxu1 %v4577_v56 }
0x1275   : > { %v4549_v27 = vadd.f32 1.0, %v4533_v29  ;;  %v4407_v36 = vadd.f32 0.2548296, %v4391_v50  ;;  %v4344_v1 = vadd.f32 1.4214138, %v4328_v57  ;;  %6604 = vpow2.f32 %v4485_v45 }
0x1276   : > { %v4502_v16 = vmul.f32 %v6597_v5, %v4422_v43  ;;  %v4313_v60 = vadd.f32 -1.4531521, %v4297_v22  ;;  %v4487_v38 = vmul.f32 1.442695, %v4457_v18  ;;  %4710 = vmatprep.mubr.f32.mxu1 %v4580_v7  ;;  %6178 = vmatprep.subr.bf16.mxu0 %v6177_v8  ;;  %v4442_v28 = vsub.f32 0.0, %v8489_v12 }
0x1277   : > { %v4565_v49 = vmul.f32 %v4549_v27, %v4149_v3  ;;  %v4423_v47 = vmul.f32 %v8472_v10, %v4407_v36  ;;  %v4360_v32 = vmul.f32 %v8498_v39, %v4344_v1  ;;  %6180 = vmatpush3.bf16.msra.mxu0 %v6177_v8  ;;  %v4198_v52 = vsel %vm4182_vm0, 1.0, %v8693_v58 }
0x1278   : > { %v4518_v13 = vsub.f32 1.0, %v4502_v16  ;;  %v4329_v59 = vmul.f32 %v8514_v21, %v4313_v60  ;;  %vm4183_vm2 = vcmp.ge.f32.partialorder %v8397_v20, 0.0  ;;  %4711 = vmatmul.mubr.f32.gmra.mrb[76].mxu1 %v4579_v37  ;;  %v4150_v48 = vmul.f32 0.5, %v8375_v31 }
0x1279   : > { %v4503_v46 = vmul.f32 %v6599_v54, %v4423_v47  ;;  %v4376_v17 = vadd.f32 -0.28449672, %v4360_v32  ;;  %v4581_v41 = vmul.f32 %v4565_v49, %v8380_v61  ;;  %6606 = vpow2.f32 %v4487_v38 }
0x127a   : > { %v4534_v10 = vmul.f32 %v4518_v13, %v4198_v52  ;;  %v4345_v24 = vadd.f32 1.4214138, %v4329_v59  ;;  %v4458_v62 = vmul.f32 %v4442_v28, %v8489_v12  ;;  %v4199_v56 = vsel %vm4183_vm2, 1.0, %v8693_v58 }
0x127b   : > { %v6603_v9 = vpop.eup %6602  ;;  %v4519_v5 = vsub.f32 1.0, %v4503_v46  ;;  %v4392_v35 = vmul.f32 %v8498_v39, %v4376_v17  ;;  %v4151_v15 = vmul.f32 0.5, %v8387_v14  ;;  %v4016_v50 = vadd.f32 %v8289_v55, %v8080_v23 }
0x127c   : > { %v4550_v45 = vadd.f32 1.0, %v4534_v10  ;;  %v4361_v20 = vmul.f32 %v8514_v21, %v4345_v24  ;;  %v4298_v2 = vmul.f32 1.0614054, %v6603_v9  ;;  %v4489_v6 = vmul.f32 1.442695, %v4458_v62  ;;  %v4742_v24 = vld [vmem:[%s8650_s18 + $0x18] sm:$0xff] }
0x127d   : > { %v4535_v54 = vmul.f32 %v4519_v5, %v4199_v56  ;;  %v4408_v40 = vadd.f32 0.2548296, %v4392_v35  ;;  %vm4184_vm3 = vcmp.ge.f32.partialorder %v8425_v42, 0.0  ;;  %vm4185_vm4 = vcmp.ge.f32.partialorder %v8448_v4, 0.0  ;;  %v4746_v5 = vld [vmem:[%s8650_s18 + $0x38] sm:$0xff] }
0x127e   : > { %v4566_v61 = vmul.f32 %v4550_v45, %v4150_v48  ;;  %v4377_v19 = vadd.f32 -0.28449672, %v4361_v20  ;;  %v4314_v31 = vadd.f32 -1.4531521, %v4298_v2  ;;  %6608 = vpow2.f32 %v4489_v6  ;;  %v5167_v45 = vld [vmem:[%s8649_s17] ss:$0 sm:$0xff] }
0x127f   : > { %v4551_v51 = vadd.f32 1.0, %v4535_v54  ;;  %v4424_v33 = vmul.f32 %v8498_v39, %v4408_v40  ;;  %v6605_v18 = vpop.eup %6604  ;;  %v4200_v63 = vsel %vm4184_vm3, 1.0, %v8693_v58  ;;  %v4152_v42 = vmul.f32 0.5, %v8410_v53  ;;  %v8701_v54 = vld [vmem:[#allocation3_spill] sm:$0xff]  ;;  %v8702_v6 = vld [vmem:[#allocation2_spill] sm:$0xff] }
0x1280   : > { %v4393_v12 = vmul.f32 %v8514_v21, %v4377_v19  ;;  %v4330_v37 = vmul.f32 %v6603_v9, %v4314_v31  ;;  %v4582_v29 = vmul.f32 %v4566_v61, %v8354_v11  ;;  %v4201_v38 = vsel %vm4185_vm4, 1.0, %v8693_v58 }
0x1281   : > { %v4567_v57 = vmul.f32 %v4551_v51, %v4151_v15  ;;  %v4504_v22 = vmul.f32 %v6605_v18, %v4424_v33  ;;  %vm4186_vm5 = vcmp.ge.f32.partialorder %v8481_v0, 0.0  ;;  %v4154_v48 = vmul.f32 0.5, %v8458_v44  ;;  %v4741_v0 = vld [vmem:[%s8650_s18 + $0x10] sm:$0xff] }
0x1282   : > { %v4409_v3 = vadd.f32 0.2548296, %v4393_v12  ;;  %v4346_v43 = vadd.f32 1.4214138, %v4330_v37  ;;  %4715 = vmatprep.mubr.f32.mxu1 %v4582_v29  ;;  %v4202_v17 = vsel %vm4186_vm5, 1.0, %v8693_v58  ;;  %v4743_v58 = vld [vmem:[%s8650_s18 + $0x20] sm:$0xff] }
0x1283   : > { %v4520_v14 = vsub.f32 1.0, %v4504_v22  ;;  %4716 = vmatmul.mubr.f32.gmra.mrb[78].mxu1 %v4581_v41  ;;  %v4583_v39 = vmul.f32 %v4567_v57, %v4016_v50  ;;  %v6607_v11 = vpop.eup %6606  ;;  %v8703_v57 = vld [vmem:[#allocation5_spill] sm:$0xff] }
0x1284   : > { %v4425_v7 = vmul.f32 %v8514_v21, %v4409_v3  ;;  %v4362_v8 = vmul.f32 %v6603_v9, %v4346_v43  ;;  %v4153_v21 = vmul.f32 0.5, %v8437_v34 }
0x1285   : > { %v4536_v27 = vmul.f32 %v4520_v14, %v4200_v63  ;;  %v8704_v63 = vld [vmem:[#allocation4_spill] sm:$0xff] }
0x1286   : > { %v4505_v23 = vmul.f32 %v6607_v11, %v4425_v7  ;;  %v4378_v55 = vadd.f32 -0.28449672, %v4362_v8 }
0x1287   : > { %v4552_v36 = vadd.f32 1.0, %v4536_v27  ;;  %v8705_v27 = vld [vmem:[#allocation7_spill] sm:$0xff] }
0x1288   : > { %v4521_v1 = vsub.f32 1.0, %v4505_v23  ;;  %v4394_v16 = vmul.f32 %v6603_v9, %v4378_v55  ;;  %v6609_v13 = vpop.eup %6608 }
0x1289   : > { %v4568_v60 = vmul.f32 %v4552_v36, %v4152_v42 }
0x128a   : > { %v4537_v49 = vmul.f32 %v4521_v1, %v4201_v38  ;;  %v4410_v47 = vadd.f32 0.2548296, %v4394_v16  ;;  %v8706_v16 = vld [vmem:[#allocation6_spill] sm:$0xff] }
0x128b   : > { %v4584_v32 = vmul.f32 %v4568_v60, %v8401_v26 }
0x128c   : > { %v4553_v28 = vadd.f32 1.0, %v4537_v49  ;;  %v4426_v52 = vmul.f32 %v6603_v9, %v4410_v47  ;;  %v4745_v9 = vld [vmem:[%s8650_s18 + $0x30] sm:$0xff] }
0x128d   : > { %4720 = vmatprep.mubr.f32.mxu1 %v4584_v32  ;;  %v6189_v35 = vpack.c.bf16 %v4746_v5, %v4745_v9 }
0x128e   : > { %v4569_v4 = vmul.f32 %v4553_v28, %v4153_v21  ;;  %v4506_v53 = vmul.f32 %v6609_v13, %v4426_v52  ;;  %4721 = vmatmul.mubr.f32.gmra.mrb[80].mxu1 %v4583_v39  ;;  %v8707_v21 = vld [vmem:[#allocation9_spill] sm:$0xff] }
0x1290   : > { %v4522_v59 = vsub.f32 1.0, %v4506_v53  ;;  %v4585_v46 = vmul.f32 %v4569_v4, %v8430_v25  ;;  %v6181_v25 = vpack.c.bf16 %v4742_v24, %v4741_v0 }
0x1292   : > { %v4538_v41 = vmul.f32 %v4522_v59, %v4202_v17  ;;  %6182 = vmatprep.subr.bf16.mxu0 %v6181_v25  ;;  %v8708_v59 = vld [vmem:[#allocation8_spill] sm:$0xff]  ;;  %v5168_v17 = vld [vmem:[%s8651_s19] ss:$0 sm:$0xff] }
0x1293   : > { %6184 = vmatpush3.bf16.msra.mxu0 %v6181_v25 }
0x1294   : > { %v4554_v26 = vadd.f32 1.0, %v4538_v41 }
0x1296   : > { %v4570_v10 = vmul.f32 %v4554_v26, %v4154_v48 }
0x1298   : > { %v4586_v34 = vmul.f32 %v4570_v10, %v8443_v30  ;;  %v4744_v30 = vld [vmem:[%s8650_s18 + $0x28] sm:$0xff] }
0x1299   : > { %v6185_v44 = vpack.c.bf16 %v4744_v30, %v4743_v58 }
0x129a   : > { %4725 = vmatprep.mubr.f32.mxu1 %v4586_v34 }
0x129b   : > { %4726 = vmatmul.mubr.f32.gmra.mrb[82].mxu1 %v4585_v46  ;;  %6186 = vmatprep.subr.bf16.mxu0 %v6185_v44 }
0x129c   : > { %6188 = vmatpush3.bf16.msra.mxu0 %v6185_v44 }
0x129d   : > { %6190 = vmatprep.subr.bf16.mxu0 %v6189_v35 }
0x12a0   : > { %6192 = vmatpush3.bf16.msra.mxu0 %v6189_v35 }
0x132d   : > { %v5425_v62 = vpop.f32.mrb[68].mxu1 }
0x132e   : > { %v5426_v56 = vpop.f32.mrb[69].mxu1 }
0x132f   : > { %v5427_v20 = vadd.f32 %v5426_v56, %v5425_v62 }
0x1331   : > { %v4693_v2 = vadd.f32 %v5427_v20, %v5167_v45  ;;  %v6610_v20 = vld [vmem:[%s6758_s3] sm:$0xff] }
0x1333   : > { %v4731_v40 = vadd.f32 %v8701_v54, %v4693_v2 }
0x1335   : > { %5857 = vmatprep.mubr.msk.f32.mxu0 %vm670_vm1, %v4731_v40  ;;  %v6611_v40 = vld [vmem:[%s6758_s3 + $0x8] sm:$0xff] }
0x133f   : > { %v5428_v61 = vpop.f32.mrb[70].mxu1 }
0x1340   : > { %v5429_v19 = vpop.f32.mrb[71].mxu1 }
0x1341   : > { %v5430_v31 = vadd.f32 %v5429_v19, %v5428_v61 }
0x1343   : > { %v4698_v15 = vadd.f32 %v5430_v31, %v5167_v45  ;;  %v5431_v51 = vpop.f32.mrb[72].mxu1  ;;  %v6612_v31 = vld [vmem:[%s6758_s3 + $0x10] sm:$0xff] }
0x1344   : > { %v5432_v33 = vpop.f32.mrb[73].mxu1 }
0x1345   : > { %v4732_v18 = vadd.f32 %v8702_v6, %v4698_v15  ;;  %v5433_v12 = vadd.f32 %v5432_v33, %v5431_v51  ;;  %v6613_v33 = vld [vmem:[%s6758_s3 + $0x18] sm:$0xff] }
0x1347   : > { %v4703_v37 = vadd.f32 %v5433_v12, %v5167_v45  ;;  %v5434_v29 = vpop.f32.mrb[74].mxu1  ;;  %5858 = vmatmul.mubr.msk.f32.vlgmr.msra.gmra.mrb[68].mxu0 %vm670_vm1, %v4732_v18  ;;  %v6614_v12 = vld [vmem:[%s6758_s3 + $0x20] sm:$0xff] }
0x1348   : > { %v5435_v50 = vpop.f32.mrb[75].mxu1 }
0x1349   : > { %v4733_v22 = vadd.f32 %v8703_v57, %v4703_v37  ;;  %v5436_v3 = vadd.f32 %v5435_v50, %v5434_v29  ;;  %v6615_v50 = vld [vmem:[%s6758_s3 + $0x28] sm:$0xff] }
0x134b   : > { %v4708_v43 = vadd.f32 %v5436_v3, %v5167_v45  ;;  %v5437_v14 = vpop.f32.mrb[76].mxu1  ;;  %5860 = vmatprep.mubr.msk.f32.mxu0 %vm670_vm1, %v4733_v22  ;;  %v6616_v3 = vld [vmem:[%s6758_s3 + $0x30] sm:$0xff] }
0x134c   : > { %v5438_v39 = vpop.f32.mrb[77].mxu1 }
0x134d   : > { %v4734_v7 = vadd.f32 %v8704_v63, %v4708_v43  ;;  %v5439_v8 = vadd.f32 %v5438_v39, %v5437_v14  ;;  %v6617_v39 = vld [vmem:[%s6758_s3 + $0x38] sm:$0xff] }
0x134f   : > { %v4713_v11 = vadd.f32 %v5439_v8, %v5167_v45  ;;  %5861 = vmatmul.mubr.msk.f32.gmra.mrb[70].mxu0 %vm670_vm1, %v4734_v7 }
0x1351   : > { %v4735_v23 = vadd.f32 %v8705_v27, %v4713_v11 }
0x1353   : > { %5863 = vmatprep.mubr.msk.f32.mxu0 %vm670_vm1, %v4735_v23 }
0x1356   : > { %v5440_v55 = vpop.f32.mrb[78].mxu1 }
0x1357   : > { %v5441_v42 = vpop.f32.mrb[79].mxu1 }
0x1358   : > { %v5442_v36 = vadd.f32 %v5441_v42, %v5440_v55 }
0x135a   : > { %v4718_v1 = vadd.f32 %v5442_v36, %v5167_v45 }
0x135c   : > { %v4736_v60 = vadd.f32 %v8706_v16, %v4718_v1 }
0x135e   : > { %5864 = vmatmul.mubr.msk.f32.gmra.mrb[72].mxu0 %vm670_vm1, %v4736_v60 }
0x1361   : > { %v5443_v38 = vpop.f32.mrb[80].mxu1 }
0x1362   : > { %v5444_v49 = vpop.f32.mrb[81].mxu1 }
0x1363   : > { %v5445_v47 = vadd.f32 %v5444_v49, %v5443_v38 }
0x1365   : > { %v4723_v32 = vadd.f32 %v5445_v47, %v5167_v45 }
0x1367   : > { %v4737_v28 = vadd.f32 %v8707_v21, %v4723_v32 }
0x1369   : > { %5866 = vmatprep.mubr.msk.f32.mxu0 %vm670_vm1, %v4737_v28 }
0x136e   : > { %v5446_v52 = vpop.f32.mrb[82].mxu1 }
0x136f   : > { %v5447_v13 = vpop.f32.mrb[83].mxu1 }
0x1370   : > { %v5448_v4 = vadd.f32 %v5447_v13, %v5446_v52 }
0x1372   : > { %v4728_v53 = vadd.f32 %v5448_v4, %v5167_v45 }
0x1374   : > { %v4738_v46 = vadd.f32 %v8708_v59, %v4728_v53 }
0x1376   : > { %5867 = vmatmul.mubr.msk.f32.gmra.mrb[74].mxu0 %vm670_vm1, %v4738_v46 }
0x141a   : > { %v5859_v41 = vpop.f32.mrb[68].mxu0 }
0x141b   : > { %v4844_v48 = vpop.f32.mrb[69].mxu0  ;;  %v4850_v10 = vadd.f32 %v5859_v41, %v5168_v17 }
0x141c   : > { %v4845_v26 = vadd.f32 %v5168_v17, %v4844_v48 }
0x141e   : > { %4883 = vxpose.xlu1.b32.start [1/8] (short) (narrow) %v4845_v26, 64 }
0x1422   : > { %v5862_v34 = vpop.f32.mrb[70].mxu0  ;;  %4884 = vxpose.xlu1.b32.cont [2/8] (short) (narrow) %v4850_v10, 64 }
0x1423   : > { %v4854_v0 = vpop.f32.mrb[71].mxu0  ;;  %v4860_v25 = vadd.f32 %v5862_v34, %v5168_v17 }
0x1424   : > { %v4855_v24 = vadd.f32 %v5168_v17, %v4854_v0 }
0x1426   : > { %4885 = vxpose.xlu1.b32.cont [3/8] (short) (narrow) %v4855_v24, 64 }
0x142a   : > { %4886 = vxpose.xlu1.b32.cont [4/8] (short) (narrow) %v4860_v25, 64 }
0x1431   : > { %v5865_v58 = vpop.f32.mrb[72].mxu0 }
0x1432   : > { %v4864_v30 = vpop.f32.mrb[73].mxu0  ;;  %v4870_v9 = vadd.f32 %v5865_v58, %v5168_v17 }
0x1433   : > { %v4865_v44 = vadd.f32 %v5168_v17, %v4864_v30 }
0x1435   : > { %4887 = vxpose.xlu1.b32.cont [5/8] (short) (narrow) %v4865_v44, 64 }
0x1439   : > { %4888 = vxpose.xlu1.b32.cont [6/8] (short) (narrow) %v4870_v9, 64 }
0x1449   : > { %v5868_v5 = vpop.f32.mrb[74].mxu0 }
0x144a   : > { %v4874_v35 = vpop.f32.mrb[75].mxu0  ;;  %v4880_v45 = vadd.f32 %v5868_v5, %v5168_v17 }
0x144b   : > { %v4875_v62 = vadd.f32 %v5168_v17, %v4874_v35 }
0x144d   : > { %4889 = vxpose.xlu1.b32.cont [7/8] (short) (narrow) %v4875_v62, 64 }
0x1451   : > { %4890 = vxpose.xlu1.b32.end [8/8] (short) (narrow) %v4880_v45, 64 }
0x14b5   : > { %v4899_v56 = vpop.trf.xlu1 }
0x14b6   : > { %v4915_v2 = vadd.f32 %v6610_v20, %v4899_v56 }
0x14b8   : > { %4923 = vst.msk [vmem:[%s8603_s24] sm:$0xff] %vm670_vm1, %v4915_v2 }
0x14b9   : > { %v4900_v54 = vpop.trf.xlu1 }
0x14ba   : > { %v4916_v61 = vadd.f32 %v6611_v40, %v4900_v54 }
0x14bc   : > { %4924 = vst.msk [vmem:[%s8603_s24 + $0x8] sm:$0xff] %vm670_vm1, %v4916_v61 }
0x14bd   : > { %v4901_v19 = vpop.trf.xlu1 }
0x14be   : > { %v4917_v15 = vadd.f32 %v6612_v31, %v4901_v19 }
0x14c0   : > { %4925 = vst.msk [vmem:[%s8603_s24 + $0x10] sm:$0xff] %vm670_vm1, %v4917_v15 }
0x14c1   : > { %v4902_v51 = vpop.trf.xlu1 }
0x14c2   : > { %v4918_v6 = vadd.f32 %v6613_v33, %v4902_v51 }
0x14c4   : > { %4926 = vst.msk [vmem:[%s8603_s24 + $0x18] sm:$0xff] %vm670_vm1, %v4918_v6 }
0x14c5   : > { %v4903_v18 = vpop.trf.xlu1 }
0x14c6   : > { %v4919_v37 = vadd.f32 %v6614_v12, %v4903_v18 }
0x14c8   : > { %4927 = vst.msk [vmem:[%s8603_s24 + $0x20] sm:$0xff] %vm670_vm1, %v4919_v37 }
0x14c9   : > { %v4904_v29 = vpop.trf.xlu1 }
0x14ca   : > { %v4920_v57 = vadd.f32 %v6615_v50, %v4904_v29 }
0x14cc   : > { %4928 = vst.msk [vmem:[%s8603_s24 + $0x28] sm:$0xff] %vm670_vm1, %v4920_v57 }
0x14cd   : > { %v4905_v22 = vpop.trf.xlu1 }
0x14ce   : > { %v4921_v43 = vadd.f32 %v6616_v3, %v4905_v22 }
0x14d0   : > { %4929 = vst.msk [vmem:[%s8603_s24 + $0x30] sm:$0xff] %vm670_vm1, %v4921_v43 }
0x14d1   : > { %v4906_v14 = vpop.trf.xlu1 }
0x14d2   : > { %v4922_v63 = vadd.f32 %v6617_v39, %v4906_v14 }
0x14d4   : > { %4930 = vst.msk [vmem:[%s8603_s24 + $0x38] sm:$0xff] %vm670_vm1, %v4922_v63 }
0x14d5 PF: > { %s30_s1 = sadd.s32 1, %s6624_s1  }
0x14d6   : > { %p27_p4 = scmp.ge.s32.totalorder %s30_s1, 4  }
0x14d8   :  { %29 = sbr.rel (!%p27_p4) target bundleno = 6 (0x6), region = 130 }

</bundles_post_ra>
